<compile_context>
chip_gen: v5e
topology: v5e:2x2
jax: 0.10.0
libtpu: 0.0.40
codegen_flags: <defaults>
</compile_context>

<pallas_src>
import math

import jax
import jax.numpy as jnp
from jax.experimental import pallas as pl
from jax.experimental.pallas import tpu as pltpu

BN_EPS = 1e-5
NEG = -1e9        # bias for padded class lanes -> exp() underflows to 0
LANE = 128        # pad feature / class dims to multiples of this
TM = 512          # node-row tile (output rows per grid step); sweep 256-1024
TK = 512          # reduction tile over the neighbor (node) axis; sweep 256-512


# ----------------------------- Pallas kernels ------------------------------ #

def _layer_hidden_kernel(a_ref, x_ref, w_ref, scale_ref, shift_ref, o_ref, acc_ref):
    # Fused GCN hidden layer tile:
    #   acc += A[i,k] @ ( X[k] @ W )    (both matmuls bf16 on the MXU, f32 acc)
    # epilogue: folded BN + bias + ReLU.
    k = pl.program_id(1)

    @pl.when(k == 0)
    def _():
        acc_ref[...] = jnp.zeros_like(acc_ref)

    xw = jnp.dot(x_ref[...], w_ref[...],
                 preferred_element_type=jnp.float32).astype(jnp.bfloat16)
    acc_ref[...] += jnp.dot(a_ref[...], xw, preferred_element_type=jnp.float32)

    @pl.when(k == pl.num_programs(1) - 1)
    def _():
        # BN(eval) + conv bias folded into scale/shift in the wrapper.
        h = acc_ref[...] * scale_ref[...] + shift_ref[...]
        # TODO(synk): dropout is identity in eval mode (training=False); no RNG needed.
        o_ref[...] = jnp.maximum(h, 0.0).astype(o_ref.dtype)


def _layer_final_kernel(a_ref, x_ref, w_ref, bias_ref, o_ref, acc_ref):
    # Fused final GCN layer tile + bias + log_softmax epilogue.
    k = pl.program_id(1)

    @pl.when(k == 0)
    def _():
        acc_ref[...] = jnp.zeros_like(acc_ref)

    xw = jnp.dot(x_ref[...], w_ref[...],
                 preferred_element_type=jnp.float32).astype(jnp.bfloat16)
    acc_ref[...] += jnp.dot(a_ref[...], xw, preferred_element_type=jnp.float32)

    @pl.when(k == pl.num_programs(1) - 1)
    def _():
        # bias_ref holds -1e9 in padded class lanes -> they vanish from the softmax.
        h = acc_ref[...] + bias_ref[...]
        m = jnp.max(h, axis=-1, keepdims=True)
        shifted = h - m
        lse = jnp.log(jnp.sum(jnp.exp(shifted), axis=-1, keepdims=True))
        o_ref[...] = shifted - lse


# ----------------------------- pallas_call wrappers ------------------------ #

def _round_up(x, m):
    return (x + m - 1) // m * m


def _pad2(a, rows, cols):
    return jnp.pad(a, ((0, rows - a.shape[0]), (0, cols - a.shape[1])))


def _pick_tiles(n_nodes, tm=TM, tk=TK):
    """Clamp tiles for small graphs and pad the node count to lcm(tm, tk)."""
    n128 = _round_up(n_nodes, LANE)
    tm = min(tm, n128)
    tk = min(tk, n128)
    n_p = _round_up(n_nodes, math.lcm(tm, tk))
    return n_p, tm, tk


def _a_blockspec(tm, tk, k_steps):
    # Deeper pipelining on the dominant (A_hat) HBM stream once the k grid is
    # deep enough to benefit; default double-buffering otherwise.
    idx = lambda i, k: (i, k)
    if k_steps >= 3:
        return pl.BlockSpec((tm, tk), idx, pipeline_mode=pl.Buffered(3))
    return pl.BlockSpec((tm, tk), idx)


def _layer_hidden(a_p, x_p, w_p, scale_row, shift_row, *, tm, tk):
    n_p = a_p.shape[0]
    fin_p, fout_p = w_p.shape
    k_steps = n_p // tk
    vec_spec = pl.BlockSpec((1, fout_p), lambda i, k: (0, 0))
    return pl.pallas_call(
        _layer_hidden_kernel,
        out_shape=jax.ShapeDtypeStruct((n_p, fout_p), jnp.bfloat16),
        grid=(n_p // tm, k_steps),
        in_specs=[
            _a_blockspec(tm, tk, k_steps),                       # A_hat tile
            pl.BlockSpec((tk, fin_p), lambda i, k: (k, 0)),      # X k-tile
            pl.BlockSpec((fin_p, fout_p), lambda i, k: (0, 0)),  # W (VMEM-resident)
            vec_spec,                                            # folded-BN scale
            vec_spec,                                            # folded-BN shift
        ],
        out_specs=pl.BlockSpec((tm, fout_p), lambda i, k: (i, 0)),
        scratch_shapes=[pltpu.VMEM((tm, fout_p), jnp.float32)],
        compiler_params=pltpu.CompilerParams(
            dimension_semantics=("parallel", "arbitrary")),
    )(a_p, x_p, w_p, scale_row, shift_row)


def _layer_final(a_p, x_p, w_p, bias_row, *, tm, tk):
    n_p = a_p.shape[0]
    fin_p, fout_p = w_p.shape
    k_steps = n_p // tk
    return pl.pallas_call(
        _layer_final_kernel,
        out_shape=jax.ShapeDtypeStruct((n_p, fout_p), jnp.float32),
        grid=(n_p // tm, k_steps),
        in_specs=[
            _a_blockspec(tm, tk, k_steps),                       # A_hat tile
            pl.BlockSpec((tk, fin_p), lambda i, k: (k, 0)),      # X k-tile
            pl.BlockSpec((fin_p, fout_p), lambda i, k: (0, 0)),  # W (VMEM-resident)
            pl.BlockSpec((1, fout_p), lambda i, k: (0, 0)),      # bias (+ -1e9 pads)
        ],
        out_specs=pl.BlockSpec((tm, fout_p), lambda i, k: (i, 0)),
        scratch_shapes=[pltpu.VMEM((tm, fout_p), jnp.float32)],
        compiler_params=pltpu.CompilerParams(
            dimension_semantics=("parallel", "arbitrary")),
    )(a_p, x_p, w_p, bias_row)


# ----------------------------- plain-JAX glue ------------------------------ #

def gcn_norm(adj):
    """PyG gcn_norm: A_hat = D^{-1/2} (A + I) D^{-1/2} (dense). Per-graph preprocessing."""
    n = adj.shape[0]
    a = adj + jnp.eye(n, dtype=adj.dtype)
    deg = jnp.sum(a, axis=1)
    d_inv_sqrt = jnp.where(deg > 0, 1.0 / jnp.sqrt(deg), 0.0)
    return a * d_inv_sqrt[:, None] * d_inv_sqrt[None, :]


def init_params(key, nfeat, nhid, nclass, num_layers):
    dims = [nfeat] + [nhid] * (num_layers - 1) + [nclass]
    hidden, keys = [], jax.random.split(key, num_layers * 2)
    for li in range(num_layers - 1):
        fin, fout = dims[li], dims[li + 1]
        wk, bk = keys[2 * li], keys[2 * li + 1]
        glorot = jnp.sqrt(6.0 / (fin + fout))
        hidden.append(dict(
            w=jax.random.uniform(wk, (fin, fout), jnp.float32, -glorot, glorot),
            b=jnp.zeros((fout,), jnp.float32),
            gamma=1.0 + 0.1 * jax.random.normal(bk, (fout,), jnp.float32),
            beta=0.1 * jax.random.normal(jax.random.fold_in(bk, 1), (fout,), jnp.float32),
            mean=0.1 * jax.random.normal(jax.random.fold_in(bk, 2), (fout,), jnp.float32),
            var=1.0 + 0.05 * jax.random.uniform(jax.random.fold_in(bk, 3), (fout,), jnp.float32),
        ))
    fin, fout = dims[-2], dims[-1]
    wk = keys[-2]
    glorot = jnp.sqrt(6.0 / (fin + fout))
    final = dict(
        w=jax.random.uniform(wk, (fin, fout), jnp.float32, -glorot, glorot),
        b=jnp.zeros((fout,), jnp.float32),
    )
    return dict(hidden=hidden, final=final)


def prepare_params(params, nclass):
    """One-time preprocessing: pad to 128 lanes, cast weights to bf16, fold BN+bias."""
    hidden = []
    for lp in params["hidden"]:
        fin, fout = lp["w"].shape
        fin_p, fout_p = _round_up(fin, LANE), _round_up(fout, LANE)
        w_p = _pad2(lp["w"], fin_p, fout_p).astype(jnp.bfloat16)
        scale = lp["gamma"] * jax.lax.rsqrt(lp["var"] + BN_EPS)
        shift = lp["beta"] + (lp["b"] - lp["mean"]) * scale
        hidden.append(dict(
            w=w_p,
            scale=_pad2(scale.reshape(1, -1), 1, fout_p).astype(jnp.float32),
            shift=_pad2(shift.reshape(1, -1), 1, fout_p).astype(jnp.float32),
        ))
    lp = params["final"]
    fin, fout = lp["w"].shape
    fin_p, fout_p = _round_up(fin, LANE), _round_up(fout, LANE)
    w_p = _pad2(lp["w"], fin_p, fout_p).astype(jnp.bfloat16)
    bias = jnp.full((1, fout_p), NEG, jnp.float32)
    bias = bias.at[0, :nclass].set(lp["b"].astype(jnp.float32))
    return dict(hidden=hidden, final=dict(w=w_p, b=bias))


def prepare_graph(x, a_hat, n_nodes, fin_p, *, tm=TM, tk=TK):
    """One-time graph preprocessing: pad + bf16-cast A_hat and X (hoisted out of forward)."""
    n_p, tm, tk = _pick_tiles(n_nodes, tm, tk)
    a_p = _pad2(a_hat, n_p, n_p).astype(jnp.bfloat16)
    x_p = _pad2(x, n_p, fin_p).astype(jnp.bfloat16)
    return dict(a=a_p, x=x_p, n_nodes=n_nodes, tm=tm, tk=tk)


def gcn_arxiv_forward(prepared, graph, nclass):
    a_p = graph["a"]
    h = graph["x"]
    tm, tk = graph["tm"], graph["tk"]

    for lp in prepared["hidden"]:
        h = _layer_hidden(a_p, h, lp["w"], lp["scale"], lp["shift"], tm=tm, tk=tk)

    lp = prepared["final"]
    out_p = _layer_final(a_p, h, lp["w"], lp["b"], tm=tm, tk=tk)
    return out_p[:graph["n_nodes"], :nclass]


def reference_forward(params, x, a_hat):
    """Pure-JAX reference mirroring the kernel's bf16-matmul / f32-epilogue recipe."""
    a = a_hat.astype(jnp.bfloat16)
    h = x.astype(jnp.bfloat16)
    for lp in params["hidden"]:
        xw = jnp.dot(h, lp["w"].astype(jnp.bfloat16),
                     preferred_element_type=jnp.float32).astype(jnp.bfloat16)
        agg = jnp.dot(a, xw, preferred_element_type=jnp.float32)
        scale = lp["gamma"] * jax.lax.rsqrt(lp["var"] + BN_EPS)
        shift = lp["beta"] + (lp["b"] - lp["mean"]) * scale
        h = jnp.maximum(agg * scale + shift, 0.0).astype(jnp.bfloat16)
    lp = params["final"]
    xw = jnp.dot(h, lp["w"].astype(jnp.bfloat16),
                 preferred_element_type=jnp.float32).astype(jnp.bfloat16)
    logits = jnp.dot(a, xw, preferred_element_type=jnp.float32) + lp["b"]
    return jax.nn.log_softmax(logits, axis=-1)


# ----------------------------------- main ----------------------------------- #

if __name__ == "__main__":
    # Small synthetic graph consistent with the module's node-classification forward.
    # N=640 -> padded to 1024, grid (2, 2): exercises the k-reduction accumulator,
    # multiple row tiles (megacore sharding) and row/lane padding paths.
    N, NFEAT, NHID, NCLASS, NUM_LAYERS = 640, 32, 32, 8, 3

    key = jax.random.PRNGKey(0)
    k_x, k_a, k_p = jax.random.split(key, 3)

    x = jax.random.normal(k_x, (N, NFEAT), jnp.float32)

    # symmetric 0/1 adjacency without self-loops (gcn_norm adds them)
    upper = (jax.random.uniform(k_a, (N, N)) < 0.05).astype(jnp.float32)
    adj = jnp.triu(upper, k=1)
    adj = adj + adj.T

    params = init_params(k_p, NFEAT, NHID, NCLASS, NUM_LAYERS)

    # Per-graph / per-model preprocessing hoisted out of the forward pass.
    a_hat = gcn_norm(adj)
    prepared = prepare_params(params, NCLASS)
    first_w = (prepared["hidden"][0] if prepared["hidden"] else prepared["final"])["w"]
    graph = prepare_graph(x, a_hat, N, first_w.shape[0])

    out = gcn_arxiv_forward(prepared, graph, NCLASS)
    out = jax.block_until_ready(out)

    assert out.shape == (N, NCLASS)
    # log_softmax rows must sum (in prob space) to ~1
    assert jnp.allclose(jnp.sum(jnp.exp(out), axis=-1), 1.0, atol=1e-4)
    # match the pure-JAX reference (same bf16 matmul / f32 epilogue recipe)
    ref = reference_forward(params, x, a_hat)
    assert jnp.allclose(out, ref, atol=5e-2, rtol=5e-2), \
        float(jnp.max(jnp.abs(out - ref)))
    print("KERNEL_OK")
</pallas_src>

<mosaic_0001>
module attributes {stable_mosaic.version = 11 : i64} {
  func.func @_layer_hidden_kernel(%arg0: i32, %arg1: i32, %arg2: memref<512x512xbf16, #tpu.memory_space<vmem>>, %arg3: memref<512x128xbf16, #tpu.memory_space<vmem>>, %arg4: memref<128x128xbf16, #tpu.memory_space<vmem>>, %arg5: memref<1x128xf32, #tpu.memory_space<vmem>>, %arg6: memref<1x128xf32, #tpu.memory_space<vmem>>, %arg7: memref<512x128xbf16, #tpu.memory_space<vmem>>, %arg8: memref<512x128xf32, #tpu.memory_space<vmem>>) attributes {dimension_semantics = [#tpu.dimension_semantics<parallel>, #tpu.dimension_semantics<arbitrary>], iteration_bounds = array<i64: 2, 2>, scalar_prefetch = 0 : i64, scratch_operands = 1 : i64, tpu.core_type = #tpu.core_type<tc>, window_params = [{transform_indices = @transform_0, window_bounds = array<i64: 512, 512>}, {transform_indices = @transform_1, window_bounds = array<i64: 512, 128>}, {pipeline_mode = #tpu.pipeline_mode<synchronous>, transform_indices = @transform_2, window_bounds = array<i64: 128, 128>}, {pipeline_mode = #tpu.pipeline_mode<synchronous>, transform_indices = @transform_3, window_bounds = array<i64: 1, 128>}, {pipeline_mode = #tpu.pipeline_mode<synchronous>, transform_indices = @transform_4, window_bounds = array<i64: 1, 128>}, {transform_indices = @transform_5, window_bounds = array<i64: 512, 128>}]} {
    %c0_i32 = arith.constant 0 : i32
    %0 = arith.cmpi eq, %arg1, %c0_i32 : i32
    %1 = arith.extui %0 : i1 to i32
    %c0_i32_0 = arith.constant 0 : i32
    %2 = arith.cmpi ne, %1, %c0_i32_0 : i32
    scf.if %2 {
      %cst_12 = arith.constant 0.000000e+00 : f32
      %15 = vector.broadcast %cst_12 : f32 to vector<512x128xf32>
      %c0_13 = arith.constant 0 : index
      %c0_14 = arith.constant 0 : index
      %16 = vector.load %arg8[%c0_13, %c0_14] : memref<512x128xf32, #tpu.memory_space<vmem>>, vector<512x128xf32>
      tpu.vector_store %arg8[%c0_13, %c0_14], %15 {strides = array<i32>} : memref<512x128xf32, #tpu.memory_space<vmem>>, vector<512x128xf32>,
    } else {
    }
    %c0 = arith.constant 0 : index
    %c0_1 = arith.constant 0 : index
    %3 = vector.load %arg3[%c0, %c0_1] : memref<512x128xbf16, #tpu.memory_space<vmem>>, vector<512x128xbf16>
    %c0_2 = arith.constant 0 : index
    %c0_3 = arith.constant 0 : index
    %4 = vector.load %arg4[%c0_2, %c0_3] : memref<128x128xbf16, #tpu.memory_space<vmem>>, vector<128x128xbf16>
    %cst = arith.constant dense<0.000000e+00> : vector<512x128xf32>
    %5 = tpu.matmul %3, %4, %cst {dimension_numbers = #tpu.dot_dimension_numbers<[1], [0], [0], [1], [0, 0, 1, 1], [], []>} : vector<512x128xbf16>, vector<128x128xbf16>, vector<512x128xf32> -> vector<512x128xf32>
    %6 = arith.truncf %5 : vector<512x128xf32> to vector<512x128xbf16>
    %c0_4 = arith.constant 0 : index
    %c0_5 = arith.constant 0 : index
    %7 = vector.load %arg8[%c0_4, %c0_5] : memref<512x128xf32, #tpu.memory_space<vmem>>, vector<512x128xf32>
    %c0_6 = arith.constant 0 : index
    %c0_7 = arith.constant 0 : index
    %8 = vector.load %arg2[%c0_6, %c0_7] : memref<512x512xbf16, #tpu.memory_space<vmem>>, vector<512x512xbf16>
    %cst_8 = arith.constant dense<0.000000e+00> : vector<512x128xf32>
    %9 = tpu.matmul %8, %6, %cst_8 {dimension_numbers = #tpu.dot_dimension_numbers<[1], [0], [0], [1], [0, 0, 1, 1], [], []>} : vector<512x512xbf16>, vector<512x128xbf16>, vector<512x128xf32> -> vector<512x128xf32>
    %10 = arith.addf %7, %9 : vector<512x128xf32>
    %c0_9 = arith.constant 0 : index
    %c0_10 = arith.constant 0 : index
    %11 = vector.load %arg8[%c0_9, %c0_10] : memref<512x128xf32, #tpu.memory_space<vmem>>, vector<512x128xf32>
    tpu.vector_store %arg8[%c0_9, %c0_10], %10 {strides = array<i32>} : memref<512x128xf32, #tpu.memory_space<vmem>>, vector<512x128xf32>,
    %c1_i32 = arith.constant 1 : i32
    %12 = arith.cmpi eq, %arg1, %c1_i32 : i32
    %13 = arith.extui %12 : i1 to i32
    %c0_i32_11 = arith.constant 0 : i32
    %14 = arith.cmpi ne, %13, %c0_i32_11 : i32
    scf.if %14 {
      %c0_12 = arith.constant 0 : index
      %c0_13 = arith.constant 0 : index
      %15 = vector.load %arg8[%c0_12, %c0_13] : memref<512x128xf32, #tpu.memory_space<vmem>>, vector<512x128xf32>
      %c0_14 = arith.constant 0 : index
      %c0_15 = arith.constant 0 : index
      %16 = vector.load %arg5[%c0_14, %c0_15] : memref<1x128xf32, #tpu.memory_space<vmem>>, vector<1x128xf32>
      %17 = vector.broadcast %16 : vector<1x128xf32> to vector<512x128xf32>
      %18 = arith.mulf %15, %17 : vector<512x128xf32>
      %c0_16 = arith.constant 0 : index
      %c0_17 = arith.constant 0 : index
      %19 = vector.load %arg6[%c0_16, %c0_17] : memref<1x128xf32, #tpu.memory_space<vmem>>, vector<1x128xf32>
      %20 = vector.broadcast %19 : vector<1x128xf32> to vector<512x128xf32>
      %21 = arith.addf %18, %20 : vector<512x128xf32>
      %cst_18 = arith.constant 0.000000e+00 : f32
      %22 = vector.broadcast %cst_18 : f32 to vector<512x128xf32>
      %23 = arith.maximumf %21, %22 : vector<512x128xf32>
      %24 = arith.truncf %23 : vector<512x128xf32> to vector<512x128xbf16>
      %c0_19 = arith.constant 0 : index
      %c0_20 = arith.constant 0 : index
      %25 = vector.load %arg7[%c0_19, %c0_20] : memref<512x128xbf16, #tpu.memory_space<vmem>>, vector<512x128xbf16>
      tpu.vector_store %arg7[%c0_19, %c0_20], %24 {strides = array<i32>} : memref<512x128xbf16, #tpu.memory_space<vmem>>, vector<512x128xbf16>,
    } else {
    }
    return
  }
  func.func @transform_0(%arg0: i32, %arg1: i32) -> (i32, i32) {
    %c0_i32 = arith.constant 0 : i32
    return %arg0, %arg1 : i32, i32
  }
  func.func @transform_1(%arg0: i32, %arg1: i32) -> (i32, i32) {
    %c0_i32 = arith.constant 0 : i32
    %c0_i32_0 = arith.constant 0 : i32
    return %arg1, %c0_i32 : i32, i32
  }
  func.func @transform_2(%arg0: i32, %arg1: i32) -> (i32, i32) {
    %c0_i32 = arith.constant 0 : i32
    %c0_i32_0 = arith.constant 0 : i32
    %c0_i32_1 = arith.constant 0 : i32
    return %c0_i32, %c0_i32_0 : i32, i32
  }
  func.func @transform_3(%arg0: i32, %arg1: i32) -> (i32, i32) {
    %c0_i32 = arith.constant 0 : i32
    %c0_i32_0 = arith.constant 0 : i32
    %c0_i32_1 = arith.constant 0 : i32
    return %c0_i32, %c0_i32_0 : i32, i32
  }
  func.func @transform_4(%arg0: i32, %arg1: i32) -> (i32, i32) {
    %c0_i32 = arith.constant 0 : i32
    %c0_i32_0 = arith.constant 0 : i32
    %c0_i32_1 = arith.constant 0 : i32
    return %c0_i32, %c0_i32_0 : i32, i32
  }
  func.func @transform_5(%arg0: i32, %arg1: i32) -> (i32, i32) {
    %c0_i32 = arith.constant 0 : i32
    %c0_i32_0 = arith.constant 0 : i32
    return %arg0, %c0_i32 : i32, i32
  }
}

</mosaic_0001>

<bundles_post_ra>
// kernel: tpu_custom_call.1
= control target key start
LH: loop header
LB: loop body
LE: loop exit
PB: predicated region body
PF: predicated region fallthrough
CT: control target
= control target key end

     0   :  { %s5651_s0 = inlined_call_operand.hbm [shape: bf16[1024,1024], index: 0, kind: input, shape index: {}]   ;;  %s5652_s1 = inlined_call_operand.hbm [shape: bf16[1024,128], index: 1, kind: input, shape index: {}]   ;;  %s5653_s2 = inlined_call_operand.hbm [shape: bf16[128,128], index: 2, kind: input, shape index: {}]   ;;  %s5654_s3 = inlined_call_operand.hbm [shape: f32[1,128], index: 3, kind: input, shape index: {}]   ;;  %s5655_s4 = inlined_call_operand.hbm [shape: f32[1,128], index: 4, kind: input, shape index: {}]   ;;  %s5656_s5 = inlined_call_operand.hbm [shape: bf16[1024,128], index: 5, kind: output, shape index: {}]  }
   0x1   :  { %5668 = sst [smem:[#allocation39_spill]] %s5651_s0 }
   0x2   :  { %5669 = sst [smem:[#allocation40_spill]] %s5653_s2 }
   0x3   :  { %5670 = sst [smem:[#allocation41_spill]] %s5654_s3 }
   0x4   :  { %5671 = sst [smem:[#allocation42_spill]] %s5655_s4 }
   0x5   :  { %5672 = sst [smem:[#allocation43_spill]] %s5656_s5 }
   0x6   :  { %10 = vsyncpa [#allocation4], 0 }
   0x7   :  { %12 = vsyncpa [#allocation4 + $0x1], 0 }
   0x8   :  { %13 = vsyncpa [#allocation7], 0 }
   0x9   :  { %15 = vsyncpa [#allocation7 + $0x1], 0 }
   0xa   :  { %16 = vsyncpa [#allocation10], 0 }
   0xb   :  { %17 = vsyncpa [#allocation5], 0 }
   0xc   :  { %19 = vsyncpa [#allocation5 + $0x1], 0  ;;  %s4738_s18 = smov 0   ;;  %s4740_s19 = smov 0  }
   0xd   :  { %s4742_s20 = smov 0   ;;  %s4744_s21 = smov 0  }
   0xe   :  { %s4746_s22 = smov 0   ;;  %s4748_s23 = smov 0  }
   0xf   :  { %s4750_s24 = smov 0   ;;  %s4752_s25 = smov 0  }
  0x10   :  { %s4754_s26 = smov 0   ;;  %s4756_s27 = smov 0  }
  0x11   :  { %s4758_s28 = smov 0   ;;  %s4760_s29 = smov 0  }
  0x12   :  { %s4762_s30 = smov 0   ;;  %s4764_s6 = smov 0  }
  0x13 LB: > { %5673 = sst [smem:[#allocation18_spill]] %s4643_s18  ;;  %s4805_s7 = sadd.s32 4294967295, %s4695_s6   ;;  %s4695_s6 = sphi %s4764_s6, %s25_s6   ;;  %s4691_s30 = sphi %s4762_s30, %s5742_s30   ;;  %s4687_s29 = sphi %s4760_s29, %s5741_s29   ;;  %s4683_s28 = sphi %s4758_s28, %s5729_s28   ;;  %s4679_s27 = sphi %s4756_s27, %s5740_s27   ;;  %s4675_s26 = sphi %s4754_s26, %s5728_s26   ;;  %s4671_s25 = sphi %s4752_s25, %s5739_s25   ;;  %s4667_s24 = sphi %s4750_s24, %s5738_s24   ;;  %s4663_s23 = sphi %s4748_s23, %s5737_s23   ;;  %s4659_s22 = sphi %s4746_s22, %s5736_s22   ;;  %s4655_s21 = sphi %s4744_s21, %s5735_s21   ;;  %s4651_s20 = sphi %s4742_s20, %s5734_s20   ;;  %s4647_s19 = sphi %s4740_s19, %s5733_s19   ;;  %s4643_s18 = sphi %s4738_s18, %s5732_s18  }
  0x14   : > { %5674 = sst [smem:[#allocation19_spill]] %s4675_s26  ;;  %s3129_s8 = sadd.s32 4294967294, %s4695_s6  }
  0x15   : > { %5675 = sst [smem:[#allocation20_spill]] %s4679_s27  ;;  %p59_p0 = scmp.ne.s32.totalorder %s4671_s25, %s4667_s24 }
  0x16   : > { %5676 = sst [smem:[#allocation21_spill]] %s4683_s28  ;;  %p60_p1 = scmp.eq.s32.totalorder %s4805_s7, 0 }
  0x17   : > { %5677 = sst [smem:[#allocation22_spill]] %s4691_s30  ;;  %p85_p2 = scmp.ne.s32.totalorder %s4659_s22, %s4655_s21 }
  0x18   : > { %p171_p3 = scmp.ne.s32.totalorder %s4651_s20, %s4647_s19  ;;  %p4815_p4 = por %p60_p1, %p59_p0 }
  0x19   : > { %p172_p5 = scmp.eq.s32.totalorder %s4805_s7, 3  ;;  %p4822_p6 = por %p85_p2, %p60_p1 }
  0x1a   : > { %p177_p7 = scmp.ne.s32.totalorder %s4647_s19, %s4643_s18  ;;  %p178_p9 = scmp.eq.s32.totalorder %s3129_s8, 3 }
  0x1b   : > { %p4828_p8 = por %p172_p5, %p171_p3  ;;  %p3130_p10 = scmp.ge.s32.totalorder %s4695_s6, 1 }
  0x1c   : > { %p185_p11 = scmp.lt.s32.totalorder %s4695_s6, 5  ;;  %p4834_p12 = por %p178_p9, %p177_p7 }
  0x1d   : > { %s5680_s11 = scalar_select %p4828_p8, 1, 0 }
  0x1e   : > { %s5682_s12 = scalar_select %p4834_p12, 1, 0 }
  0x1f   : > { %5681 = sst [smem:[#allocation23_spill]] %s5680_s11  ;;  %p4838_p13 = pnand %p3130_p10, %p185_p11 }
  0x20   : > { %5683 = sst [smem:[#allocation24_spill]] %s5682_s12  ;;  %s4697_s17 = smov [#allocation8]  }
  0x21   : > { %s5685_s2 = sld [smem:[#allocation40_spill]]  ;;  %p4233_p0 = pneg %p4838_p13 }
  0x22   : > { %s198_s21 = sshll.u32 %s4697_s17, 4  ;;  %s5687_s3 = sld [smem:[#allocation41_spill]]  ;;  %s199_s21 = int_to_ptr.vmem [resolvable:$true] %s198_s21 }
  0x23   : > { %p4849_p2 = pnand %p4233_p0, %p60_p1  ;;  %s5662_s15 = smov 64  }
  0x24   : > { %s5688_s4 = sld [smem:[#allocation42_spill]]  ;;  %s4700_s8 = smov [#allocation9]  }
  0x25   : > { %s4701_s5 = smov [#allocation11]   ;;  %s34_s18 = sadd.s32 1, %s4687_s29 }
  0x26   : > { %s225_s11 = sshll.u32 %s4701_s5, 4  ;;  %p35_p3 = scmp.ge.s32.totalorder %s34_s18, 2  ;;  %s226_s11 = int_to_ptr.vmem [resolvable:$true] %s225_s11 }
  0x27   : > { %s196_s16 = sshll.u32 %s5685_s2, 4  ;;  %s5663_s2 = smov 4   ;;  %s197_s16 = int_to_ptr.hbm [resolvable:$true] %s196_s16 }
  0x28   : > { %s211_s14 = sshll.u32 %s5687_s3, 4  ;;  %s213_s3 = sshll.u32 %s4700_s8, 4  ;;  %s212_s14 = int_to_ptr.hbm [resolvable:$true] %s211_s14  ;;  %s214_s3 = int_to_ptr.vmem [resolvable:$true] %s213_s3 }
  0x29   : > { %4236 = dma.hbm_to_vmem [thread:$0]  (!%p4849_p2), %s197_s16, 1024, %s199_s21, [#allocation7], %s5662_s15, %s5662_s15, %s5663_s2  }
  0x2a   : > { %s223_s12 = sshll.u32 %s5688_s4, 4  ;;  %s37_s16 = sadd.s32 1, %s4691_s30  ;;  %s224_s12 = int_to_ptr.hbm [resolvable:$true] %s223_s12 }
  0x2b   : > { %4239 = dma.hbm_to_vmem [thread:$0]  (!%p4849_p2), %s212_s14, 16, %s214_s3, [#allocation10]  }
  0x2c   : > { %4242 = dma.hbm_to_vmem [thread:$0]  (!%p4849_p2), %s224_s12, 16, %s226_s11, [#allocation10]  }
  0x2d   : > { %s46_s21 = sadd.s32 1, %s4675_s26  ;;  %p53_p5 = scmp.ne.s32.totalorder %s4675_s26, %s4671_s25 }
  0x2e   : > { %p54_p7 = scmp.eq.s32.totalorder %s4695_s6, 0  ;;  %s5744_s18 = smov (%p35_p3, %s34_s18), 0 }
  0x2f   : > { %5689 = sst [smem:[#allocation25_spill]] %s5744_s18  ;;  %s5746_s16 = smov (!%p35_p3, %s37_s16), %s4691_s30 }
  0x30   : > { %s4879_s3 = ssub.s32 %s4687_s29, %s5744_s18  ;;  %p4883_p9 = por %p54_p7, %p53_p5 }
  0x31   : > { %p39_p10 = scmp.ge.s32.totalorder %s5746_s16, 2  ;;  %p70_p11 = scmp.eq.s32.totalorder %s4879_s3, 0 }
  0x32   : > { %s161_s11 = sadd.s32 1, %s4651_s20  ;;  %p4257_p0 = scmp.lt.s32.totalorder %s4695_s6, 4 }
  0x33   : > { %s5748_s16 = smov (%p39_p10, %s5746_s16), 0  ;;  %s236_s24 = sand.u32 1, %s4675_s26  }
  0x34   : > { %5691 = sst [smem:[#allocation26_spill]] %s5748_s16  ;;  %s3137_s14 = sshll.u32 %s4687_s29, 2 }
  0x35   : > { %s41_s17 = ssub.s32 %s4691_s30, %s5748_s16  ;;  %s3135_s8 = sshll.u32 %s236_s24, 10 }
  0x36   : > { %s43_s12 = sor.u32 %s4879_s3, %s41_s17  ;;  %p159_p2 = scmp.eq.s32.totalorder %s41_s17, 0 }
  0x37   : > { %p44_p3 = scmp.eq.s32.totalorder %s43_s12, 0  ;;  %s3829_s4 = sshll.u32 %s4691_s30, 9 }
  0x38   : > { %s4898_s15 = scalar_select %p159_p2, %s4651_s20, %s161_s11  }
  0x39   : > { %s4901_s2 = scalar_select %p44_p3, %s4675_s26, %s46_s21  }
  0x3a   : > { %5692 = sst [smem:[#allocation27_spill]] %s4898_s15  ;;  %s246_s18 = sadd.s32 %s3829_s4, %s3137_s14 }
  0x3b   : > { %5693 = sst [smem:[#allocation28_spill]] %s4901_s2  ;;  %s240_s28 = scalar_lea.vmem [#allocation3], %s3135_s8 }
  0x3c   : > { %s251_s27 = sshll.u32 %s240_s28, 4  ;;  %s3139_s16 = sshll.u32 %s246_s18, 2  ;;  %s252_s27 = int_to_ptr.vmem [resolvable:$true] %s251_s27 }
  0x3d   : > { %s5694_s0 = sld [smem:[#allocation39_spill]]  ;;  %p4244_p5 = pnand %p4257_p0, %p4883_p9 }
  0x3e   : > { %s237_s4 = scalar_lea.sflag [#allocation4], %s236_s24  ;;  %s4702_s14 = smov 512  }
  0x3f   : > { %s4703_s8 = smov 256   ;;  %s4704_s30 = smov 16  }
  0x40   : > { %s261_s28 = sand.u32 1, %s4695_s6   ;;  %s72_s18 = sadd.s32 1, %s4663_s23 }
  0x41   : > { %p79_p10 = scmp.ne.s32.totalorder %s4663_s23, %s4659_s22  ;;  %s3830_s17 = sshll.u32 %s4687_s29, 8 }
  0x42   : > { %s4918_s2 = scalar_select %p70_p11, %s4663_s23, %s72_s18  }
  0x43   : > { %s248_s11 = scalar_lea.hbm %s5694_s0, %s3139_s16  ;;  %p81_p2 = por %p79_p10, %p54_p7 }
  0x44   : > { %s249_s21 = sshll.u32 %s248_s11, 4  ;;  %s263_s16 = sand.u32 1, %s4663_s23   ;;  %s250_s21 = int_to_ptr.hbm [resolvable:$true] %s249_s21 }
  0x45   : > { %4246 = dma.hbm_to_vmem [thread:$0]  (!%p4244_p5), %s250_s21, 16384, %s252_s27, %s237_s4, %s4702_s14, %s4703_s8, %s4704_s30  }
  0x46   : > { %s3140_s5 = sshll.u32 %s263_s16, 8  ;;  %s270_s24 = scalar_lea.hbm %s5652_s1, %s3830_s17 }
  0x47   : > { %s271_s0 = sshll.u32 %s270_s24, 4  ;;  %s265_s26 = scalar_lea.vmem [#allocation6], %s3140_s5  ;;  %s272_s0 = int_to_ptr.hbm [resolvable:$true] %s271_s0 }
  0x48   : > { %s273_s15 = sshll.u32 %s265_s26, 4  ;;  %p4247_p9 = pnand %p4257_p0, %p81_p2  ;;  %s274_s15 = int_to_ptr.vmem [resolvable:$true] %s273_s15 }
  0x49   : > { %s262_s27 = scalar_lea.sflag [#allocation7], %s261_s28  ;;  %s5695_s30 = smov 4  }
  0x4a   : > { %s5696_s3 = smov 64   ;;  %285 = sbr.rel (%p4838_p13) target bundleno = 1215 (0x4bf), region = 40 }
  0x4b   : > { %4249 = dma.hbm_to_vmem [thread:$0]  (!%p4247_p9), %s272_s0, 4096, %s274_s15, %s262_s27, %s5696_s3, %s5696_s3, %s5695_s30  }
  0x4f   : > { %s287_s21 = sand.u32 1, %s4671_s25  }
  0x50   : > { %s3144_s4 = sshll.u32 %s287_s21, 10  ;;  %s288_s14 = scalar_lea.sflag [#allocation4], %s287_s21 }
  0x51   : > { %s4935_s8 = scalar_lea.vmem [#allocation3], %s3144_s4 }
  0x52   : > { %4622 = dma.done.wait (%p4815_p4), %s288_s14, 16384  }
  0x53   : > { %4624 = vsyncadd (%p4815_p4), %s288_s14, 4294950912  ;;  %s297_s26 = sand.u32 1, %s4805_s7   ;;  %s299_s0 = sand.u32 1, %s4659_s22  }
  0x54   : > { %s3145_s15 = sshll.u32 %s299_s0, 8  ;;  %s298_s13 = scalar_lea.sflag [#allocation7], %s297_s26 }
  0x55   : > { %s4943_s28 = scalar_lea.vmem [#allocation6], %s3145_s15 }
  0x56   : > { %4626 = dma.done.wait (%p4822_p6), %s298_s13, 4096  }
  0x57   : > { %4628 = vsyncadd (%p4822_p6), %s298_s13, 4294963200 }
  0x58   : > { %4630 = dma.done.wait (%p60_p1), [#allocation7], 1024  }
  0x59   : > { %4632 = vsyncadd (%p60_p1), [#allocation7], 4294966272 }
  0x5a   : > { %4634 = dma.done.wait (%p60_p1), [#allocation10], 32  }
  0x5b   : > { %4636 = vsyncadd (%p60_p1), [#allocation10], 4294967264  ;;  %s346_s9 = sand.u32 1, %s4647_s19   ;;  %s5697_s10 = sld [smem:[#allocation20_spill]] }
  0x5c   : > { %s3149_s18 = sshll.u32 %s346_s9, 8 }
  0x5d   : > { %s4960_s16 = scalar_lea.vmem [#allocation12], %s3149_s18 }
  0x61   : > { %p3150_p4 = scmp.ne.s32.totalorder %s5697_s10, 0 }
  0x63   : > { %356 = sbr.rel (%p3150_p4) target bundleno = 169 (0xa9), region = 64 }
  0x68   : > { %v4705_v0 = vmov 0.0  }
  0x69   : > { %357 = vst [vmem:[#allocation2 + $0xb0] sm:$0xff] %v4705_v0 }
  0x6a   : > { %358 = vst [vmem:[#allocation2 + $0x1b0] sm:$0xff] %v4705_v0 }
  0x6b   : > { %359 = vst [vmem:[#allocation2 + $0xd8] sm:$0xff] %v4705_v0 }
  0x6c   : > { %360 = vst [vmem:[#allocation2 + $0x18] sm:$0xff] %v4705_v0 }
  0x6d   : > { %361 = vst [vmem:[#allocation2 + $0x50] sm:$0xff] %v4705_v0 }
  0x6e   : > { %362 = vst [vmem:[#allocation2 + $0x168] sm:$0xff] %v4705_v0 }
  0x6f   : > { %363 = vst [vmem:[#allocation2 + $0x130] sm:$0xff] %v4705_v0 }
  0x70   : > { %364 = vst [vmem:[#allocation2 + $0x48] sm:$0xff] %v4705_v0 }
  0x71   : > { %365 = vst [vmem:[#allocation2 + $0x180] sm:$0xff] %v4705_v0 }
  0x72   : > { %366 = vst [vmem:[#allocation2 + $0x110] sm:$0xff] %v4705_v0 }
  0x73   : > { %367 = vst [vmem:[#allocation2 + $0x118] sm:$0xff] %v4705_v0 }
  0x74   : > { %368 = vst [vmem:[#allocation2 + $0x98] sm:$0xff] %v4705_v0 }
  0x75   : > { %369 = vst [vmem:[#allocation2 + $0x120] sm:$0xff] %v4705_v0 }
  0x76   : > { %370 = vst [vmem:[#allocation2 + $0x150] sm:$0xff] %v4705_v0 }
  0x77   : > { %371 = vst [vmem:[#allocation2 + $0x108] sm:$0xff] %v4705_v0 }
  0x78   : > { %372 = vst [vmem:[#allocation2 + $0x60] sm:$0xff] %v4705_v0 }
  0x79   : > { %373 = vst [vmem:[#allocation2 + $0xe0] sm:$0xff] %v4705_v0 }
  0x7a   : > { %374 = vst [vmem:[#allocation2 + $0x188] sm:$0xff] %v4705_v0 }
  0x7b   : > { %375 = vst [vmem:[#allocation2 + $0x138] sm:$0xff] %v4705_v0 }
  0x7c   : > { %376 = vst [vmem:[#allocation2 + $0x140] sm:$0xff] %v4705_v0 }
  0x7d   : > { %377 = vst [vmem:[#allocation2 + $0x80] sm:$0xff] %v4705_v0 }
  0x7e   : > { %378 = vst [vmem:[#allocation2 + $0x1a8] sm:$0xff] %v4705_v0 }
  0x7f   : > { %379 = vst [vmem:[#allocation2 + $0x1b8] sm:$0xff] %v4705_v0 }
  0x80   : > { %380 = vst [vmem:[#allocation2 + $0x28] sm:$0xff] %v4705_v0 }
  0x81   : > { %381 = vst [vmem:[#allocation2 + $0x1e8] sm:$0xff] %v4705_v0 }
  0x82   : > { %382 = vst [vmem:[#allocation2 + $0xf8] sm:$0xff] %v4705_v0 }
  0x83   : > { %383 = vst [vmem:[#allocation2 + $0x160] sm:$0xff] %v4705_v0 }
  0x84   : > { %384 = vst [vmem:[#allocation2 + $0x30] sm:$0xff] %v4705_v0 }
  0x85   : > { %385 = vst [vmem:[#allocation2 + $0x1e0] sm:$0xff] %v4705_v0 }
  0x86   : > { %386 = vst [vmem:[#allocation2] sm:$0xff] %v4705_v0 }
  0x87   : > { %387 = vst [vmem:[#allocation2 + $0xf0] sm:$0xff] %v4705_v0 }
  0x88   : > { %388 = vst [vmem:[#allocation2 + $0x8] sm:$0xff] %v4705_v0 }
  0x89   : > { %389 = vst [vmem:[#allocation2 + $0x148] sm:$0xff] %v4705_v0 }
  0x8a   : > { %390 = vst [vmem:[#allocation2 + $0x1d0] sm:$0xff] %v4705_v0 }
  0x8b   : > { %391 = vst [vmem:[#allocation2 + $0x100] sm:$0xff] %v4705_v0 }
  0x8c   : > { %392 = vst [vmem:[#allocation2 + $0xc8] sm:$0xff] %v4705_v0 }
  0x8d   : > { %393 = vst [vmem:[#allocation2 + $0x40] sm:$0xff] %v4705_v0 }
  0x8e   : > { %394 = vst [vmem:[#allocation2 + $0x1f8] sm:$0xff] %v4705_v0 }
  0x8f   : > { %395 = vst [vmem:[#allocation2 + $0x20] sm:$0xff] %v4705_v0 }
  0x90   : > { %396 = vst [vmem:[#allocation2 + $0x128] sm:$0xff] %v4705_v0 }
  0x91   : > { %397 = vst [vmem:[#allocation2 + $0x1a0] sm:$0xff] %v4705_v0 }
  0x92   : > { %398 = vst [vmem:[#allocation2 + $0x1f0] sm:$0xff] %v4705_v0 }
  0x93   : > { %399 = vst [vmem:[#allocation2 + $0xe8] sm:$0xff] %v4705_v0 }
  0x94   : > { %400 = vst [vmem:[#allocation2 + $0x78] sm:$0xff] %v4705_v0 }
  0x95   : > { %401 = vst [vmem:[#allocation2 + $0x70] sm:$0xff] %v4705_v0 }
  0x96   : > { %402 = vst [vmem:[#allocation2 + $0x90] sm:$0xff] %v4705_v0 }
  0x97   : > { %403 = vst [vmem:[#allocation2 + $0x1d8] sm:$0xff] %v4705_v0 }
  0x98   : > { %404 = vst [vmem:[#allocation2 + $0xd0] sm:$0xff] %v4705_v0 }
  0x99   : > { %405 = vst [vmem:[#allocation2 + $0xb8] sm:$0xff] %v4705_v0 }
  0x9a   : > { %406 = vst [vmem:[#allocation2 + $0x88] sm:$0xff] %v4705_v0 }
  0x9b   : > { %407 = vst [vmem:[#allocation2 + $0xa8] sm:$0xff] %v4705_v0 }
  0x9c   : > { %408 = vst [vmem:[#allocation2 + $0x1c8] sm:$0xff] %v4705_v0 }
  0x9d   : > { %409 = vst [vmem:[#allocation2 + $0x170] sm:$0xff] %v4705_v0 }
  0x9e   : > { %410 = vst [vmem:[#allocation2 + $0x178] sm:$0xff] %v4705_v0 }
  0x9f   : > { %411 = vst [vmem:[#allocation2 + $0x68] sm:$0xff] %v4705_v0 }
  0xa0   : > { %412 = vst [vmem:[#allocation2 + $0x190] sm:$0xff] %v4705_v0 }
  0xa1   : > { %413 = vst [vmem:[#allocation2 + $0x198] sm:$0xff] %v4705_v0 }
  0xa2   : > { %414 = vst [vmem:[#allocation2 + $0x38] sm:$0xff] %v4705_v0 }
  0xa3   : > { %415 = vst [vmem:[#allocation2 + $0xc0] sm:$0xff] %v4705_v0 }
  0xa4   : > { %416 = vst [vmem:[#allocation2 + $0x1c0] sm:$0xff] %v4705_v0 }
  0xa5   : > { %417 = vst [vmem:[#allocation2 + $0x158] sm:$0xff] %v4705_v0 }
  0xa6   : > { %418 = vst [vmem:[#allocation2 + $0x10] sm:$0xff] %v4705_v0 }
  0xa7   : > { %419 = vst [vmem:[#allocation2 + $0x58] sm:$0xff] %v4705_v0 }
  0xa8   : > { %420 = vst [vmem:[#allocation2 + $0xa0] sm:$0xff] %v4705_v0 }
  0xa9 PF: > { %v3870_v1 = vld [vmem:[#allocation8 + $0x38] sm:$0xff]  ;;  %v3869_v2 = vld [vmem:[#allocation8 + $0x30] sm:$0xff]  ;;  %v3868_v3 = vld [vmem:[#allocation8 + $0x28] sm:$0xff]  ;;  %s5718_s7 = sld [smem:[#allocation20_spill]] }
  0xaa   : > { %741 = vmatpush.bf16.msra.mxu0 %v3870_v1  ;;  %4191 = vmatpush.bf16.msra.mxu1 %v3870_v1  ;;  %v3867_v4 = vld [vmem:[#allocation8 + $0x20] sm:$0xff]  ;;  %v3866_v5 = vld [vmem:[#allocation8 + $0x18] sm:$0xff]  ;;  %v3865_v6 = vld [vmem:[#allocation8 + $0x10] sm:$0xff] }
  0xab   : > { %4192 = vmatpush.bf16.msra.mxu2 %v3870_v1  ;;  %4193 = vmatpush.bf16.msra.mxu3 %v3870_v1  ;;  %v3864_v7 = vld [vmem:[#allocation8 + $0x8] sm:$0xff]  ;;  %v3863_v8 = vld [vmem:[#allocation8] sm:$0xff]  ;;  %v3833_v17 = vld [vmem:[%s4943_s28 + $0x10] sm:$0xff] }
  0xac   : > { %v3831_v9 = vld [vmem:[%s4943_s28] sm:$0xff]  ;;  %v3832_v13 = vld [vmem:[%s4943_s28 + $0x8] sm:$0xff]  ;;  %v3841_v18 = vld [vmem:[%s4943_s28 + $0x50] sm:$0xff] }
  0xad   : > { %v3839_v10 = vld [vmem:[%s4943_s28 + $0x40] sm:$0xff]  ;;  %v3840_v14 = vld [vmem:[%s4943_s28 + $0x48] sm:$0xff]  ;;  %v3849_v19 = vld [vmem:[%s4943_s28 + $0x90] sm:$0xff] }
  0xae   : > { %742 = vmatpush.bf16.msra.mxu0 %v3869_v2  ;;  %4194 = vmatpush.bf16.msra.mxu1 %v3869_v2  ;;  %v3847_v11 = vld [vmem:[%s4943_s28 + $0x80] sm:$0xff]  ;;  %v3848_v15 = vld [vmem:[%s4943_s28 + $0x88] sm:$0xff]  ;;  %v3857_v20 = vld [vmem:[%s4943_s28 + $0xd0] sm:$0xff] }
  0xaf   : > { %4195 = vmatpush.bf16.msra.mxu2 %v3869_v2  ;;  %4196 = vmatpush.bf16.msra.mxu3 %v3869_v2  ;;  %v3855_v12 = vld [vmem:[%s4943_s28 + $0xc0] sm:$0xff]  ;;  %v3856_v16 = vld [vmem:[%s4943_s28 + $0xc8] sm:$0xff]  ;;  %v3834_v21 = vld [vmem:[%s4943_s28 + $0x18] sm:$0xff]  ;;  %p3823_p1 = scmp.ne.s32.totalorder %s5718_s7, 1 }
  0xb0   : > { %v3842_v22 = vld [vmem:[%s4943_s28 + $0x58] sm:$0xff]  ;;  %v3835_v25 = vld [vmem:[%s4943_s28 + $0x20] sm:$0xff]  ;;  %v3836_v29 = vld [vmem:[%s4943_s28 + $0x28] sm:$0xff] }
  0xb1   : > { %v3850_v23 = vld [vmem:[%s4943_s28 + $0x98] sm:$0xff]  ;;  %v3843_v26 = vld [vmem:[%s4943_s28 + $0x60] sm:$0xff]  ;;  %v3844_v30 = vld [vmem:[%s4943_s28 + $0x68] sm:$0xff] }
  0xb2   : > { %743 = vmatpush.bf16.msra.mxu0 %v3868_v3  ;;  %4197 = vmatpush.bf16.msra.mxu1 %v3868_v3  ;;  %v3858_v24 = vld [vmem:[%s4943_s28 + $0xd8] sm:$0xff]  ;;  %v3851_v27 = vld [vmem:[%s4943_s28 + $0xa0] sm:$0xff]  ;;  %v3852_v31 = vld [vmem:[%s4943_s28 + $0xa8] sm:$0xff] }
  0xb3   : > { %4198 = vmatpush.bf16.msra.mxu2 %v3868_v3  ;;  %4199 = vmatpush.bf16.msra.mxu3 %v3868_v3  ;;  %v3859_v28 = vld [vmem:[%s4943_s28 + $0xe0] sm:$0xff]  ;;  %v3860_v32 = vld [vmem:[%s4943_s28 + $0xe8] sm:$0xff]  ;;  %v3837_v33 = vld [vmem:[%s4943_s28 + $0x30] sm:$0xff] }
  0xb4   : > { %v3845_v34 = vld [vmem:[%s4943_s28 + $0x70] sm:$0xff]  ;;  %v3838_v37 = vld [vmem:[%s4943_s28 + $0x38] sm:$0xff] }
  0xb5   : > { %v3853_v35 = vld [vmem:[%s4943_s28 + $0xb0] sm:$0xff]  ;;  %v3846_v38 = vld [vmem:[%s4943_s28 + $0x78] sm:$0xff] }
  0xb6   : > { %744 = vmatpush.bf16.msra.mxu0 %v3867_v4  ;;  %4200 = vmatpush.bf16.msra.mxu1 %v3867_v4  ;;  %v3861_v36 = vld [vmem:[%s4943_s28 + $0xf0] sm:$0xff]  ;;  %v3854_v39 = vld [vmem:[%s4943_s28 + $0xb8] sm:$0xff] }
  0xb7   : > { %4201 = vmatpush.bf16.msra.mxu2 %v3867_v4  ;;  %4202 = vmatpush.bf16.msra.mxu3 %v3867_v4  ;;  %v3862_v40 = vld [vmem:[%s4943_s28 + $0xf8] sm:$0xff] }
  0xba   : > { %745 = vmatpush.bf16.msra.mxu0 %v3866_v5  ;;  %4203 = vmatpush.bf16.msra.mxu1 %v3866_v5 }
  0xbb   : > { %4204 = vmatpush.bf16.msra.mxu2 %v3866_v5  ;;  %4205 = vmatpush.bf16.msra.mxu3 %v3866_v5 }
  0xbe   : > { %746 = vmatpush.bf16.msra.mxu0 %v3865_v6  ;;  %4206 = vmatpush.bf16.msra.mxu1 %v3865_v6 }
  0xbf   : > { %4207 = vmatpush.bf16.msra.mxu2 %v3865_v6  ;;  %4208 = vmatpush.bf16.msra.mxu3 %v3865_v6 }
  0xc2   : > { %747 = vmatpush.bf16.msra.mxu0 %v3864_v7  ;;  %4209 = vmatpush.bf16.msra.mxu1 %v3864_v7 }
  0xc3   : > { %4210 = vmatpush.bf16.msra.mxu2 %v3864_v7  ;;  %4211 = vmatpush.bf16.msra.mxu3 %v3864_v7 }
  0xc6   : > { %748 = vmatpush.bf16.msra.mxu0 %v3863_v8  ;;  %4212 = vmatpush.bf16.msra.mxu1 %v3863_v8 }
  0xc7   : > { %4213 = vmatpush.bf16.msra.mxu2 %v3863_v8  ;;  %4214 = vmatpush.bf16.msra.mxu3 %v3863_v8 }
  0xc9   : > { %749 = vmatmul.bf16.vlgmr.msra.gmra.mxu0 %v3831_v9  ;;  %789 = vmatmul.bf16.vlgmr.msra.gmra.mxu1 %v3839_v10 }
  0xca   : > { %829 = vmatmul.bf16.vlgmr.msra.gmra.mxu2 %v3847_v11  ;;  %869 = vmatmul.bf16.vlgmr.msra.gmra.mxu3 %v3855_v12 }
  0xd9   : > { %754 = vmatmul.bf16.gmra.mxu0 %v3832_v13  ;;  %794 = vmatmul.bf16.gmra.mxu1 %v3840_v14 }
  0xda   : > { %834 = vmatmul.bf16.gmra.mxu2 %v3848_v15  ;;  %874 = vmatmul.bf16.gmra.mxu3 %v3856_v16 }
  0xe9   : > { %759 = vmatmul.bf16.gmra.mxu0 %v3833_v17  ;;  %799 = vmatmul.bf16.gmra.mxu1 %v3841_v18 }
  0xea   : > { %839 = vmatmul.bf16.gmra.mxu2 %v3849_v19  ;;  %879 = vmatmul.bf16.gmra.mxu3 %v3857_v20 }
  0xf9   : > { %764 = vmatmul.bf16.gmra.mxu0 %v3834_v21  ;;  %804 = vmatmul.bf16.gmra.mxu1 %v3842_v22 }
  0xfa   : > { %844 = vmatmul.bf16.gmra.mxu2 %v3850_v23  ;;  %884 = vmatmul.bf16.gmra.mxu3 %v3858_v24 }
 0x109   : > { %769 = vmatmul.bf16.gmra.mxu0 %v3835_v25  ;;  %809 = vmatmul.bf16.gmra.mxu1 %v3843_v26 }
 0x10a   : > { %849 = vmatmul.bf16.gmra.mxu2 %v3851_v27  ;;  %889 = vmatmul.bf16.gmra.mxu3 %v3859_v28 }
 0x119   : > { %774 = vmatmul.bf16.gmra.mxu0 %v3836_v29  ;;  %814 = vmatmul.bf16.gmra.mxu1 %v3844_v30 }
 0x11a   : > { %854 = vmatmul.bf16.gmra.mxu2 %v3852_v31  ;;  %894 = vmatmul.bf16.gmra.mxu3 %v3860_v32 }
 0x129   : > { %779 = vmatmul.bf16.gmra.mxu0 %v3837_v33  ;;  %819 = vmatmul.bf16.gmra.mxu1 %v3845_v34 }
 0x12a   : > { %859 = vmatmul.bf16.gmra.mxu2 %v3853_v35  ;;  %899 = vmatmul.bf16.gmra.mxu3 %v3861_v36 }
 0x139   : > { %784 = vmatmul.bf16.gmra.mxu0 %v3838_v37  ;;  %824 = vmatmul.bf16.gmra.mxu1 %v3846_v38 }
 0x13a   : > { %864 = vmatmul.bf16.gmra.mxu2 %v3854_v39  ;;  %904 = vmatmul.bf16.gmra.mxu3 %v3862_v40 }
 0x146   : > { %v5059_v41 = vpop.f32.mrf.mxu0  ;;  %v5061_v42 = vpop.f32.mrf.mxu1 }
 0x147   : > { %5698 = vst [vmem:[#allocation29_spill] sm:$0xff] %v5061_v42 }
 0x14d   : > { %v5063_v43 = vpop.f32.mrf.mxu2  ;;  %v5065_v44 = vpop.f32.mrf.mxu3 }
 0x14e   : > { %5699 = vst [vmem:[#allocation30_spill] sm:$0xff] %v5063_v43  ;;  %v5067_v45 = vpop.f32.mrf.mxu0  ;;  %v5069_v46 = vpop.f32.mrf.mxu1 }
 0x14f   : > { %5700 = vst [vmem:[#allocation31_spill] sm:$0xff] %v5065_v44 }
 0x150   : > { %5701 = vst [vmem:[#allocation32_spill] sm:$0xff] %v5069_v46 }
 0x155   : > { %v5071_v47 = vpop.f32.mrf.mxu2  ;;  %v5073_v48 = vpop.f32.mrf.mxu3 }
 0x156   : > { %5702 = vst [vmem:[#allocation33_spill] sm:$0xff] %v5071_v47  ;;  %v5075_v49 = vpop.f32.mrf.mxu0  ;;  %v5077_v50 = vpop.f32.mrf.mxu1 }
 0x157   : > { %5703 = vst [vmem:[#allocation34_spill] sm:$0xff] %v5073_v48 }
 0x15d   : > { %v5079_v51 = vpop.f32.mrf.mxu2  ;;  %v5081_v52 = vpop.f32.mrf.mxu3 }
 0x15e   : > { %5704 = vst [vmem:[#allocation35_spill] sm:$0xff] %v5079_v51  ;;  %v5083_v53 = vpop.f32.mrf.mxu0  ;;  %v5085_v54 = vpop.f32.mrf.mxu1 }
 0x15f   : > { %5705 = vst [vmem:[#allocation36_spill] sm:$0xff] %v5081_v52 }
 0x165   : > { %v5087_v55 = vpop.f32.mrf.mxu2  ;;  %v5089_v56 = vpop.f32.mrf.mxu3 }
 0x166   : > { %5706 = vst [vmem:[#allocation37_spill] sm:$0xff] %v5087_v55  ;;  %v5091_v57 = vpop.f32.mrf.mxu0  ;;  %v5093_v58 = vpop.f32.mrf.mxu1 }
 0x167   : > { %5707 = vst [vmem:[#allocation38_spill] sm:$0xff] %v5089_v56 }
 0x16d   : > { %v5095_v59 = vpop.f32.mrf.mxu2  ;;  %v5097_v60 = vpop.f32.mrf.mxu3 }
 0x16e   : > { %v5099_v61 = vpop.f32.mrf.mxu0  ;;  %v5101_v62 = vpop.f32.mrf.mxu1 }
 0x175   : > { %v5103_v63 = vpop.f32.mrf.mxu2  ;;  %v5105_v0 = vpop.f32.mrf.mxu3 }
 0x176   : > { %v5107_v1 = vpop.f32.mrf.mxu0  ;;  %v5109_v2 = vpop.f32.mrf.mxu1 }
 0x17d   : > { %v5111_v3 = vpop.f32.mrf.mxu2  ;;  %v5113_v4 = vpop.f32.mrf.mxu3 }
 0x17e   : > { %v5115_v5 = vpop.f32.mrf.mxu0  ;;  %v5117_v6 = vpop.f32.mrf.mxu1 }
 0x185   : > { %v5119_v7 = vpop.f32.mrf.mxu2  ;;  %v5121_v8 = vpop.f32.mrf.mxu3 }
 0x186   : > { %v770_v9 = vpop.f32.mrf.mxu0  ;;  %v810_v10 = vpop.f32.mrf.mxu1 }
 0x18d   : > { %v5123_v11 = vpop.f32.mrf.mxu2  ;;  %v5125_v12 = vpop.f32.mrf.mxu3 }
 0x18e   : > { %v772_v13 = vpop.f32.mrf.mxu0  ;;  %v812_v14 = vpop.f32.mrf.mxu1 }
 0x195   : > { %v852_v15 = vpop.f32.mrf.mxu2  ;;  %v892_v16 = vpop.f32.mrf.mxu3 }
 0x196   : > { %v775_v17 = vpop.f32.mrf.mxu0  ;;  %v815_v18 = vpop.f32.mrf.mxu1 }
 0x19d   : > { %v855_v19 = vpop.f32.mrf.mxu2  ;;  %v895_v20 = vpop.f32.mrf.mxu3 }
 0x19e   : > { %v777_v21 = vpop.f32.mrf.mxu0  ;;  %v817_v22 = vpop.f32.mrf.mxu1 }
 0x19f   : > { %v915_v55 = vpack.c.bf16 %v777_v21, %v775_v17  ;;  %v923_v51 = vpack.c.bf16 %v817_v22, %v815_v18  ;;  %v3875_v17 = vld [vmem:[%s4935_s8 + $0x24] sm:$0xf]  ;;  %v3331_v18 = vld [vmem:[%s4935_s8 + $0x30] sm:$0xf0] }
 0x1a0   : > { %v3334_v21 = vor.u32 %v3875_v17, %v3331_v18 }
 0x1a5   : > { %v857_v23 = vpop.f32.mrf.mxu2  ;;  %v897_v24 = vpop.f32.mrf.mxu3 }
 0x1a6   : > { %v780_v25 = vpop.f32.mrf.mxu0  ;;  %v820_v26 = vpop.f32.mrf.mxu1 }
 0x1ad   : > { %v860_v27 = vpop.f32.mrf.mxu2  ;;  %v900_v28 = vpop.f32.mrf.mxu3 }
 0x1ae   : > { %v782_v29 = vpop.f32.mrf.mxu0  ;;  %v822_v30 = vpop.f32.mrf.mxu1 }
 0x1af   : > { %v916_v48 = vpack.c.bf16 %v782_v29, %v780_v25  ;;  %v924_v44 = vpack.c.bf16 %v822_v30, %v820_v26  ;;  %v931_v25 = vpack.c.bf16 %v857_v23, %v855_v19  ;;  %v939_v26 = vpack.c.bf16 %v897_v24, %v895_v20  ;;  %v3329_v19 = vld [vmem:[%s4935_s8 + $0x20] sm:$0xf]  ;;  %v3877_v20 = vld [vmem:[%s4935_s8 + $0x2c] sm:$0xf0]  ;;  %v3337_v23 = vld [vmem:[%s4935_s8 + $0x28] sm:$0xf] }
 0x1b0   : > { %v3330_v22 = vor.u32 %v3877_v20, %v3329_v19  ;;  %v3878_v24 = vld [vmem:[%s4935_s8 + $0x34] sm:$0xf0]  ;;  %v3417_v19 = vld [vmem:[%s4935_s8 + $0xc8] sm:$0xf] }
 0x1b1   : > { %v3338_v29 = vor.u32 %v3878_v24, %v3337_v23  ;;  %v3898_v20 = vld [vmem:[%s4935_s8 + $0xd4] sm:$0xf0] }
 0x1b2   : > { %v3418_v23 = vor.u32 %v3898_v20, %v3417_v19  ;;  %v3911_v20 = vld [vmem:[%s4935_s8 + $0x144] sm:$0xf] }
 0x1b5   : > { %v862_v31 = vpop.f32.mrf.mxu2  ;;  %v902_v32 = vpop.f32.mrf.mxu3 }
 0x1b6   : > { %v785_v33 = vpop.f32.mrf.mxu0  ;;  %v825_v34 = vpop.f32.mrf.mxu1  ;;  %v932_v46 = vpack.c.bf16 %v862_v31, %v860_v27  ;;  %v940_v42 = vpack.c.bf16 %v902_v32, %v900_v28  ;;  %v3876_v27 = vld [vmem:[%s4935_s8 + $0x2c] sm:$0xf]  ;;  %v3339_v28 = vld [vmem:[%s4935_s8 + $0x38] sm:$0xf0]  ;;  %v3879_v31 = vld [vmem:[%s4935_s8 + $0x44] sm:$0xf] }
 0x1b7   : > { %v3342_v30 = vor.u32 %v3876_v27, %v3339_v28  ;;  %v3347_v32 = vld [vmem:[%s4935_s8 + $0x50] sm:$0xf0]  ;;  %v3899_v27 = vld [vmem:[%s4935_s8 + $0xe4] sm:$0xf] }
 0x1b8   : > { %v3427_v28 = vld [vmem:[%s4935_s8 + $0xf0] sm:$0xf0] }
 0x1bd   : > { %v865_v35 = vpop.f32.mrf.mxu2  ;;  %v905_v36 = vpop.f32.mrf.mxu3 }
 0x1be   : > { %v787_v37 = vpop.f32.mrf.mxu0  ;;  %v827_v38 = vpop.f32.mrf.mxu1 }
 0x1bf   : > { %v917_v39 = vpack.c.bf16 %v787_v37, %v785_v33  ;;  %v925_v40 = vpack.c.bf16 %v827_v38, %v825_v34  ;;  %v914_v33 = vpack.c.bf16 %v772_v13, %v770_v9  ;;  %v922_v34 = vpack.c.bf16 %v812_v14, %v810_v10  ;;  %v5714_v9 = vld [vmem:[#allocation30_spill] sm:$0xff]  ;;  %v5715_v10 = vld [vmem:[#allocation33_spill] sm:$0xff] }
 0x1c0   : > { %v5717_v13 = vld [vmem:[#allocation34_spill] sm:$0xff]  ;;  %v3350_v37 = vor.u32 %v3879_v31, %v3347_v32  ;;  %v3430_v31 = vor.u32 %v3899_v27, %v3427_v28  ;;  %v944_v28 = vld [vmem:[#allocation2 + $0xd8] sm:$0xff] }
 0x1c1   : > { %1774 = vmatpush.bf16.msrb.mxu1 %v917_v39  ;;  %1943 = vmatpush.bf16.msrb.mxu2 %v925_v40  ;;  %v3353_v39 = vld [vmem:[%s4935_s8 + $0x48] sm:$0xf]  ;;  %v3882_v40 = vld [vmem:[%s4935_s8 + $0x54] sm:$0xf0] }
 0x1c5   : > { %v867_v47 = vpop.f32.mrf.mxu2  ;;  %v907_v43 = vpop.f32.mrf.mxu3  ;;  %1775 = vmatpush.bf16.msrb.mxu1 %v916_v48  ;;  %1944 = vmatpush.bf16.msrb.mxu2 %v924_v44  ;;  %v913_v44 = vpack.c.bf16 %v5115_v5, %v5107_v1  ;;  %v920_v48 = vpack.c.bf16 %v5101_v62, %v5093_v58  ;;  %v928_v58 = vpack.c.bf16 %v5103_v63, %v5095_v59  ;;  %v3315_v62 = vld [vmem:[%s4935_s8 + $0x10] sm:$0xf0]  ;;  %v3313_v1 = vld [vmem:[%s4935_s8] sm:$0xf]  ;;  %v5713_v5 = vld [vmem:[#allocation38_spill] sm:$0xff] }
 0x1c6   : > { %v933_v56 = vpack.c.bf16 %v867_v47, %v865_v35  ;;  %v941_v52 = vpack.c.bf16 %v907_v43, %v905_v36  ;;  %v921_v43 = vpack.c.bf16 %v5117_v6, %v5109_v2  ;;  %v930_v47 = vpack.c.bf16 %v852_v15, %v5123_v11  ;;  %v3345_v35 = vld [vmem:[%s4935_s8 + $0x40] sm:$0xf]  ;;  %v3881_v36 = vld [vmem:[%s4935_s8 + $0x4c] sm:$0xf0] }
 0x1c7   : > { %v926_v11 = vpack.c.bf16 %v5715_v10, %v5714_v9  ;;  %v3346_v38 = vor.u32 %v3881_v36, %v3345_v35  ;;  %v3892_v9 = vld [vmem:[%s4935_s8 + $0xac] sm:$0xf]  ;;  %v3403_v10 = vld [vmem:[%s4935_s8 + $0xb8] sm:$0xf0]  ;;  %v3433_v35 = vld [vmem:[%s4935_s8 + $0xe8] sm:$0xf] }
 0x1c8   : > { %2112 = vmatpush.bf16.msrb.mxu3 %v933_v56  ;;  %2281 = vmatpush.bf16.msrb.mxu0 %v941_v52  ;;  %v937_v52 = vpack.c.bf16 %v5121_v8, %v5113_v4  ;;  %v919_v56 = vpack.c.bf16 %v5085_v54, %v5077_v50  ;;  %v910_v50 = vpack.c.bf16 %v5067_v45, %v5059_v41  ;;  %v5709_v54 = vld [vmem:[#allocation32_spill] sm:$0xff]  ;;  %v3874_v41 = vld [vmem:[%s4935_s8 + $0x14] sm:$0xf0]  ;;  %v3872_v45 = vld [vmem:[%s4935_s8 + $0xc] sm:$0xf] }
 0x1c9   : > { %1776 = vmatpush.bf16.msrb.mxu1 %v915_v55  ;;  %1945 = vmatpush.bf16.msrb.mxu2 %v923_v51  ;;  %v929_v51 = vpack.c.bf16 %v5119_v7, %v5111_v3  ;;  %v911_v55 = vpack.c.bf16 %v5083_v53, %v5075_v49  ;;  %v3873_v49 = vld [vmem:[%s4935_s8 + $0xc] sm:$0xf0]  ;;  %v5708_v53 = vld [vmem:[#allocation29_spill] sm:$0xff]  ;;  %v5710_v3 = vld [vmem:[#allocation35_spill] sm:$0xff] }
 0x1ca   : > { %v918_v2 = vpack.c.bf16 %v5709_v54, %v5708_v53  ;;  %v3314_v63 = vor.u32 %v3873_v49, %v3313_v1  ;;  %v5712_v4 = vld [vmem:[#allocation36_spill] sm:$0xff]  ;;  %v3321_v7 = vld [vmem:[%s4935_s8 + $0x8] sm:$0xf]  ;;  %v3889_v49 = vld [vmem:[%s4935_s8 + $0x8c] sm:$0xf0] }
 0x1cb   : > { %v935_v6 = vpack.c.bf16 %v5713_v5, %v5712_v4  ;;  %v3323_v8 = vld [vmem:[%s4935_s8 + $0x18] sm:$0xf0]  ;;  %v3322_v15 = vor.u32 %v3874_v41, %v3321_v7  ;;  %v3377_v1 = vld [vmem:[%s4935_s8 + $0x80] sm:$0xf]  ;;  %v3385_v54 = vld [vmem:[%s4935_s8 + $0x88] sm:$0xf] }
 0x1cc   : > { %2113 = vmatpush.bf16.msrb.mxu3 %v932_v46  ;;  %2282 = vmatpush.bf16.msrb.mxu0 %v940_v42  ;;  %v938_v46 = vpack.c.bf16 %v892_v16, %v5125_v12  ;;  %v912_v42 = vpack.c.bf16 %v5099_v61, %v5091_v57  ;;  %v3871_v57 = vld [vmem:[%s4935_s8 + $0x4] sm:$0xf]  ;;  %v936_v61 = vpack.c.bf16 %v5105_v0, %v5097_v60  ;;  %v5716_v12 = vld [vmem:[#allocation31_spill] sm:$0xff]  ;;  %v3393_v5 = vld [vmem:[%s4935_s8 + $0xa0] sm:$0xf] }
 0x1cd   : > { %1777 = vmatpush.bf16.msrb.mxu1 %v914_v33  ;;  %1946 = vmatpush.bf16.msrb.mxu2 %v922_v34  ;;  %v3318_v59 = vor.u32 %v3871_v57, %v3315_v62  ;;  %v5711_v60 = vld [vmem:[#allocation37_spill] sm:$0xff]  ;;  %v934_v14 = vpack.c.bf16 %v5717_v13, %v5716_v12  ;;  %v3326_v16 = vor.u32 %v3872_v45, %v3323_v8  ;;  %v3880_v33 = vld [vmem:[%s4935_s8 + $0x4c] sm:$0xf]  ;;  %v3355_v34 = vld [vmem:[%s4935_s8 + $0x58] sm:$0xf0] }
 0x1ce   : > { %v927_v0 = vpack.c.bf16 %v5711_v60, %v5710_v3  ;;  %v3379_v62 = vld [vmem:[%s4935_s8 + $0x90] sm:$0xf0]  ;;  %v3378_v53 = vor.u32 %v3889_v49, %v3377_v1  ;;  %v3401_v45 = vld [vmem:[%s4935_s8 + $0xa8] sm:$0xf]  ;;  %v3894_v8 = vld [vmem:[%s4935_s8 + $0xb4] sm:$0xf0]  ;;  %v3406_v12 = vor.u32 %v3892_v9, %v3403_v10 }
 0x1cf   : > { %v3395_v4 = vld [vmem:[%s4935_s8 + $0xb0] sm:$0xf0]  ;;  %v3895_v13 = vld [vmem:[%s4935_s8 + $0xc4] sm:$0xf]  ;;  %v3902_v36 = vld [vmem:[%s4935_s8 + $0xf4] sm:$0xf0] }
 0x1d0   : > { %2114 = vmatpush.bf16.msrb.mxu3 %v931_v25  ;;  %2283 = vmatpush.bf16.msrb.mxu0 %v939_v26  ;;  %v3354_v25 = vor.u32 %v3882_v40, %v3353_v39  ;;  %v3358_v26 = vor.u32 %v3880_v33, %v3355_v34  ;;  %v3434_v39 = vor.u32 %v3902_v36, %v3433_v35  ;;  %v3903_v33 = vld [vmem:[%s4935_s8 + $0x104] sm:$0xf]  ;;  %v3443_v34 = vld [vmem:[%s4935_s8 + $0x110] sm:$0xf0] }
 0x1d1   : > { %1778 = vmatpush.bf16.msrb.mxu1 %v913_v44  ;;  %1947 = vmatpush.bf16.msrb.mxu2 %v921_v43  ;;  %v3883_v44 = vld [vmem:[%s4935_s8 + $0x64] sm:$0xf]  ;;  %v3363_v43 = vld [vmem:[%s4935_s8 + $0x70] sm:$0xf0] }
 0x1d2   : > { %v3459_v49 = vld [vmem:[%s4935_s8 + $0x130] sm:$0xf0] }
 0x1d4   : > { %2115 = vmatpush.bf16.msrb.mxu3 %v930_v47  ;;  %2284 = vmatpush.bf16.msrb.mxu0 %v938_v46  ;;  %v3361_v47 = vld [vmem:[%s4935_s8 + $0x60] sm:$0xf]  ;;  %v3885_v46 = vld [vmem:[%s4935_s8 + $0x6c] sm:$0xf0] }
 0x1d5   : > { %1779 = vmatpush.bf16.msrb.mxu1 %v912_v42  ;;  %1948 = vmatpush.bf16.msrb.mxu2 %v920_v48  ;;  %v3366_v42 = vor.u32 %v3883_v44, %v3363_v43  ;;  %v3362_v48 = vor.u32 %v3885_v46, %v3361_v47  ;;  %v3446_v44 = vor.u32 %v3903_v33, %v3443_v34  ;;  %v3449_v46 = vld [vmem:[%s4935_s8 + $0x108] sm:$0xf]  ;;  %v3483_v33 = vld [vmem:[%s4935_s8 + $0x158] sm:$0xf0] }
 0x1d8   : > { %2116 = vmatpush.bf16.msrb.mxu3 %v929_v51  ;;  %2285 = vmatpush.bf16.msrb.mxu0 %v937_v52  ;;  %v3369_v51 = vld [vmem:[%s4935_s8 + $0x68] sm:$0xf]  ;;  %v3886_v52 = vld [vmem:[%s4935_s8 + $0x74] sm:$0xf0] }
 0x1d9   : > { %1780 = vmatpush.bf16.msrb.mxu1 %v911_v55  ;;  %1949 = vmatpush.bf16.msrb.mxu2 %v919_v56  ;;  %v3884_v55 = vld [vmem:[%s4935_s8 + $0x6c] sm:$0xf]  ;;  %v3371_v56 = vld [vmem:[%s4935_s8 + $0x78] sm:$0xf0]  ;;  %v3370_v57 = vor.u32 %v3886_v52, %v3369_v51 }
 0x1da   : > { %v3451_v51 = vld [vmem:[%s4935_s8 + $0x118] sm:$0xf0] }
 0x1dc   : > { %2117 = vmatpush.bf16.msrb.mxu3 %v928_v58  ;;  %2286 = vmatpush.bf16.msrb.mxu0 %v936_v61  ;;  %v3374_v58 = vor.u32 %v3884_v55, %v3371_v56  ;;  %v3887_v61 = vld [vmem:[%s4935_s8 + $0x84] sm:$0xf] }
 0x1dd   : > { %1781 = vmatpush.bf16.msrb.mxu1 %v910_v50  ;;  %1950 = vmatpush.bf16.msrb.mxu2 %v918_v2  ;;  %v3382_v50 = vor.u32 %v3887_v61, %v3379_v62  ;;  %v3890_v2 = vld [vmem:[%s4935_s8 + $0x94] sm:$0xf0]  ;;  %v3907_v62 = vld [vmem:[%s4935_s8 + $0x124] sm:$0xf] }
 0x1de   : > { %v3386_v3 = vor.u32 %v3890_v2, %v3385_v54  ;;  %v942_v2 = vld [vmem:[#allocation2 + $0xb0] sm:$0xff] }
 0x1e0   : > { %2118 = vmatpush.bf16.msrb.mxu3 %v927_v0  ;;  %2287 = vmatpush.bf16.msrb.mxu0 %v935_v6  ;;  %v3891_v0 = vld [vmem:[%s4935_s8 + $0xa4] sm:$0xf]  ;;  %v3893_v6 = vld [vmem:[%s4935_s8 + $0xac] sm:$0xf0] }
 0x1e1   : > { %1951 = vmatmul.bf16.vlgmr.msrb.gmra.mxu2 %v3318_v59  ;;  %1782 = vmatmul.bf16.vlgmr.msrb.gmra.mxu1 %v3314_v63  ;;  %v3888_v59 = vld [vmem:[%s4935_s8 + $0x8c] sm:$0xf]  ;;  %v3387_v63 = vld [vmem:[%s4935_s8 + $0x98] sm:$0xf0]  ;;  %v3398_v7 = vor.u32 %v3891_v0, %v3395_v4  ;;  %v3394_v41 = vor.u32 %v3893_v6, %v3393_v5  ;;  %v3465_v6 = vld [vmem:[%s4935_s8 + $0x128] sm:$0xf] }
 0x1e2   : > { %v3390_v60 = vor.u32 %v3888_v59, %v3387_v63 }
 0x1e4   : > { %2119 = vmatpush.bf16.msrb.mxu3 %v926_v11  ;;  %2288 = vmatpush.bf16.msrb.mxu0 %v934_v14  ;;  %v3402_v11 = vor.u32 %v3894_v8, %v3401_v45  ;;  %v3411_v14 = vld [vmem:[%s4935_s8 + $0xd0] sm:$0xf0]  ;;  %v3467_v45 = vld [vmem:[%s4935_s8 + $0x138] sm:$0xf0] }
 0x1e5   : > { %v3414_v17 = vor.u32 %v3895_v13, %v3411_v14  ;;  %v943_v13 = vld [vmem:[#allocation2 + $0x1b0] sm:$0xff] }
 0x1e7   : > { %2120 = vmatmul.bf16.vlgmr.msrb.gmra.mxu3 %v3322_v15  ;;  %2289 = vmatmul.bf16.vlgmr.msrb.gmra.mxu0 %v3326_v16  ;;  %v3409_v15 = vld [vmem:[%s4935_s8 + $0xc0] sm:$0xf]  ;;  %v3897_v16 = vld [vmem:[%s4935_s8 + $0xcc] sm:$0xf0] }
 0x1e8   : > { %v3410_v18 = vor.u32 %v3897_v16, %v3409_v15 }
 0x1f1   : > { %1956 = vmatmul.bf16.gmra.mxu2 %v3334_v21  ;;  %1787 = vmatmul.bf16.gmra.mxu1 %v3330_v22  ;;  %v3896_v21 = vld [vmem:[%s4935_s8 + $0xcc] sm:$0xf]  ;;  %v3419_v22 = vld [vmem:[%s4935_s8 + $0xd8] sm:$0xf0] }
 0x1f2   : > { %v3422_v24 = vor.u32 %v3896_v21, %v3419_v22  ;;  %v3475_v22 = vld [vmem:[%s4935_s8 + $0x150] sm:$0xf0] }
 0x1f7   : > { %2125 = vmatmul.bf16.gmra.mxu3 %v3338_v29  ;;  %2294 = vmatmul.bf16.gmra.mxu0 %v3342_v30  ;;  %v3425_v29 = vld [vmem:[%s4935_s8 + $0xe0] sm:$0xf]  ;;  %v3901_v30 = vld [vmem:[%s4935_s8 + $0xec] sm:$0xf0] }
 0x1f8   : > { %v3426_v32 = vor.u32 %v3901_v30, %v3425_v29 }
 0x201   : > { %1961 = vmatmul.bf16.gmra.mxu2 %v3350_v37  ;;  %1792 = vmatmul.bf16.gmra.mxu1 %v3346_v38  ;;  %v3900_v37 = vld [vmem:[%s4935_s8 + $0xec] sm:$0xf]  ;;  %v3435_v38 = vld [vmem:[%s4935_s8 + $0xf8] sm:$0xf0] }
 0x202   : > { %v3438_v40 = vor.u32 %v3900_v37, %v3435_v38  ;;  %v3481_v38 = vld [vmem:[%s4935_s8 + $0x148] sm:$0xf] }
 0x207   : > { %2130 = vmatmul.bf16.gmra.mxu3 %v3354_v25  ;;  %2299 = vmatmul.bf16.gmra.mxu0 %v3358_v26  ;;  %v3441_v25 = vld [vmem:[%s4935_s8 + $0x100] sm:$0xf]  ;;  %v3905_v26 = vld [vmem:[%s4935_s8 + $0x10c] sm:$0xf0] }
 0x208   : > { %v3442_v43 = vor.u32 %v3905_v26, %v3441_v25 }
 0x211   : > { %1966 = vmatmul.bf16.gmra.mxu2 %v3366_v42  ;;  %1797 = vmatmul.bf16.gmra.mxu1 %v3362_v48  ;;  %v3906_v42 = vld [vmem:[%s4935_s8 + $0x114] sm:$0xf0]  ;;  %v3904_v48 = vld [vmem:[%s4935_s8 + $0x10c] sm:$0xf] }
 0x212   : > { %v3450_v52 = vor.u32 %v3906_v42, %v3449_v46  ;;  %v3454_v55 = vor.u32 %v3904_v48, %v3451_v51 }
 0x217   : > { %2135 = vmatmul.bf16.gmra.mxu3 %v3370_v57  ;;  %2304 = vmatmul.bf16.gmra.mxu0 %v3374_v58 }
 0x221   : > { %1971 = vmatmul.bf16.gmra.mxu2 %v3382_v50  ;;  %1802 = vmatmul.bf16.gmra.mxu1 %v3378_v53  ;;  %v3457_v50 = vld [vmem:[%s4935_s8 + $0x120] sm:$0xf]  ;;  %v3909_v53 = vld [vmem:[%s4935_s8 + $0x12c] sm:$0xf0] }
 0x222   : > { %v3458_v0 = vor.u32 %v3909_v53, %v3457_v50 }
 0x227   : > { %2140 = vmatmul.bf16.gmra.mxu3 %v3386_v3  ;;  %2309 = vmatmul.bf16.gmra.mxu0 %v3390_v60  ;;  %v3462_v60 = vor.u32 %v3907_v62, %v3459_v49  ;;  %v3917_v62 = vld [vmem:[%s4935_s8 + $0x16c] sm:$0xf0] }
 0x228   : > { %v946_v49 = vld [vmem:[#allocation2 + $0x50] sm:$0xff] }
 0x231   : > { %1976 = vmatmul.bf16.gmra.mxu2 %v3398_v7  ;;  %1807 = vmatmul.bf16.gmra.mxu1 %v3394_v41  ;;  %v3910_v7 = vld [vmem:[%s4935_s8 + $0x134] sm:$0xf0]  ;;  %v3908_v41 = vld [vmem:[%s4935_s8 + $0x12c] sm:$0xf] }
 0x237   : > { %2145 = vmatmul.bf16.gmra.mxu3 %v3402_v11  ;;  %2314 = vmatmul.bf16.gmra.mxu0 %v3406_v12  ;;  %v3466_v11 = vor.u32 %v3910_v7, %v3465_v6  ;;  %v3470_v12 = vor.u32 %v3908_v41, %v3467_v45 }
 0x241   : > { %1981 = vmatmul.bf16.gmra.mxu2 %v3414_v17  ;;  %1812 = vmatmul.bf16.gmra.mxu1 %v3410_v18 }
 0x247   : > { %2150 = vmatmul.bf16.gmra.mxu3 %v3418_v23  ;;  %2319 = vmatmul.bf16.gmra.mxu0 %v3422_v24  ;;  %v3473_v23 = vld [vmem:[%s4935_s8 + $0x140] sm:$0xf]  ;;  %v3913_v24 = vld [vmem:[%s4935_s8 + $0x14c] sm:$0xf0] }
 0x248   : > { %v3474_v35 = vor.u32 %v3913_v24, %v3473_v23 }
 0x251   : > { %1986 = vmatmul.bf16.gmra.mxu2 %v3430_v31  ;;  %1817 = vmatmul.bf16.gmra.mxu1 %v3426_v32  ;;  %v3478_v32 = vor.u32 %v3911_v20, %v3475_v22  ;;  %v3921_v20 = vld [vmem:[%s4935_s8 + $0x18c] sm:$0xf0] }
 0x252   : > { %v948_v22 = vld [vmem:[#allocation2 + $0x130] sm:$0xff] }
 0x257   : > { %2155 = vmatmul.bf16.gmra.mxu3 %v3434_v39  ;;  %2324 = vmatmul.bf16.gmra.mxu0 %v3438_v40  ;;  %v3914_v39 = vld [vmem:[%s4935_s8 + $0x154] sm:$0xf0]  ;;  %v3912_v40 = vld [vmem:[%s4935_s8 + $0x14c] sm:$0xf] }
 0x25e   : > { %v1783_v47 = vpop.f32.mrf.mxu1 }
 0x261   : > { %1991 = vmatmul.bf16.gmra.mxu2 %v3446_v44  ;;  %1822 = vmatmul.bf16.gmra.mxu1 %v3442_v43  ;;  %v3482_v44 = vor.u32 %v3914_v39, %v3481_v38  ;;  %v3486_v43 = vor.u32 %v3912_v40, %v3483_v33 }
 0x264   : > { %v1952_v56 = vpop.f32.mrf.mxu2  ;;  %v2290_v57 = vpop.f32.mrf.mxu0 }
 0x265   : > { %v1953_v61 = vadd.f32 %v1952_v56, %v1783_v47  ;;  %v945_v47 = vld [vmem:[#allocation2 + $0x18] sm:$0xff]  ;;  %v3915_v56 = vld [vmem:[%s4935_s8 + $0x164] sm:$0xf] }
 0x266   : > { %v1785_v58 = vpop.f32.mrf.mxu1 }
 0x267   : > { %2160 = vmatmul.bf16.gmra.mxu3 %v3450_v52  ;;  %2329 = vmatmul.bf16.gmra.mxu0 %v3454_v55 }
 0x26a   : > { %v2121_v1 = vpop.f32.mrf.mxu3 }
 0x26b   : > { %v2122_v54 = vadd.f32 %v2121_v1, %v1953_v61  ;;  %v3489_v61 = vld [vmem:[%s4935_s8 + $0x160] sm:$0xf] }
 0x26c   : > { %v1954_v59 = vpop.f32.mrf.mxu2  ;;  %v2292_v63 = vpop.f32.mrf.mxu0 }
 0x26d   : > { %v2291_v3 = vadd.f32 %v2290_v57, %v2122_v54  ;;  %v1955_v8 = vadd.f32 %v1954_v59, %v1785_v58  ;;  %v3491_v58 = vld [vmem:[%s4935_s8 + $0x170] sm:$0xf0]  ;;  %v3490_v59 = vor.u32 %v3917_v62, %v3489_v61 }
 0x26e   : > { %v1788_v4 = vpop.f32.mrf.mxu1 }
 0x26f   : > { %v2450_v5 = vadd.f32 %v2291_v3, %v942_v2  ;;  %v3494_v2 = vor.u32 %v3915_v56, %v3491_v58  ;;  %v3925_v56 = vld [vmem:[%s4935_s8 + $0x1ac] sm:$0xf0]  ;;  %v950_v58 = vld [vmem:[#allocation2 + $0x180] sm:$0xff] }
 0x271   : > { %2514 = vst [vmem:[#allocation2 + $0xb0] sm:$0xff] %v2450_v5  ;;  %1996 = vmatmul.bf16.gmra.mxu2 %v3462_v60  ;;  %1827 = vmatmul.bf16.gmra.mxu1 %v3458_v0  ;;  %v3497_v60 = vld [vmem:[%s4935_s8 + $0x168] sm:$0xf]  ;;  %v3918_v0 = vld [vmem:[%s4935_s8 + $0x174] sm:$0xf0] }
 0x272   : > { %v2123_v9 = vpop.f32.mrf.mxu3  ;;  %v3499_v5 = vld [vmem:[%s4935_s8 + $0x178] sm:$0xf0]  ;;  %v3498_v45 = vor.u32 %v3918_v0, %v3497_v60 }
 0x273   : > { %v2124_v10 = vadd.f32 %v2123_v9, %v1955_v8  ;;  %v947_v9 = vld [vmem:[#allocation2 + $0x168] sm:$0xff] }
 0x274   : > { %v1957_v14 = vpop.f32.mrf.mxu2  ;;  %v2295_v15 = vpop.f32.mrf.mxu0 }
 0x275   : > { %v2293_v16 = vadd.f32 %v2292_v63, %v2124_v10  ;;  %v1958_v19 = vadd.f32 %v1957_v14, %v1788_v4  ;;  %v3916_v4 = vld [vmem:[%s4935_s8 + $0x16c] sm:$0xf] }
 0x276   : > { %v1790_v17 = vpop.f32.mrf.mxu1  ;;  %v3502_v8 = vor.u32 %v3916_v4, %v3499_v5 }
 0x277   : > { %v2451_v18 = vadd.f32 %v2293_v16, %v943_v13  ;;  %2165 = vmatmul.bf16.gmra.mxu3 %v3466_v11  ;;  %2334 = vmatmul.bf16.gmra.mxu0 %v3470_v12  ;;  %v3919_v16 = vld [vmem:[%s4935_s8 + $0x184] sm:$0xf] }
 0x279   : > { %2515 = vst [vmem:[#allocation2 + $0x1b0] sm:$0xff] %v2451_v18  ;;  %v3507_v18 = vld [vmem:[%s4935_s8 + $0x190] sm:$0xf0] }
 0x27a   : > { %v2126_v21 = vpop.f32.mrf.mxu3 }
 0x27b   : > { %v2127_v27 = vadd.f32 %v2126_v21, %v1958_v19  ;;  %v3505_v19 = vld [vmem:[%s4935_s8 + $0x180] sm:$0xf] }
 0x27c   : > { %v1959_v29 = vpop.f32.mrf.mxu2  ;;  %v2297_v30 = vpop.f32.mrf.mxu0 }
 0x27d   : > { %v2296_v31 = vadd.f32 %v2295_v15, %v2127_v27  ;;  %v1960_v34 = vadd.f32 %v1959_v29, %v1790_v17  ;;  %v3506_v29 = vor.u32 %v3921_v20, %v3505_v19 }
 0x27e   : > { %v1793_v36 = vpop.f32.mrf.mxu1 }
 0x27f   : > { %v2452_v37 = vadd.f32 %v2296_v31, %v944_v28  ;;  %v3510_v28 = vor.u32 %v3919_v16, %v3507_v18  ;;  %v3929_v16 = vld [vmem:[%s4935_s8 + $0x1cc] sm:$0xf0]  ;;  %v952_v18 = vld [vmem:[#allocation2 + $0x118] sm:$0xff] }
 0x281   : > { %2516 = vst [vmem:[#allocation2 + $0xd8] sm:$0xff] %v2452_v37  ;;  %2001 = vmatmul.bf16.gmra.mxu2 %v3478_v32  ;;  %1832 = vmatmul.bf16.gmra.mxu1 %v3474_v35  ;;  %v3513_v32 = vld [vmem:[%s4935_s8 + $0x188] sm:$0xf]  ;;  %v3922_v35 = vld [vmem:[%s4935_s8 + $0x194] sm:$0xf0] }
 0x282   : > { %v2128_v25 = vpop.f32.mrf.mxu3  ;;  %v3515_v37 = vld [vmem:[%s4935_s8 + $0x198] sm:$0xf0]  ;;  %v3514_v33 = vor.u32 %v3922_v35, %v3513_v32 }
 0x283   : > { %v2129_v26 = vadd.f32 %v2128_v25, %v1960_v34  ;;  %v949_v25 = vld [vmem:[#allocation2 + $0x48] sm:$0xff] }
 0x284   : > { %v1962_v46 = vpop.f32.mrf.mxu2  ;;  %v2300_v42 = vpop.f32.mrf.mxu0 }
 0x285   : > { %v2298_v48 = vadd.f32 %v2297_v30, %v2129_v26  ;;  %v1963_v55 = vadd.f32 %v1962_v46, %v1793_v36  ;;  %v3920_v36 = vld [vmem:[%s4935_s8 + $0x18c] sm:$0xf] }
 0x286   : > { %v1795_v51 = vpop.f32.mrf.mxu1  ;;  %v3518_v34 = vor.u32 %v3920_v36, %v3515_v37 }
 0x287   : > { %v2453_v52 = vadd.f32 %v2298_v48, %v945_v47  ;;  %2170 = vmatmul.bf16.gmra.mxu3 %v3482_v44  ;;  %2339 = vmatmul.bf16.gmra.mxu0 %v3486_v43  ;;  %v3923_v48 = vld [vmem:[%s4935_s8 + $0x1a4] sm:$0xf] }
 0x289   : > { %2517 = vst [vmem:[#allocation2 + $0x18] sm:$0xff] %v2453_v52  ;;  %v3523_v52 = vld [vmem:[%s4935_s8 + $0x1b0] sm:$0xf0] }
 0x28a   : > { %v2131_v57 = vpop.f32.mrf.mxu3 }
 0x28b   : > { %v2132_v1 = vadd.f32 %v2131_v57, %v1963_v55  ;;  %v3521_v55 = vld [vmem:[%s4935_s8 + $0x1a0] sm:$0xf] }
 0x28c   : > { %v1964_v50 = vpop.f32.mrf.mxu2  ;;  %v2302_v53 = vpop.f32.mrf.mxu0 }
 0x28d   : > { %v2301_v54 = vadd.f32 %v2300_v42, %v2132_v1  ;;  %v1965_v6 = vadd.f32 %v1964_v50, %v1795_v51  ;;  %v3522_v50 = vor.u32 %v3925_v56, %v3521_v55 }
 0x28e   : > { %v1798_v63 = vpop.f32.mrf.mxu1 }
 0x28f   : > { %v2454_v3 = vadd.f32 %v2301_v54, %v946_v49  ;;  %v3526_v49 = vor.u32 %v3923_v48, %v3523_v52  ;;  %v3933_v48 = vld [vmem:[%s4935_s8 + $0x1ec] sm:$0xf0]  ;;  %v954_v52 = vld [vmem:[#allocation2 + $0x120] sm:$0xff] }
 0x291   : > { %2518 = vst [vmem:[#allocation2 + $0x50] sm:$0xff] %v2454_v3  ;;  %2006 = vmatmul.bf16.gmra.mxu2 %v3494_v2  ;;  %1837 = vmatmul.bf16.gmra.mxu1 %v3490_v59  ;;  %v3529_v2 = vld [vmem:[%s4935_s8 + $0x1a8] sm:$0xf]  ;;  %v3926_v59 = vld [vmem:[%s4935_s8 + $0x1b4] sm:$0xf0] }
 0x292   : > { %v2133_v7 = vpop.f32.mrf.mxu3  ;;  %v3531_v3 = vld [vmem:[%s4935_s8 + $0x1b8] sm:$0xf0]  ;;  %v3530_v5 = vor.u32 %v3926_v59, %v3529_v2 }
 0x293   : > { %v2134_v41 = vadd.f32 %v2133_v7, %v1965_v6  ;;  %v951_v7 = vld [vmem:[#allocation2 + $0x110] sm:$0xff] }
 0x294   : > { %v1967_v10 = vpop.f32.mrf.mxu2  ;;  %v2305_v11 = vpop.f32.mrf.mxu0 }
 0x295   : > { %v2303_v12 = vadd.f32 %v2302_v53, %v2134_v41  ;;  %v1968_v15 = vadd.f32 %v1967_v10, %v1798_v63  ;;  %v3924_v63 = vld [vmem:[%s4935_s8 + $0x1ac] sm:$0xf] }
 0x296   : > { %v1800_v13 = vpop.f32.mrf.mxu1  ;;  %v3534_v6 = vor.u32 %v3924_v63, %v3531_v3 }
 0x297   : > { %v2455_v14 = vadd.f32 %v2303_v12, %v947_v9  ;;  %2175 = vmatmul.bf16.gmra.mxu3 %v3498_v45  ;;  %2344 = vmatmul.bf16.gmra.mxu0 %v3502_v8  ;;  %v3927_v12 = vld [vmem:[%s4935_s8 + $0x1c4] sm:$0xf] }
 0x299   : > { %2519 = vst [vmem:[#allocation2 + $0x168] sm:$0xff] %v2455_v14  ;;  %v3539_v14 = vld [vmem:[%s4935_s8 + $0x1d0] sm:$0xf0] }
 0x29a   : > { %v2136_v17 = vpop.f32.mrf.mxu3 }
 0x29b   : > { %v2137_v21 = vadd.f32 %v2136_v17, %v1968_v15  ;;  %v3537_v15 = vld [vmem:[%s4935_s8 + $0x1c0] sm:$0xf] }
 0x29c   : > { %v1969_v23 = vpop.f32.mrf.mxu2  ;;  %v2307_v24 = vpop.f32.mrf.mxu0 }
 0x29d   : > { %v2306_v27 = vadd.f32 %v2305_v11, %v2137_v21  ;;  %v1970_v38 = vadd.f32 %v1969_v23, %v1800_v13  ;;  %v3538_v23 = vor.u32 %v3929_v16, %v3537_v15 }
 0x29e   : > { %v1803_v30 = vpop.f32.mrf.mxu1 }
 0x29f   : > { %v2456_v31 = vadd.f32 %v2306_v27, %v948_v22  ;;  %v3542_v22 = vor.u32 %v3927_v12, %v3539_v14  ;;  %v3937_v12 = vld [vmem:[%s4935_s8 + $0x20c] sm:$0xf0]  ;;  %v956_v14 = vld [vmem:[#allocation2 + $0x108] sm:$0xff] }
 0x2a1   : > { %2520 = vst [vmem:[#allocation2 + $0x130] sm:$0xff] %v2456_v31  ;;  %2011 = vmatmul.bf16.gmra.mxu2 %v3510_v28  ;;  %1842 = vmatmul.bf16.gmra.mxu1 %v3506_v29  ;;  %v3545_v28 = vld [vmem:[%s4935_s8 + $0x1c8] sm:$0xf]  ;;  %v3930_v29 = vld [vmem:[%s4935_s8 + $0x1d4] sm:$0xf0] }
 0x2a2   : > { %v2138_v39 = vpop.f32.mrf.mxu3  ;;  %v3547_v31 = vld [vmem:[%s4935_s8 + $0x1d8] sm:$0xf0]  ;;  %v3546_v37 = vor.u32 %v3930_v29, %v3545_v28 }
 0x2a3   : > { %v2139_v40 = vadd.f32 %v2138_v39, %v1970_v38  ;;  %v953_v39 = vld [vmem:[#allocation2 + $0x98] sm:$0xff] }
 0x2a4   : > { %v1972_v26 = vpop.f32.mrf.mxu2  ;;  %v2310_v44 = vpop.f32.mrf.mxu0 }
 0x2a5   : > { %v2308_v43 = vadd.f32 %v2307_v24, %v2139_v40  ;;  %v1973_v42 = vadd.f32 %v1972_v26, %v1803_v30  ;;  %v3928_v30 = vld [vmem:[%s4935_s8 + $0x1cc] sm:$0xf] }
 0x2a6   : > { %v1805_v47 = vpop.f32.mrf.mxu1  ;;  %v3550_v38 = vor.u32 %v3928_v30, %v3547_v31 }
 0x2a7   : > { %v2457_v46 = vadd.f32 %v2308_v43, %v949_v25  ;;  %2180 = vmatmul.bf16.gmra.mxu3 %v3514_v33  ;;  %2349 = vmatmul.bf16.gmra.mxu0 %v3518_v34  ;;  %v3931_v43 = vld [vmem:[%s4935_s8 + $0x1e4] sm:$0xf] }
 0x2a9   : > { %2521 = vst [vmem:[#allocation2 + $0x48] sm:$0xff] %v2457_v46  ;;  %v3555_v46 = vld [vmem:[%s4935_s8 + $0x1f0] sm:$0xf0] }
 0x2aa   : > { %v2141_v51 = vpop.f32.mrf.mxu3 }
 0x2ab   : > { %v2142_v57 = vadd.f32 %v2141_v51, %v1973_v42  ;;  %v3553_v42 = vld [vmem:[%s4935_s8 + $0x1e0] sm:$0xf] }
 0x2ac   : > { %v1974_v61 = vpop.f32.mrf.mxu2  ;;  %v2312_v62 = vpop.f32.mrf.mxu0 }
 0x2ad   : > { %v2311_v1 = vadd.f32 %v2310_v44, %v2142_v57  ;;  %v1975_v60 = vadd.f32 %v1974_v61, %v1805_v47  ;;  %v3554_v61 = vor.u32 %v3933_v48, %v3553_v42 }
 0x2ae   : > { %v1808_v53 = vpop.f32.mrf.mxu1 }
 0x2af   : > { %v2458_v54 = vadd.f32 %v2311_v1, %v950_v58  ;;  %v3558_v58 = vor.u32 %v3931_v43, %v3555_v46  ;;  %v3941_v43 = vld [vmem:[%s4935_s8 + $0x22c] sm:$0xf0]  ;;  %v958_v46 = vld [vmem:[#allocation2 + $0xe0] sm:$0xff] }
 0x2b1   : > { %2522 = vst [vmem:[#allocation2 + $0x180] sm:$0xff] %v2458_v54  ;;  %2016 = vmatmul.bf16.gmra.mxu2 %v3526_v49  ;;  %1847 = vmatmul.bf16.gmra.mxu1 %v3522_v50  ;;  %v3561_v49 = vld [vmem:[%s4935_s8 + $0x1e8] sm:$0xf]  ;;  %v3934_v50 = vld [vmem:[%s4935_s8 + $0x1f4] sm:$0xf0] }
 0x2b2   : > { %v2143_v0 = vpop.f32.mrf.mxu3  ;;  %v3563_v54 = vld [vmem:[%s4935_s8 + $0x1f8] sm:$0xf0]  ;;  %v3562_v3 = vor.u32 %v3934_v50, %v3561_v49 }
 0x2b3   : > { %v2144_v4 = vadd.f32 %v2143_v0, %v1975_v60  ;;  %v955_v0 = vld [vmem:[#allocation2 + $0x150] sm:$0xff] }
 0x2b4   : > { %v1977_v41 = vpop.f32.mrf.mxu2  ;;  %v2315_v45 = vpop.f32.mrf.mxu0 }
 0x2b5   : > { %v2313_v8 = vadd.f32 %v2312_v62, %v2144_v4  ;;  %v1978_v11 = vadd.f32 %v1977_v41, %v1808_v53  ;;  %v3932_v53 = vld [vmem:[%s4935_s8 + $0x1ec] sm:$0xf] }
 0x2b6   : > { %v1810_v9 = vpop.f32.mrf.mxu1  ;;  %v3566_v60 = vor.u32 %v3932_v53, %v3563_v54 }
 0x2b7   : > { %v2459_v10 = vadd.f32 %v2313_v8, %v951_v7  ;;  %2185 = vmatmul.bf16.gmra.mxu3 %v3530_v5  ;;  %2354 = vmatmul.bf16.gmra.mxu0 %v3534_v6  ;;  %v3935_v8 = vld [vmem:[%s4935_s8 + $0x204] sm:$0xf] }
 0x2b9   : > { %2523 = vst [vmem:[#allocation2 + $0x110] sm:$0xff] %v2459_v10  ;;  %v3571_v10 = vld [vmem:[%s4935_s8 + $0x210] sm:$0xf0] }
 0x2ba   : > { %v2146_v13 = vpop.f32.mrf.mxu3 }
 0x2bb   : > { %v2147_v17 = vadd.f32 %v2146_v13, %v1978_v11  ;;  %v3569_v11 = vld [vmem:[%s4935_s8 + $0x200] sm:$0xf] }
 0x2bc   : > { %v1979_v19 = vpop.f32.mrf.mxu2  ;;  %v2317_v20 = vpop.f32.mrf.mxu0 }
 0x2bd   : > { %v2316_v21 = vadd.f32 %v2315_v45, %v2147_v17  ;;  %v1980_v32 = vadd.f32 %v1979_v19, %v1810_v9  ;;  %v3570_v19 = vor.u32 %v3937_v12, %v3569_v11 }
 0x2be   : > { %v1813_v24 = vpop.f32.mrf.mxu1 }
 0x2bf   : > { %v2460_v27 = vadd.f32 %v2316_v21, %v952_v18  ;;  %v3574_v18 = vor.u32 %v3935_v8, %v3571_v10  ;;  %v3945_v8 = vld [vmem:[%s4935_s8 + $0x24c] sm:$0xf0]  ;;  %v960_v10 = vld [vmem:[#allocation2 + $0x138] sm:$0xff] }
 0x2c1   : > { %2524 = vst [vmem:[#allocation2 + $0x118] sm:$0xff] %v2460_v27  ;;  %2021 = vmatmul.bf16.gmra.mxu2 %v3542_v22  ;;  %1852 = vmatmul.bf16.gmra.mxu1 %v3538_v23  ;;  %v3577_v22 = vld [vmem:[%s4935_s8 + $0x208] sm:$0xf]  ;;  %v3938_v23 = vld [vmem:[%s4935_s8 + $0x214] sm:$0xf0] }
 0x2c2   : > { %v2148_v35 = vpop.f32.mrf.mxu3  ;;  %v3579_v27 = vld [vmem:[%s4935_s8 + $0x218] sm:$0xf0]  ;;  %v3578_v31 = vor.u32 %v3938_v23, %v3577_v22 }
 0x2c3   : > { %v2149_v36 = vadd.f32 %v2148_v35, %v1980_v32  ;;  %v957_v35 = vld [vmem:[#allocation2 + $0x60] sm:$0xff] }
 0x2c4   : > { %v1982_v40 = vpop.f32.mrf.mxu2  ;;  %v2320_v33 = vpop.f32.mrf.mxu0 }
 0x2c5   : > { %v2318_v34 = vadd.f32 %v2317_v20, %v2149_v36  ;;  %v1983_v44 = vadd.f32 %v1982_v40, %v1813_v24  ;;  %v3936_v24 = vld [vmem:[%s4935_s8 + $0x20c] sm:$0xf] }
 0x2c6   : > { %v1815_v25 = vpop.f32.mrf.mxu1  ;;  %v3582_v32 = vor.u32 %v3936_v24, %v3579_v27 }
 0x2c7   : > { %v2461_v26 = vadd.f32 %v2318_v34, %v953_v39  ;;  %2190 = vmatmul.bf16.gmra.mxu3 %v3546_v37  ;;  %2359 = vmatmul.bf16.gmra.mxu0 %v3550_v38  ;;  %v3939_v34 = vld [vmem:[%s4935_s8 + $0x224] sm:$0xf] }
 0x2c9   : > { %2525 = vst [vmem:[#allocation2 + $0x98] sm:$0xff] %v2461_v26  ;;  %v3587_v26 = vld [vmem:[%s4935_s8 + $0x230] sm:$0xf0] }
 0x2ca   : > { %v2151_v47 = vpop.f32.mrf.mxu3 }
 0x2cb   : > { %v2152_v51 = vadd.f32 %v2151_v47, %v1983_v44  ;;  %v3585_v44 = vld [vmem:[%s4935_s8 + $0x220] sm:$0xf] }
 0x2cc   : > { %v1984_v55 = vpop.f32.mrf.mxu2  ;;  %v2322_v56 = vpop.f32.mrf.mxu0 }
 0x2cd   : > { %v2321_v57 = vadd.f32 %v2320_v33, %v2152_v51  ;;  %v1985_v2 = vadd.f32 %v1984_v55, %v1815_v25  ;;  %v3586_v55 = vor.u32 %v3941_v43, %v3585_v44 }
 0x2ce   : > { %v1818_v62 = vpop.f32.mrf.mxu1 }
 0x2cf   : > { %v2462_v1 = vadd.f32 %v2321_v57, %v954_v52  ;;  %v3590_v52 = vor.u32 %v3939_v34, %v3587_v26  ;;  %v3949_v34 = vld [vmem:[%s4935_s8 + $0x26c] sm:$0xf0]  ;;  %v962_v26 = vld [vmem:[#allocation2 + $0x80] sm:$0xff] }
 0x2d1   : > { %2526 = vst [vmem:[#allocation2 + $0x120] sm:$0xff] %v2462_v1  ;;  %2026 = vmatmul.bf16.gmra.mxu2 %v3558_v58  ;;  %1857 = vmatmul.bf16.gmra.mxu1 %v3554_v61  ;;  %v3593_v58 = vld [vmem:[%s4935_s8 + $0x228] sm:$0xf]  ;;  %v3942_v61 = vld [vmem:[%s4935_s8 + $0x234] sm:$0xf0] }
 0x2d2   : > { %v2153_v59 = vpop.f32.mrf.mxu3  ;;  %v3595_v1 = vld [vmem:[%s4935_s8 + $0x238] sm:$0xf0]  ;;  %v3594_v54 = vor.u32 %v3942_v61, %v3593_v58 }
 0x2d3   : > { %v2154_v63 = vadd.f32 %v2153_v59, %v1985_v2  ;;  %v959_v59 = vld [vmem:[#allocation2 + $0x188] sm:$0xff] }
 0x2d4   : > { %v1987_v4 = vpop.f32.mrf.mxu2  ;;  %v2325_v5 = vpop.f32.mrf.mxu0 }
 0x2d5   : > { %v2323_v6 = vadd.f32 %v2322_v56, %v2154_v63  ;;  %v1988_v45 = vadd.f32 %v1987_v4, %v1818_v62  ;;  %v3940_v62 = vld [vmem:[%s4935_s8 + $0x22c] sm:$0xf] }
 0x2d6   : > { %v1820_v7 = vpop.f32.mrf.mxu1  ;;  %v3598_v2 = vor.u32 %v3940_v62, %v3595_v1 }
 0x2d7   : > { %v2463_v41 = vadd.f32 %v2323_v6, %v955_v0  ;;  %2195 = vmatmul.bf16.gmra.mxu3 %v3562_v3  ;;  %2364 = vmatmul.bf16.gmra.mxu0 %v3566_v60  ;;  %v3943_v6 = vld [vmem:[%s4935_s8 + $0x244] sm:$0xf] }
 0x2d9   : > { %2527 = vst [vmem:[#allocation2 + $0x150] sm:$0xff] %v2463_v41  ;;  %v3603_v41 = vld [vmem:[%s4935_s8 + $0x250] sm:$0xf0] }
 0x2da   : > { %v2156_v9 = vpop.f32.mrf.mxu3 }
 0x2db   : > { %v2157_v13 = vadd.f32 %v2156_v9, %v1988_v45  ;;  %v3601_v45 = vld [vmem:[%s4935_s8 + $0x240] sm:$0xf] }
 0x2dc   : > { %v1989_v15 = vpop.f32.mrf.mxu2  ;;  %v2327_v16 = vpop.f32.mrf.mxu0 }
 0x2dd   : > { %v2326_v17 = vadd.f32 %v2325_v5, %v2157_v13  ;;  %v1990_v28 = vadd.f32 %v1989_v15, %v1820_v7  ;;  %v3602_v15 = vor.u32 %v3945_v8, %v3601_v45 }
 0x2de   : > { %v1823_v20 = vpop.f32.mrf.mxu1 }
 0x2df   : > { %v2464_v21 = vadd.f32 %v2326_v17, %v956_v14  ;;  %v3606_v14 = vor.u32 %v3943_v6, %v3603_v41  ;;  %v3953_v6 = vld [vmem:[%s4935_s8 + $0x28c] sm:$0xf0]  ;;  %v964_v41 = vld [vmem:[#allocation2 + $0x1b8] sm:$0xff] }
 0x2e1   : > { %2528 = vst [vmem:[#allocation2 + $0x108] sm:$0xff] %v2464_v21  ;;  %2031 = vmatmul.bf16.gmra.mxu2 %v3574_v18  ;;  %1862 = vmatmul.bf16.gmra.mxu1 %v3570_v19  ;;  %v3609_v18 = vld [vmem:[%s4935_s8 + $0x248] sm:$0xf]  ;;  %v3946_v19 = vld [vmem:[%s4935_s8 + $0x254] sm:$0xf0] }
 0x2e2   : > { %v2158_v29 = vpop.f32.mrf.mxu3  ;;  %v3611_v21 = vld [vmem:[%s4935_s8 + $0x258] sm:$0xf0]  ;;  %v3610_v27 = vor.u32 %v3946_v19, %v3609_v18 }
 0x2e3   : > { %v2159_v30 = vadd.f32 %v2158_v29, %v1990_v28  ;;  %v961_v29 = vld [vmem:[#allocation2 + $0x140] sm:$0xff] }
 0x2e4   : > { %v1992_v36 = vpop.f32.mrf.mxu2  ;;  %v2330_v37 = vpop.f32.mrf.mxu0 }
 0x2e5   : > { %v2328_v38 = vadd.f32 %v2327_v16, %v2159_v30  ;;  %v1993_v33 = vadd.f32 %v1992_v36, %v1823_v20  ;;  %v3944_v20 = vld [vmem:[%s4935_s8 + $0x24c] sm:$0xf] }
 0x2e6   : > { %v1825_v39 = vpop.f32.mrf.mxu1  ;;  %v3614_v28 = vor.u32 %v3944_v20, %v3611_v21 }
 0x2e7   : > { %v2465_v40 = vadd.f32 %v2328_v38, %v957_v35  ;;  %2200 = vmatmul.bf16.gmra.mxu3 %v3578_v31  ;;  %2369 = vmatmul.bf16.gmra.mxu0 %v3582_v32  ;;  %v3947_v38 = vld [vmem:[%s4935_s8 + $0x264] sm:$0xf] }
 0x2e9   : > { %2529 = vst [vmem:[#allocation2 + $0x60] sm:$0xff] %v2465_v40  ;;  %v3619_v40 = vld [vmem:[%s4935_s8 + $0x270] sm:$0xf0] }
 0x2ea   : > { %v2161_v25 = vpop.f32.mrf.mxu3 }
 0x2eb   : > { %v2162_v47 = vadd.f32 %v2161_v25, %v1993_v33  ;;  %v3617_v33 = vld [vmem:[%s4935_s8 + $0x260] sm:$0xf] }
 0x2ec   : > { %v1994_v42 = vpop.f32.mrf.mxu2  ;;  %v2332_v48 = vpop.f32.mrf.mxu0 }
 0x2ed   : > { %v2331_v51 = vadd.f32 %v2330_v37, %v2162_v47  ;;  %v1995_v49 = vadd.f32 %v1994_v42, %v1825_v39  ;;  %v3618_v42 = vor.u32 %v3949_v34, %v3617_v33 }
 0x2ee   : > { %v1828_v56 = vpop.f32.mrf.mxu1 }
 0x2ef   : > { %v2466_v57 = vadd.f32 %v2331_v51, %v958_v46  ;;  %v3622_v46 = vor.u32 %v3947_v38, %v3619_v40  ;;  %v3957_v38 = vld [vmem:[%s4935_s8 + $0x2ac] sm:$0xf0]  ;;  %v966_v40 = vld [vmem:[#allocation2 + $0x1e8] sm:$0xff] }
 0x2f1   : > { %2530 = vst [vmem:[#allocation2 + $0xe0] sm:$0xff] %v2466_v57  ;;  %2036 = vmatmul.bf16.gmra.mxu2 %v3590_v52  ;;  %1867 = vmatmul.bf16.gmra.mxu1 %v3586_v55  ;;  %v3625_v52 = vld [vmem:[%s4935_s8 + $0x268] sm:$0xf]  ;;  %v3950_v55 = vld [vmem:[%s4935_s8 + $0x274] sm:$0xf0] }
 0x2f2   : > { %v2163_v50 = vpop.f32.mrf.mxu3  ;;  %v3627_v57 = vld [vmem:[%s4935_s8 + $0x278] sm:$0xf0]  ;;  %v3626_v1 = vor.u32 %v3950_v55, %v3625_v52 }
 0x2f3   : > { %v2164_v53 = vadd.f32 %v2163_v50, %v1995_v49  ;;  %v963_v50 = vld [vmem:[#allocation2 + $0x1a8] sm:$0xff] }
 0x2f4   : > { %v1997_v63 = vpop.f32.mrf.mxu2  ;;  %v2335_v3 = vpop.f32.mrf.mxu0 }
 0x2f5   : > { %v2333_v60 = vadd.f32 %v2332_v48, %v2164_v53  ;;  %v1998_v5 = vadd.f32 %v1997_v63, %v1828_v56  ;;  %v3948_v56 = vld [vmem:[%s4935_s8 + $0x26c] sm:$0xf] }
 0x2f6   : > { %v1830_v0 = vpop.f32.mrf.mxu1  ;;  %v3630_v49 = vor.u32 %v3948_v56, %v3627_v57 }
 0x2f7   : > { %v2467_v4 = vadd.f32 %v2333_v60, %v959_v59  ;;  %2205 = vmatmul.bf16.gmra.mxu3 %v3594_v54  ;;  %2374 = vmatmul.bf16.gmra.mxu0 %v3598_v2  ;;  %v3951_v60 = vld [vmem:[%s4935_s8 + $0x284] sm:$0xf] }
 0x2f9   : > { %2531 = vst [vmem:[#allocation2 + $0x188] sm:$0xff] %v2467_v4  ;;  %v3635_v4 = vld [vmem:[%s4935_s8 + $0x290] sm:$0xf0] }
 0x2fa   : > { %v2166_v7 = vpop.f32.mrf.mxu3 }
 0x2fb   : > { %v2167_v9 = vadd.f32 %v2166_v7, %v1998_v5  ;;  %v3633_v5 = vld [vmem:[%s4935_s8 + $0x280] sm:$0xf] }
 0x2fc   : > { %v1999_v11 = vpop.f32.mrf.mxu2  ;;  %v2337_v12 = vpop.f32.mrf.mxu0 }
 0x2fd   : > { %v2336_v13 = vadd.f32 %v2335_v3, %v2167_v9  ;;  %v2000_v22 = vadd.f32 %v1999_v11, %v1830_v0  ;;  %v3634_v11 = vor.u32 %v3953_v6, %v3633_v5 }
 0x2fe   : > { %v1833_v16 = vpop.f32.mrf.mxu1 }
 0x2ff   : > { %v2468_v17 = vadd.f32 %v2336_v13, %v960_v10  ;;  %v3638_v10 = vor.u32 %v3951_v60, %v3635_v4  ;;  %v3961_v60 = vld [vmem:[%s4935_s8 + $0x2cc] sm:$0xf0]  ;;  %v968_v4 = vld [vmem:[#allocation2 + $0x160] sm:$0xff] }
 0x301   : > { %2532 = vst [vmem:[#allocation2 + $0x138] sm:$0xff] %v2468_v17  ;;  %2041 = vmatmul.bf16.gmra.mxu2 %v3606_v14  ;;  %1872 = vmatmul.bf16.gmra.mxu1 %v3602_v15  ;;  %v3641_v14 = vld [vmem:[%s4935_s8 + $0x288] sm:$0xf]  ;;  %v3954_v15 = vld [vmem:[%s4935_s8 + $0x294] sm:$0xf0] }
 0x302   : > { %v2168_v23 = vpop.f32.mrf.mxu3  ;;  %v3643_v17 = vld [vmem:[%s4935_s8 + $0x298] sm:$0xf0]  ;;  %v3642_v21 = vor.u32 %v3954_v15, %v3641_v14 }
 0x303   : > { %v2169_v24 = vadd.f32 %v2168_v23, %v2000_v22  ;;  %v965_v23 = vld [vmem:[#allocation2 + $0x28] sm:$0xff] }
 0x304   : > { %v2002_v30 = vpop.f32.mrf.mxu2  ;;  %v2340_v31 = vpop.f32.mrf.mxu0 }
 0x305   : > { %v2338_v32 = vadd.f32 %v2337_v12, %v2169_v24  ;;  %v2003_v37 = vadd.f32 %v2002_v30, %v1833_v16  ;;  %v3952_v16 = vld [vmem:[%s4935_s8 + $0x28c] sm:$0xf] }
 0x306   : > { %v1835_v35 = vpop.f32.mrf.mxu1  ;;  %v3646_v22 = vor.u32 %v3952_v16, %v3643_v17 }
 0x307   : > { %v2469_v36 = vadd.f32 %v2338_v32, %v961_v29  ;;  %2210 = vmatmul.bf16.gmra.mxu3 %v3610_v27  ;;  %2379 = vmatmul.bf16.gmra.mxu0 %v3614_v28  ;;  %v3955_v32 = vld [vmem:[%s4935_s8 + $0x2a4] sm:$0xf] }
 0x309   : > { %2533 = vst [vmem:[#allocation2 + $0x140] sm:$0xff] %v2469_v36  ;;  %v3651_v36 = vld [vmem:[%s4935_s8 + $0x2b0] sm:$0xf0] }
 0x30a   : > { %v2171_v39 = vpop.f32.mrf.mxu3 }
 0x30b   : > { %v2172_v25 = vadd.f32 %v2171_v39, %v2003_v37  ;;  %v3649_v37 = vld [vmem:[%s4935_s8 + $0x2a0] sm:$0xf] }
 0x30c   : > { %v2004_v44 = vpop.f32.mrf.mxu2  ;;  %v2342_v43 = vpop.f32.mrf.mxu0 }
 0x30d   : > { %v2341_v47 = vadd.f32 %v2340_v31, %v2172_v25  ;;  %v2005_v58 = vadd.f32 %v2004_v44, %v1835_v35  ;;  %v3650_v44 = vor.u32 %v3957_v38, %v3649_v37 }
 0x30e   : > { %v1838_v48 = vpop.f32.mrf.mxu1 }
 0x30f   : > { %v2470_v51 = vadd.f32 %v2341_v47, %v962_v26  ;;  %v3654_v26 = vor.u32 %v3955_v32, %v3651_v36  ;;  %v3965_v32 = vld [vmem:[%s4935_s8 + $0x2ec] sm:$0xf0]  ;;  %v970_v36 = vld [vmem:[#allocation2 + $0x1e0] sm:$0xff] }
 0x311   : > { %2534 = vst [vmem:[#allocation2 + $0x80] sm:$0xff] %v2470_v51  ;;  %2046 = vmatmul.bf16.gmra.mxu2 %v3622_v46  ;;  %1877 = vmatmul.bf16.gmra.mxu1 %v3618_v42  ;;  %v3657_v46 = vld [vmem:[%s4935_s8 + $0x2a8] sm:$0xf]  ;;  %v3958_v42 = vld [vmem:[%s4935_s8 + $0x2b4] sm:$0xf0] }
 0x312   : > { %v2173_v61 = vpop.f32.mrf.mxu3  ;;  %v3659_v51 = vld [vmem:[%s4935_s8 + $0x2b8] sm:$0xf0]  ;;  %v3658_v57 = vor.u32 %v3958_v42, %v3657_v46 }
 0x313   : > { %v2174_v62 = vadd.f32 %v2173_v61, %v2005_v58  ;;  %v967_v61 = vld [vmem:[#allocation2 + $0xf8] sm:$0xff] }
 0x314   : > { %v2007_v53 = vpop.f32.mrf.mxu2  ;;  %v2345_v54 = vpop.f32.mrf.mxu0 }
 0x315   : > { %v2343_v2 = vadd.f32 %v2342_v43, %v2174_v62  ;;  %v2008_v3 = vadd.f32 %v2007_v53, %v1838_v48  ;;  %v3956_v48 = vld [vmem:[%s4935_s8 + $0x2ac] sm:$0xf] }
 0x316   : > { %v1840_v59 = vpop.f32.mrf.mxu1  ;;  %v3662_v58 = vor.u32 %v3956_v48, %v3659_v51 }
 0x317   : > { %v2471_v63 = vadd.f32 %v2343_v2, %v963_v50  ;;  %2215 = vmatmul.bf16.gmra.mxu3 %v3626_v1  ;;  %2384 = vmatmul.bf16.gmra.mxu0 %v3630_v49  ;;  %v3959_v2 = vld [vmem:[%s4935_s8 + $0x2c4] sm:$0xf] }
 0x319   : > { %2535 = vst [vmem:[#allocation2 + $0x1a8] sm:$0xff] %v2471_v63  ;;  %v3667_v63 = vld [vmem:[%s4935_s8 + $0x2d0] sm:$0xf0] }
 0x31a   : > { %v2176_v0 = vpop.f32.mrf.mxu3 }
 0x31b   : > { %v2177_v7 = vadd.f32 %v2176_v0, %v2008_v3  ;;  %v3665_v3 = vld [vmem:[%s4935_s8 + $0x2c0] sm:$0xf] }
 0x31c   : > { %v2009_v45 = vpop.f32.mrf.mxu2  ;;  %v2347_v8 = vpop.f32.mrf.mxu0 }
 0x31d   : > { %v2346_v9 = vadd.f32 %v2345_v54, %v2177_v7  ;;  %v2010_v18 = vadd.f32 %v2009_v45, %v1840_v59  ;;  %v3666_v45 = vor.u32 %v3961_v60, %v3665_v3 }
 0x31e   : > { %v1843_v12 = vpop.f32.mrf.mxu1 }
 0x31f   : > { %v2472_v13 = vadd.f32 %v2346_v9, %v964_v41  ;;  %v3670_v41 = vor.u32 %v3959_v2, %v3667_v63  ;;  %v3969_v2 = vld [vmem:[%s4935_s8 + $0x30c] sm:$0xf0] }
 0x320   : > { %v972_v63 = vld [vmem:[#allocation2 + $0xf0] sm:$0xff] }
 0x321   : > { %2536 = vst [vmem:[#allocation2 + $0x1b8] sm:$0xff] %v2472_v13  ;;  %2051 = vmatmul.bf16.gmra.mxu2 %v3638_v10  ;;  %1882 = vmatmul.bf16.gmra.mxu1 %v3634_v11  ;;  %v3673_v10 = vld [vmem:[%s4935_s8 + $0x2c8] sm:$0xf]  ;;  %v3962_v11 = vld [vmem:[%s4935_s8 + $0x2d4] sm:$0xf0] }
 0x322   : > { %v2178_v19 = vpop.f32.mrf.mxu3  ;;  %v3675_v13 = vld [vmem:[%s4935_s8 + $0x2d8] sm:$0xf0]  ;;  %v3674_v17 = vor.u32 %v3962_v11, %v3673_v10 }
 0x323   : > { %v2179_v20 = vadd.f32 %v2178_v19, %v2010_v18  ;;  %v969_v19 = vld [vmem:[#allocation2 + $0x30] sm:$0xff] }
 0x324   : > { %v2012_v24 = vpop.f32.mrf.mxu2  ;;  %v2350_v27 = vpop.f32.mrf.mxu0 }
 0x325   : > { %v2348_v28 = vadd.f32 %v2347_v8, %v2179_v20  ;;  %v2013_v31 = vadd.f32 %v2012_v24, %v1843_v12  ;;  %v3960_v12 = vld [vmem:[%s4935_s8 + $0x2cc] sm:$0xf] }
 0x326   : > { %v1845_v29 = vpop.f32.mrf.mxu1  ;;  %v3678_v18 = vor.u32 %v3960_v12, %v3675_v13 }
 0x327   : > { %v2473_v30 = vadd.f32 %v2348_v28, %v965_v23  ;;  %2220 = vmatmul.bf16.gmra.mxu3 %v3642_v21  ;;  %2389 = vmatmul.bf16.gmra.mxu0 %v3646_v22  ;;  %v3963_v28 = vld [vmem:[%s4935_s8 + $0x2e4] sm:$0xf] }
 0x329   : > { %2537 = vst [vmem:[#allocation2 + $0x28] sm:$0xff] %v2473_v30  ;;  %v3683_v30 = vld [vmem:[%s4935_s8 + $0x2f0] sm:$0xf0] }
 0x32a   : > { %v2181_v35 = vpop.f32.mrf.mxu3 }
 0x32b   : > { %v2182_v39 = vadd.f32 %v2181_v35, %v2013_v31  ;;  %v3681_v31 = vld [vmem:[%s4935_s8 + $0x2e0] sm:$0xf] }
 0x32c   : > { %v2014_v33 = vpop.f32.mrf.mxu2  ;;  %v2352_v34 = vpop.f32.mrf.mxu0 }
 0x32d   : > { %v2351_v25 = vadd.f32 %v2350_v27, %v2182_v39  ;;  %v2015_v52 = vadd.f32 %v2014_v33, %v1845_v29  ;;  %v3682_v33 = vor.u32 %v3965_v32, %v3681_v31 }
 0x32e   : > { %v1848_v43 = vpop.f32.mrf.mxu1 }
 0x32f   : > { %v2474_v47 = vadd.f32 %v2351_v25, %v966_v40  ;;  %v3686_v40 = vor.u32 %v3963_v28, %v3683_v30  ;;  %v3973_v28 = vld [vmem:[%s4935_s8 + $0x32c] sm:$0xf0]  ;;  %v974_v30 = vld [vmem:[#allocation2 + $0x148] sm:$0xff] }
 0x331   : > { %2538 = vst [vmem:[#allocation2 + $0x1e8] sm:$0xff] %v2474_v47  ;;  %2056 = vmatmul.bf16.gmra.mxu2 %v3654_v26  ;;  %1887 = vmatmul.bf16.gmra.mxu1 %v3650_v44  ;;  %v3689_v26 = vld [vmem:[%s4935_s8 + $0x2e8] sm:$0xf]  ;;  %v3966_v44 = vld [vmem:[%s4935_s8 + $0x2f4] sm:$0xf0] }
 0x332   : > { %v2183_v55 = vpop.f32.mrf.mxu3  ;;  %v3691_v47 = vld [vmem:[%s4935_s8 + $0x2f8] sm:$0xf0]  ;;  %v3690_v51 = vor.u32 %v3966_v44, %v3689_v26 }
 0x333   : > { %v2184_v56 = vadd.f32 %v2183_v55, %v2015_v52  ;;  %v971_v55 = vld [vmem:[#allocation2] sm:$0xff] }
 0x334   : > { %v2017_v62 = vpop.f32.mrf.mxu2  ;;  %v2355_v1 = vpop.f32.mrf.mxu0 }
 0x335   : > { %v2353_v49 = vadd.f32 %v2352_v34, %v2184_v56  ;;  %v2018_v54 = vadd.f32 %v2017_v62, %v1848_v43  ;;  %v3964_v43 = vld [vmem:[%s4935_s8 + $0x2ec] sm:$0xf] }
 0x336   : > { %v1850_v50 = vpop.f32.mrf.mxu1  ;;  %v3694_v52 = vor.u32 %v3964_v43, %v3691_v47 }
 0x337   : > { %v2475_v53 = vadd.f32 %v2353_v49, %v967_v61  ;;  %2225 = vmatmul.bf16.gmra.mxu3 %v3658_v57  ;;  %2394 = vmatmul.bf16.gmra.mxu0 %v3662_v58  ;;  %v3967_v49 = vld [vmem:[%s4935_s8 + $0x304] sm:$0xf] }
 0x339   : > { %2539 = vst [vmem:[#allocation2 + $0xf8] sm:$0xff] %v2475_v53  ;;  %v3699_v53 = vld [vmem:[%s4935_s8 + $0x310] sm:$0xf0] }
 0x33a   : > { %v2186_v59 = vpop.f32.mrf.mxu3 }
 0x33b   : > { %v2187_v0 = vadd.f32 %v2186_v59, %v2018_v54  ;;  %v3697_v54 = vld [vmem:[%s4935_s8 + $0x300] sm:$0xf] }
 0x33c   : > { %v2019_v5 = vpop.f32.mrf.mxu2  ;;  %v2357_v6 = vpop.f32.mrf.mxu0 }
 0x33d   : > { %v2356_v7 = vadd.f32 %v2355_v1, %v2187_v0  ;;  %v2020_v14 = vadd.f32 %v2019_v5, %v1850_v50  ;;  %v3698_v5 = vor.u32 %v3969_v2, %v3697_v54 }
 0x33e   : > { %v1853_v8 = vpop.f32.mrf.mxu1 }
 0x33f   : > { %v2476_v9 = vadd.f32 %v2356_v7, %v968_v4  ;;  %v3702_v4 = vor.u32 %v3967_v49, %v3699_v53  ;;  %v3977_v49 = vld [vmem:[%s4935_s8 + $0x34c] sm:$0xf0]  ;;  %v976_v53 = vld [vmem:[#allocation2 + $0x100] sm:$0xff] }
 0x341   : > { %2540 = vst [vmem:[#allocation2 + $0x160] sm:$0xff] %v2476_v9  ;;  %2061 = vmatmul.bf16.gmra.mxu2 %v3670_v41  ;;  %1892 = vmatmul.bf16.gmra.mxu1 %v3666_v45  ;;  %v3705_v41 = vld [vmem:[%s4935_s8 + $0x308] sm:$0xf]  ;;  %v3970_v45 = vld [vmem:[%s4935_s8 + $0x314] sm:$0xf0] }
 0x342   : > { %v2188_v15 = vpop.f32.mrf.mxu3  ;;  %v3707_v9 = vld [vmem:[%s4935_s8 + $0x318] sm:$0xf0]  ;;  %v3706_v13 = vor.u32 %v3970_v45, %v3705_v41 }
 0x343   : > { %v2189_v16 = vadd.f32 %v2188_v15, %v2020_v14  ;;  %v973_v15 = vld [vmem:[#allocation2 + $0x8] sm:$0xff] }
 0x344   : > { %v2022_v20 = vpop.f32.mrf.mxu2  ;;  %v2360_v21 = vpop.f32.mrf.mxu0 }
 0x345   : > { %v2358_v22 = vadd.f32 %v2357_v6, %v2189_v16  ;;  %v2023_v27 = vadd.f32 %v2022_v20, %v1853_v8  ;;  %v3968_v8 = vld [vmem:[%s4935_s8 + $0x30c] sm:$0xf] }
 0x346   : > { %v1855_v23 = vpop.f32.mrf.mxu1  ;;  %v3710_v14 = vor.u32 %v3968_v8, %v3707_v9 }
 0x347   : > { %v2477_v24 = vadd.f32 %v2358_v22, %v969_v19  ;;  %2230 = vmatmul.bf16.gmra.mxu3 %v3674_v17  ;;  %2399 = vmatmul.bf16.gmra.mxu0 %v3678_v18  ;;  %v3971_v22 = vld [vmem:[%s4935_s8 + $0x324] sm:$0xf] }
 0x349   : > { %2541 = vst [vmem:[#allocation2 + $0x30] sm:$0xff] %v2477_v24  ;;  %v3715_v24 = vld [vmem:[%s4935_s8 + $0x330] sm:$0xf0] }
 0x34a   : > { %v2191_v29 = vpop.f32.mrf.mxu3 }
 0x34b   : > { %v2192_v35 = vadd.f32 %v2191_v29, %v2023_v27  ;;  %v3713_v27 = vld [vmem:[%s4935_s8 + $0x320] sm:$0xf] }
 0x34c   : > { %v2024_v37 = vpop.f32.mrf.mxu2  ;;  %v2362_v38 = vpop.f32.mrf.mxu0 }
 0x34d   : > { %v2361_v39 = vadd.f32 %v2360_v21, %v2192_v35  ;;  %v2025_v46 = vadd.f32 %v2024_v37, %v1855_v23  ;;  %v3714_v37 = vor.u32 %v3973_v28, %v3713_v27 }
 0x34e   : > { %v1858_v34 = vpop.f32.mrf.mxu1 }
 0x34f   : > { %v2478_v25 = vadd.f32 %v2361_v39, %v970_v36  ;;  %v3718_v36 = vor.u32 %v3971_v22, %v3715_v24  ;;  %v3981_v22 = vld [vmem:[%s4935_s8 + $0x36c] sm:$0xf0]  ;;  %v978_v24 = vld [vmem:[#allocation2 + $0x40] sm:$0xff] }
 0x351   : > { %2542 = vst [vmem:[#allocation2 + $0x1e0] sm:$0xff] %v2478_v25  ;;  %2066 = vmatmul.bf16.gmra.mxu2 %v3686_v40  ;;  %1897 = vmatmul.bf16.gmra.mxu1 %v3682_v33  ;;  %v3721_v40 = vld [vmem:[%s4935_s8 + $0x328] sm:$0xf]  ;;  %v3974_v33 = vld [vmem:[%s4935_s8 + $0x334] sm:$0xf0] }
 0x352   : > { %v2193_v42 = vpop.f32.mrf.mxu3  ;;  %v3723_v25 = vld [vmem:[%s4935_s8 + $0x338] sm:$0xf0]  ;;  %v3722_v47 = vor.u32 %v3974_v33, %v3721_v40 }
 0x353   : > { %v2194_v48 = vadd.f32 %v2193_v42, %v2025_v46  ;;  %v975_v42 = vld [vmem:[#allocation2 + $0x1d0] sm:$0xff] }
 0x354   : > { %v2027_v56 = vpop.f32.mrf.mxu2  ;;  %v2365_v57 = vpop.f32.mrf.mxu0 }
 0x355   : > { %v2363_v58 = vadd.f32 %v2362_v38, %v2194_v48  ;;  %v2028_v1 = vadd.f32 %v2027_v56, %v1858_v34  ;;  %v3972_v34 = vld [vmem:[%s4935_s8 + $0x32c] sm:$0xf] }
 0x356   : > { %v1860_v61 = vpop.f32.mrf.mxu1  ;;  %v3726_v46 = vor.u32 %v3972_v34, %v3723_v25 }
 0x357   : > { %v2479_v62 = vadd.f32 %v2363_v58, %v971_v55  ;;  %2235 = vmatmul.bf16.gmra.mxu3 %v3690_v51  ;;  %2404 = vmatmul.bf16.gmra.mxu0 %v3694_v52  ;;  %v3975_v58 = vld [vmem:[%s4935_s8 + $0x344] sm:$0xf] }
 0x359   : > { %2543 = vst [vmem:[#allocation2] sm:$0xff] %v2479_v62  ;;  %v3731_v62 = vld [vmem:[%s4935_s8 + $0x350] sm:$0xf0] }
 0x35a   : > { %v2196_v50 = vpop.f32.mrf.mxu3 }
 0x35b   : > { %v2197_v59 = vadd.f32 %v2196_v50, %v2028_v1  ;;  %v3729_v1 = vld [vmem:[%s4935_s8 + $0x340] sm:$0xf] }
 0x35c   : > { %v2029_v3 = vpop.f32.mrf.mxu2  ;;  %v2367_v60 = vpop.f32.mrf.mxu0 }
 0x35d   : > { %v2366_v0 = vadd.f32 %v2365_v57, %v2197_v59  ;;  %v2030_v10 = vadd.f32 %v2029_v3, %v1860_v61  ;;  %v3730_v3 = vor.u32 %v3977_v49, %v3729_v1 }
 0x35e   : > { %v1863_v6 = vpop.f32.mrf.mxu1 }
 0x35f   : > { %v2480_v7 = vadd.f32 %v2366_v0, %v972_v63  ;;  %v3734_v63 = vor.u32 %v3975_v58, %v3731_v62  ;;  %v3985_v58 = vld [vmem:[%s4935_s8 + $0x38c] sm:$0xf0]  ;;  %v980_v62 = vld [vmem:[#allocation2 + $0x20] sm:$0xff] }
 0x361   : > { %2544 = vst [vmem:[#allocation2 + $0xf0] sm:$0xff] %v2480_v7  ;;  %2071 = vmatmul.bf16.gmra.mxu2 %v3702_v4  ;;  %1902 = vmatmul.bf16.gmra.mxu1 %v3698_v5  ;;  %v3737_v4 = vld [vmem:[%s4935_s8 + $0x348] sm:$0xf]  ;;  %v3978_v5 = vld [vmem:[%s4935_s8 + $0x354] sm:$0xf0] }
 0x362   : > { %v2198_v11 = vpop.f32.mrf.mxu3  ;;  %v3739_v7 = vld [vmem:[%s4935_s8 + $0x358] sm:$0xf0]  ;;  %v3738_v9 = vor.u32 %v3978_v5, %v3737_v4 }
 0x363   : > { %v2199_v12 = vadd.f32 %v2198_v11, %v2030_v10  ;;  %v977_v11 = vld [vmem:[#allocation2 + $0xc8] sm:$0xff] }
 0x364   : > { %v2032_v16 = vpop.f32.mrf.mxu2  ;;  %v2370_v17 = vpop.f32.mrf.mxu0 }
 0x365   : > { %v2368_v18 = vadd.f32 %v2367_v60, %v2199_v12  ;;  %v2033_v21 = vadd.f32 %v2032_v16, %v1863_v6  ;;  %v3976_v6 = vld [vmem:[%s4935_s8 + $0x34c] sm:$0xf] }
 0x366   : > { %v1865_v19 = vpop.f32.mrf.mxu1  ;;  %v3742_v10 = vor.u32 %v3976_v6, %v3739_v7 }
 0x367   : > { %v2481_v20 = vadd.f32 %v2368_v18, %v973_v15  ;;  %2240 = vmatmul.bf16.gmra.mxu3 %v3706_v13  ;;  %2409 = vmatmul.bf16.gmra.mxu0 %v3710_v14  ;;  %v3979_v18 = vld [vmem:[%s4935_s8 + $0x364] sm:$0xf] }
 0x369   : > { %2545 = vst [vmem:[#allocation2 + $0x8] sm:$0xff] %v2481_v20  ;;  %v3747_v20 = vld [vmem:[%s4935_s8 + $0x370] sm:$0xf0] }
 0x36a   : > { %v2201_v23 = vpop.f32.mrf.mxu3 }
 0x36b   : > { %v2202_v29 = vadd.f32 %v2201_v23, %v2033_v21  ;;  %v3745_v21 = vld [vmem:[%s4935_s8 + $0x360] sm:$0xf] }
 0x36c   : > { %v2034_v31 = vpop.f32.mrf.mxu2  ;;  %v2372_v32 = vpop.f32.mrf.mxu0 }
 0x36d   : > { %v2371_v35 = vadd.f32 %v2370_v17, %v2202_v29  ;;  %v2035_v26 = vadd.f32 %v2034_v31, %v1865_v19  ;;  %v3746_v31 = vor.u32 %v3981_v22, %v3745_v21 }
 0x36e   : > { %v1868_v38 = vpop.f32.mrf.mxu1 }
 0x36f   : > { %v2482_v39 = vadd.f32 %v2371_v35, %v974_v30  ;;  %v3750_v30 = vor.u32 %v3979_v18, %v3747_v20  ;;  %v3989_v18 = vld [vmem:[%s4935_s8 + $0x3ac] sm:$0xf0]  ;;  %v982_v20 = vld [vmem:[#allocation2 + $0x1a0] sm:$0xff] }
 0x371   : > { %2546 = vst [vmem:[#allocation2 + $0x148] sm:$0xff] %v2482_v39  ;;  %2076 = vmatmul.bf16.gmra.mxu2 %v3718_v36  ;;  %1907 = vmatmul.bf16.gmra.mxu1 %v3714_v37  ;;  %v3753_v36 = vld [vmem:[%s4935_s8 + $0x368] sm:$0xf]  ;;  %v3982_v37 = vld [vmem:[%s4935_s8 + $0x374] sm:$0xf0] }
 0x372   : > { %v2203_v44 = vpop.f32.mrf.mxu3  ;;  %v3755_v39 = vld [vmem:[%s4935_s8 + $0x378] sm:$0xf0]  ;;  %v3754_v25 = vor.u32 %v3982_v37, %v3753_v36 }
 0x373   : > { %v2204_v43 = vadd.f32 %v2203_v44, %v2035_v26  ;;  %v979_v44 = vld [vmem:[#allocation2 + $0x1f8] sm:$0xff] }
 0x374   : > { %v2037_v48 = vpop.f32.mrf.mxu2  ;;  %v2375_v51 = vpop.f32.mrf.mxu0 }
 0x375   : > { %v2373_v52 = vadd.f32 %v2372_v32, %v2204_v43  ;;  %v2038_v57 = vadd.f32 %v2037_v48, %v1868_v38  ;;  %v3980_v38 = vld [vmem:[%s4935_s8 + $0x36c] sm:$0xf] }
 0x376   : > { %v1870_v55 = vpop.f32.mrf.mxu1  ;;  %v3758_v26 = vor.u32 %v3980_v38, %v3755_v39 }
 0x377   : > { %v2483_v56 = vadd.f32 %v2373_v52, %v975_v42  ;;  %2245 = vmatmul.bf16.gmra.mxu3 %v3722_v47  ;;  %2414 = vmatmul.bf16.gmra.mxu0 %v3726_v46  ;;  %v3983_v52 = vld [vmem:[%s4935_s8 + $0x384] sm:$0xf] }
 0x379   : > { %2547 = vst [vmem:[#allocation2 + $0x1d0] sm:$0xff] %v2483_v56  ;;  %v3763_v56 = vld [vmem:[%s4935_s8 + $0x390] sm:$0xf0] }
 0x37a   : > { %v2206_v61 = vpop.f32.mrf.mxu3 }
 0x37b   : > { %v2207_v50 = vadd.f32 %v2206_v61, %v2038_v57  ;;  %v3761_v57 = vld [vmem:[%s4935_s8 + $0x380] sm:$0xf] }
 0x37c   : > { %v2039_v54 = vpop.f32.mrf.mxu2  ;;  %v2377_v2 = vpop.f32.mrf.mxu0 }
 0x37d   : > { %v2376_v59 = vadd.f32 %v2375_v51, %v2207_v50  ;;  %v2040_v41 = vadd.f32 %v2039_v54, %v1870_v55  ;;  %v3762_v54 = vor.u32 %v3985_v58, %v3761_v57 }
 0x37e   : > { %v1873_v60 = vpop.f32.mrf.mxu1 }
 0x37f   : > { %v2484_v0 = vadd.f32 %v2376_v59, %v976_v53  ;;  %v3766_v53 = vor.u32 %v3983_v52, %v3763_v56  ;;  %v3993_v52 = vld [vmem:[%s4935_s8 + $0x3cc] sm:$0xf0]  ;;  %v984_v56 = vld [vmem:[#allocation2 + $0xe8] sm:$0xff] }
 0x381   : > { %2548 = vst [vmem:[#allocation2 + $0x100] sm:$0xff] %v2484_v0  ;;  %2081 = vmatmul.bf16.gmra.mxu2 %v3734_v63  ;;  %1912 = vmatmul.bf16.gmra.mxu1 %v3730_v3  ;;  %v3769_v63 = vld [vmem:[%s4935_s8 + $0x388] sm:$0xf]  ;;  %v3986_v3 = vld [vmem:[%s4935_s8 + $0x394] sm:$0xf0] }
 0x382   : > { %v2208_v45 = vpop.f32.mrf.mxu3  ;;  %v3771_v0 = vld [vmem:[%s4935_s8 + $0x398] sm:$0xf0]  ;;  %v3770_v7 = vor.u32 %v3986_v3, %v3769_v63 }
 0x383   : > { %v2209_v8 = vadd.f32 %v2208_v45, %v2040_v41  ;;  %v981_v45 = vld [vmem:[#allocation2 + $0x128] sm:$0xff] }
 0x384   : > { %v2042_v12 = vpop.f32.mrf.mxu2  ;;  %v2380_v13 = vpop.f32.mrf.mxu0 }
 0x385   : > { %v2378_v14 = vadd.f32 %v2377_v2, %v2209_v8  ;;  %v2043_v17 = vadd.f32 %v2042_v12, %v1873_v60  ;;  %v3984_v60 = vld [vmem:[%s4935_s8 + $0x38c] sm:$0xf] }
 0x386   : > { %v1875_v15 = vpop.f32.mrf.mxu1  ;;  %v3774_v41 = vor.u32 %v3984_v60, %v3771_v0 }
 0x387   : > { %v2485_v16 = vadd.f32 %v2378_v14, %v977_v11  ;;  %2250 = vmatmul.bf16.gmra.mxu3 %v3738_v9  ;;  %2419 = vmatmul.bf16.gmra.mxu0 %v3742_v10  ;;  %v3987_v14 = vld [vmem:[%s4935_s8 + $0x3a4] sm:$0xf] }
 0x389   : > { %2549 = vst [vmem:[#allocation2 + $0xc8] sm:$0xff] %v2485_v16  ;;  %v3779_v16 = vld [vmem:[%s4935_s8 + $0x3b0] sm:$0xf0] }
 0x38a   : > { %v2211_v19 = vpop.f32.mrf.mxu3 }
 0x38b   : > { %v2212_v23 = vadd.f32 %v2211_v19, %v2043_v17  ;;  %v3777_v17 = vld [vmem:[%s4935_s8 + $0x3a0] sm:$0xf] }
 0x38c   : > { %v2044_v27 = vpop.f32.mrf.mxu2  ;;  %v2382_v28 = vpop.f32.mrf.mxu0 }
 0x38d   : > { %v2381_v29 = vadd.f32 %v2380_v13, %v2212_v23  ;;  %v2045_v40 = vadd.f32 %v2044_v27, %v1875_v15  ;;  %v3778_v27 = vor.u32 %v3989_v18, %v3777_v17 }
 0x38e   : > { %v1878_v32 = vpop.f32.mrf.mxu1 }
 0x38f   : > { %v2486_v35 = vadd.f32 %v2381_v29, %v978_v24  ;;  %v3782_v24 = vor.u32 %v3987_v14, %v3779_v16  ;;  %v3997_v14 = vld [vmem:[%s4935_s8 + $0x3ec] sm:$0xf0] }
 0x390   : > { %v986_v16 = vld [vmem:[#allocation2 + $0x70] sm:$0xff] }
 0x391   : > { %2550 = vst [vmem:[#allocation2 + $0x40] sm:$0xff] %v2486_v35  ;;  %2086 = vmatmul.bf16.gmra.mxu2 %v3750_v30  ;;  %1917 = vmatmul.bf16.gmra.mxu1 %v3746_v31  ;;  %v3785_v30 = vld [vmem:[%s4935_s8 + $0x3a8] sm:$0xf]  ;;  %v3990_v31 = vld [vmem:[%s4935_s8 + $0x3b4] sm:$0xf0] }
 0x392   : > { %v2213_v33 = vpop.f32.mrf.mxu3  ;;  %v3787_v35 = vld [vmem:[%s4935_s8 + $0x3b8] sm:$0xf0]  ;;  %v3786_v39 = vor.u32 %v3990_v31, %v3785_v30 }
 0x393   : > { %v2214_v34 = vadd.f32 %v2213_v33, %v2045_v40  ;;  %v983_v33 = vld [vmem:[#allocation2 + $0x1f0] sm:$0xff] }
 0x394   : > { %v2047_v43 = vpop.f32.mrf.mxu2  ;;  %v2385_v47 = vpop.f32.mrf.mxu0 }
 0x395   : > { %v2383_v46 = vadd.f32 %v2382_v28, %v2214_v34  ;;  %v2048_v51 = vadd.f32 %v2047_v43, %v1878_v32  ;;  %v3988_v32 = vld [vmem:[%s4935_s8 + $0x3ac] sm:$0xf] }
 0x396   : > { %v1880_v42 = vpop.f32.mrf.mxu1  ;;  %v3790_v40 = vor.u32 %v3988_v32, %v3787_v35 }
 0x397   : > { %v2487_v48 = vadd.f32 %v2383_v46, %v979_v44  ;;  %2255 = vmatmul.bf16.gmra.mxu3 %v3754_v25  ;;  %2424 = vmatmul.bf16.gmra.mxu0 %v3758_v26  ;;  %v3991_v46 = vld [vmem:[%s4935_s8 + $0x3c4] sm:$0xf] }
 0x399   : > { %2551 = vst [vmem:[#allocation2 + $0x1f8] sm:$0xff] %v2487_v48  ;;  %v3795_v48 = vld [vmem:[%s4935_s8 + $0x3d0] sm:$0xf0] }
 0x39a   : > { %v2216_v55 = vpop.f32.mrf.mxu3 }
 0x39b   : > { %v2217_v61 = vadd.f32 %v2216_v55, %v2048_v51  ;;  %v3793_v51 = vld [vmem:[%s4935_s8 + $0x3c0] sm:$0xf] }
 0x39c   : > { %v2049_v1 = vpop.f32.mrf.mxu2  ;;  %v2387_v49 = vpop.f32.mrf.mxu0 }
 0x39d   : > { %v2386_v50 = vadd.f32 %v2385_v47, %v2217_v61  ;;  %v2050_v4 = vadd.f32 %v2049_v1, %v1880_v42  ;;  %v3794_v1 = vor.u32 %v3993_v52, %v3793_v51 }
 0x39e   : > { %v1883_v2 = vpop.f32.mrf.mxu1 }
 0x39f   : > { %v2488_v59 = vadd.f32 %v2386_v50, %v980_v62  ;;  %v3798_v62 = vor.u32 %v3991_v46, %v3795_v48 }
 0x3a1   : > { %2552 = vst [vmem:[#allocation2 + $0x20] sm:$0xff] %v2488_v59  ;;  %2091 = vmatmul.bf16.gmra.mxu2 %v3766_v53  ;;  %1922 = vmatmul.bf16.gmra.mxu1 %v3762_v54  ;;  %v3801_v53 = vld [vmem:[%s4935_s8 + $0x3c8] sm:$0xf]  ;;  %v3994_v54 = vld [vmem:[%s4935_s8 + $0x3d4] sm:$0xf0] }
 0x3a2   : > { %v2218_v5 = vpop.f32.mrf.mxu3  ;;  %v3803_v59 = vld [vmem:[%s4935_s8 + $0x3d8] sm:$0xf0]  ;;  %v3802_v0 = vor.u32 %v3994_v54, %v3801_v53 }
 0x3a3   : > { %v2219_v6 = vadd.f32 %v2218_v5, %v2050_v4  ;;  %v985_v5 = vld [vmem:[#allocation2 + $0x78] sm:$0xff] }
 0x3a4   : > { %v2052_v8 = vpop.f32.mrf.mxu2  ;;  %v2390_v9 = vpop.f32.mrf.mxu0 }
 0x3a5   : > { %v2388_v10 = vadd.f32 %v2387_v49, %v2219_v6  ;;  %v2053_v13 = vadd.f32 %v2052_v8, %v1883_v2  ;;  %v3992_v2 = vld [vmem:[%s4935_s8 + $0x3cc] sm:$0xf] }
 0x3a6   : > { %v1885_v11 = vpop.f32.mrf.mxu1  ;;  %v3806_v4 = vor.u32 %v3992_v2, %v3803_v59  ;;  %v990_v2 = vld [vmem:[#allocation2 + $0xb8] sm:$0xff] }
 0x3a7   : > { %v2489_v12 = vadd.f32 %v2388_v10, %v981_v45  ;;  %2260 = vmatmul.bf16.gmra.mxu3 %v3770_v7  ;;  %2429 = vmatmul.bf16.gmra.mxu0 %v3774_v41  ;;  %v3995_v10 = vld [vmem:[%s4935_s8 + $0x3e4] sm:$0xf] }
 0x3a9   : > { %2553 = vst [vmem:[#allocation2 + $0x128] sm:$0xff] %v2489_v12  ;;  %v3811_v12 = vld [vmem:[%s4935_s8 + $0x3f0] sm:$0xf0] }
 0x3aa   : > { %v2221_v15 = vpop.f32.mrf.mxu3 }
 0x3ab   : > { %v2222_v19 = vadd.f32 %v2221_v15, %v2053_v13  ;;  %v3809_v13 = vld [vmem:[%s4935_s8 + $0x3e0] sm:$0xf] }
 0x3ac   : > { %v2054_v21 = vpop.f32.mrf.mxu2  ;;  %v2392_v22 = vpop.f32.mrf.mxu0 }
 0x3ad   : > { %v2391_v23 = vadd.f32 %v2390_v9, %v2222_v19  ;;  %v2055_v36 = vadd.f32 %v2054_v21, %v1885_v11  ;;  %v3810_v21 = vor.u32 %v3997_v14, %v3809_v13  ;;  %v992_v14 = vld [vmem:[#allocation2 + $0xa8] sm:$0xff] }
 0x3ae   : > { %v1888_v28 = vpop.f32.mrf.mxu1 }
 0x3af   : > { %v2490_v29 = vadd.f32 %v2391_v23, %v982_v20  ;;  %v3814_v20 = vor.u32 %v3995_v10, %v3811_v12 }
 0x3b1   : > { %2554 = vst [vmem:[#allocation2 + $0x1a0] sm:$0xff] %v2490_v29  ;;  %2096 = vmatmul.bf16.gmra.mxu2 %v3782_v24  ;;  %1927 = vmatmul.bf16.gmra.mxu1 %v3778_v27  ;;  %v3817_v24 = vld [vmem:[%s4935_s8 + $0x3e8] sm:$0xf]  ;;  %v3998_v27 = vld [vmem:[%s4935_s8 + $0x3f4] sm:$0xf0] }
 0x3b2   : > { %v2223_v37 = vpop.f32.mrf.mxu3  ;;  %v3819_v29 = vld [vmem:[%s4935_s8 + $0x3f8] sm:$0xf0]  ;;  %v3818_v35 = vor.u32 %v3998_v27, %v3817_v24 }
 0x3b3   : > { %v2224_v38 = vadd.f32 %v2223_v37, %v2055_v36  ;;  %v987_v37 = vld [vmem:[#allocation2 + $0x90] sm:$0xff] }
 0x3b4   : > { %v2057_v34 = vpop.f32.mrf.mxu2  ;;  %v2395_v25 = vpop.f32.mrf.mxu0 }
 0x3b5   : > { %v2393_v26 = vadd.f32 %v2392_v22, %v2224_v38  ;;  %v2058_v47 = vadd.f32 %v2057_v34, %v1888_v28  ;;  %v3996_v28 = vld [vmem:[%s4935_s8 + $0x3ec] sm:$0xf] }
 0x3b6   : > { %v1890_v44 = vpop.f32.mrf.mxu1  ;;  %v3822_v36 = vor.u32 %v3996_v28, %v3819_v29 }
 0x3b7   : > { %v2491_v43 = vadd.f32 %v2393_v26, %v983_v33  ;;  %2265 = vmatmul.bf16.gmra.mxu3 %v3786_v39  ;;  %2434 = vmatmul.bf16.gmra.mxu0 %v3790_v40 }
 0x3b9   : > { %2555 = vst [vmem:[#allocation2 + $0x1f0] sm:$0xff] %v2491_v43  ;;  %v988_v43 = vld [vmem:[#allocation2 + $0x1d8] sm:$0xff] }
 0x3ba   : > { %v2226_v42 = vpop.f32.mrf.mxu3 }
 0x3bb   : > { %v2227_v55 = vadd.f32 %v2226_v42, %v2058_v47 }
 0x3bc   : > { %v2059_v57 = vpop.f32.mrf.mxu2  ;;  %v2397_v58 = vpop.f32.mrf.mxu0 }
 0x3bd   : > { %v2396_v61 = vadd.f32 %v2395_v25, %v2227_v55  ;;  %v2060_v63 = vadd.f32 %v2059_v57, %v1890_v44  ;;  %v989_v57 = vld [vmem:[#allocation2 + $0xd0] sm:$0xff] }
 0x3be   : > { %v1893_v49 = vpop.f32.mrf.mxu1 }
 0x3bf   : > { %v2492_v50 = vadd.f32 %v2396_v61, %v984_v56 }
 0x3c1   : > { %2556 = vst [vmem:[#allocation2 + $0xe8] sm:$0xff] %v2492_v50  ;;  %2101 = vmatmul.bf16.gmra.mxu2 %v3798_v62  ;;  %1932 = vmatmul.bf16.gmra.mxu1 %v3794_v1 }
 0x3c2   : > { %v2228_v3 = vpop.f32.mrf.mxu3 }
 0x3c3   : > { %v2229_v60 = vadd.f32 %v2228_v3, %v2060_v63 }
 0x3c4   : > { %v2062_v6 = vpop.f32.mrf.mxu2  ;;  %v2400_v7 = vpop.f32.mrf.mxu0 }
 0x3c5   : > { %v2398_v41 = vadd.f32 %v2397_v58, %v2229_v60  ;;  %v2063_v9 = vadd.f32 %v2062_v6, %v1893_v49 }
 0x3c6   : > { %v1895_v45 = vpop.f32.mrf.mxu1 }
 0x3c7   : > { %v2493_v8 = vadd.f32 %v2398_v41, %v985_v5  ;;  %2270 = vmatmul.bf16.gmra.mxu3 %v3802_v0  ;;  %2439 = vmatmul.bf16.gmra.mxu0 %v3806_v4 }
 0x3c9   : > { %2557 = vst [vmem:[#allocation2 + $0x78] sm:$0xff] %v2493_v8 }
 0x3ca   : > { %v2231_v11 = vpop.f32.mrf.mxu3 }
 0x3cb   : > { %v2232_v15 = vadd.f32 %v2231_v11, %v2063_v9 }
 0x3cc   : > { %v2064_v17 = vpop.f32.mrf.mxu2  ;;  %v2402_v18 = vpop.f32.mrf.mxu0 }
 0x3cd   : > { %v2401_v19 = vadd.f32 %v2400_v7, %v2232_v15  ;;  %v2065_v30 = vadd.f32 %v2064_v17, %v1895_v45  ;;  %v991_v7 = vld [vmem:[#allocation2 + $0x88] sm:$0xff] }
 0x3ce   : > { %v1898_v22 = vpop.f32.mrf.mxu1 }
 0x3cf   : > { %v2494_v23 = vadd.f32 %v2401_v19, %v986_v16 }
 0x3d1   : > { %2558 = vst [vmem:[#allocation2 + $0x70] sm:$0xff] %v2494_v23  ;;  %2106 = vmatmul.bf16.gmra.mxu2 %v3814_v20  ;;  %1937 = vmatmul.bf16.gmra.mxu1 %v3810_v21  ;;  %v993_v23 = vld [vmem:[#allocation2 + $0x1c8] sm:$0xff] }
 0x3d2   : > { %v2233_v31 = vpop.f32.mrf.mxu3 }
 0x3d3   : > { %v2234_v32 = vadd.f32 %v2233_v31, %v2065_v30 }
 0x3d4   : > { %v2067_v38 = vpop.f32.mrf.mxu2  ;;  %v2405_v39 = vpop.f32.mrf.mxu0 }
 0x3d5   : > { %v2403_v40 = vadd.f32 %v2402_v18, %v2234_v32  ;;  %v2068_v25 = vadd.f32 %v2067_v38, %v1898_v22 }
 0x3d6   : > { %v1900_v33 = vpop.f32.mrf.mxu1 }
 0x3d7   : > { %v2495_v34 = vadd.f32 %v2403_v40, %v987_v37  ;;  %2275 = vmatmul.bf16.gmra.mxu3 %v3818_v35  ;;  %2444 = vmatmul.bf16.gmra.mxu0 %v3822_v36  ;;  %v994_v36 = vld [vmem:[#allocation2 + $0x170] sm:$0xff] }
 0x3d9   : > { %2559 = vst [vmem:[#allocation2 + $0x90] sm:$0xff] %v2495_v34 }
 0x3da   : > { %v2236_v26 = vpop.f32.mrf.mxu3 }
 0x3db   : > { %v2237_v44 = vadd.f32 %v2236_v26, %v2068_v25 }
 0x3dc   : > { %v2069_v47 = vpop.f32.mrf.mxu2  ;;  %v2407_v46 = vpop.f32.mrf.mxu0 }
 0x3dd   : > { %v2406_v42 = vadd.f32 %v2405_v39, %v2237_v44  ;;  %v2070_v52 = vadd.f32 %v2069_v47, %v1900_v33  ;;  %v995_v44 = vld [vmem:[#allocation2 + $0x178] sm:$0xff] }
 0x3de   : > { %v1903_v48 = vpop.f32.mrf.mxu1 }
 0x3df   : > { %v2496_v51 = vadd.f32 %v2406_v42, %v988_v43 }
 0x3e1   : > { %2560 = vst [vmem:[#allocation2 + $0x1d8] sm:$0xff] %v2496_v51 }
 0x3e2   : > { %v2238_v55 = vpop.f32.mrf.mxu3 }
 0x3e3   : > { %v2239_v56 = vadd.f32 %v2238_v55, %v2070_v52 }
 0x3e4   : > { %v2072_v58 = vpop.f32.mrf.mxu2  ;;  %v2410_v61 = vpop.f32.mrf.mxu0 }
 0x3e5   : > { %v2408_v62 = vadd.f32 %v2407_v46, %v2239_v56  ;;  %v2073_v50 = vadd.f32 %v2072_v58, %v1903_v48  ;;  %v996_v56 = vld [vmem:[#allocation2 + $0x68] sm:$0xff] }
 0x3e6   : > { %v1905_v1 = vpop.f32.mrf.mxu1 }
 0x3e7   : > { %v2497_v49 = vadd.f32 %v2408_v62, %v989_v57 }
 0x3e9   : > { %2561 = vst [vmem:[#allocation2 + $0xd0] sm:$0xff] %v2497_v49 }
 0x3ea   : > { %v2241_v53 = vpop.f32.mrf.mxu3 }
 0x3eb   : > { %v2242_v54 = vadd.f32 %v2241_v53, %v2073_v50 }
 0x3ec   : > { %v2074_v59 = vpop.f32.mrf.mxu2  ;;  %v2412_v63 = vpop.f32.mrf.mxu0 }
 0x3ed   : > { %v2411_v3 = vadd.f32 %v2410_v61, %v2242_v54  ;;  %v2075_v4 = vadd.f32 %v2074_v59, %v1905_v1  ;;  %v997_v54 = vld [vmem:[#allocation2 + $0x190] sm:$0xff] }
 0x3ee   : > { %v1908_v60 = vpop.f32.mrf.mxu1 }
 0x3ef   : > { %v2498_v0 = vadd.f32 %v2411_v3, %v990_v2 }
 0x3f1   : > { %2562 = vst [vmem:[#allocation2 + $0xb8] sm:$0xff] %v2498_v0 }
 0x3f2   : > { %v2243_v5 = vpop.f32.mrf.mxu3 }
 0x3f3   : > { %v2244_v6 = vadd.f32 %v2243_v5, %v2075_v4 }
 0x3f4   : > { %v2077_v41 = vpop.f32.mrf.mxu2  ;;  %v2415_v45 = vpop.f32.mrf.mxu0 }
 0x3f5   : > { %v2413_v8 = vadd.f32 %v2412_v63, %v2244_v6  ;;  %v2078_v11 = vadd.f32 %v2077_v41, %v1908_v60  ;;  %v998_v6 = vld [vmem:[#allocation2 + $0x198] sm:$0xff] }
 0x3f6   : > { %v1910_v9 = vpop.f32.mrf.mxu1 }
 0x3f7   : > { %v2499_v10 = vadd.f32 %v2413_v8, %v991_v7 }
 0x3f9   : > { %2563 = vst [vmem:[#allocation2 + $0x88] sm:$0xff] %v2499_v10 }
 0x3fa   : > { %v2246_v12 = vpop.f32.mrf.mxu3 }
 0x3fb   : > { %v2247_v13 = vadd.f32 %v2246_v12, %v2078_v11 }
 0x3fc   : > { %v2079_v15 = vpop.f32.mrf.mxu2  ;;  %v2417_v16 = vpop.f32.mrf.mxu0 }
 0x3fd   : > { %v2416_v17 = vadd.f32 %v2415_v45, %v2247_v13  ;;  %v2080_v20 = vadd.f32 %v2079_v15, %v1910_v9  ;;  %v999_v13 = vld [vmem:[#allocation2 + $0x38] sm:$0xff] }
 0x3fe   : > { %v1913_v18 = vpop.f32.mrf.mxu1 }
 0x3ff   : > { %v2500_v19 = vadd.f32 %v2416_v17, %v992_v14 }
 0x401   : > { %2564 = vst [vmem:[#allocation2 + $0xa8] sm:$0xff] %v2500_v19 }
 0x402   : > { %v2248_v21 = vpop.f32.mrf.mxu3 }
 0x403   : > { %v2249_v22 = vadd.f32 %v2248_v21, %v2080_v20 }
 0x404   : > { %v2082_v24 = vpop.f32.mrf.mxu2  ;;  %v2420_v27 = vpop.f32.mrf.mxu0 }
 0x405   : > { %v2418_v28 = vadd.f32 %v2417_v16, %v2249_v22  ;;  %v2083_v31 = vadd.f32 %v2082_v24, %v1913_v18  ;;  %v1000_v22 = vld [vmem:[#allocation2 + $0xc0] sm:$0xff] }
 0x406   : > { %v1915_v29 = vpop.f32.mrf.mxu1 }
 0x407   : > { %v2501_v30 = vadd.f32 %v2418_v28, %v993_v23 }
 0x409   : > { %2565 = vst [vmem:[#allocation2 + $0x1c8] sm:$0xff] %v2501_v30 }
 0x40a   : > { %v2251_v32 = vpop.f32.mrf.mxu3 }
 0x40b   : > { %v2252_v35 = vadd.f32 %v2251_v32, %v2083_v31 }
 0x40c   : > { %v2084_v37 = vpop.f32.mrf.mxu2  ;;  %v2422_v38 = vpop.f32.mrf.mxu0 }
 0x40d   : > { %v2421_v39 = vadd.f32 %v2420_v27, %v2252_v35  ;;  %v2085_v34 = vadd.f32 %v2084_v37, %v1915_v29  ;;  %v1001_v35 = vld [vmem:[#allocation2 + $0x1c0] sm:$0xff] }
 0x40e   : > { %v1918_v40 = vpop.f32.mrf.mxu1 }
 0x40f   : > { %v2502_v33 = vadd.f32 %v2421_v39, %v994_v36 }
 0x411   : > { %2566 = vst [vmem:[#allocation2 + $0x170] sm:$0xff] %v2502_v33 }
 0x412   : > { %v2253_v25 = vpop.f32.mrf.mxu3 }
 0x413   : > { %v2254_v26 = vadd.f32 %v2253_v25, %v2085_v34  ;;  %v1002_v25 = vld [vmem:[#allocation2 + $0x158] sm:$0xff] }
 0x414   : > { %v2087_v43 = vpop.f32.mrf.mxu2  ;;  %v2425_v47 = vpop.f32.mrf.mxu0 }
 0x415   : > { %v2423_v46 = vadd.f32 %v2422_v38, %v2254_v26  ;;  %v2088_v51 = vadd.f32 %v2087_v43, %v1918_v40 }
 0x416   : > { %v1920_v42 = vpop.f32.mrf.mxu1 }
 0x417   : > { %v2503_v48 = vadd.f32 %v2423_v46, %v995_v44 }
 0x419   : > { %2567 = vst [vmem:[#allocation2 + $0x178] sm:$0xff] %v2503_v48 }
 0x41a   : > { %v2256_v52 = vpop.f32.mrf.mxu3 }
 0x41b   : > { %v2257_v55 = vadd.f32 %v2256_v52, %v2088_v51  ;;  %v1003_v52 = vld [vmem:[#allocation2 + $0x10] sm:$0xff] }
 0x41c   : > { %v2089_v57 = vpop.f32.mrf.mxu2  ;;  %v2427_v58 = vpop.f32.mrf.mxu0 }
 0x41d   : > { %v2426_v61 = vadd.f32 %v2425_v47, %v2257_v55  ;;  %v2090_v49 = vadd.f32 %v2089_v57, %v1920_v42 }
 0x41e   : > { %v1923_v62 = vpop.f32.mrf.mxu1 }
 0x41f   : > { %v2504_v1 = vadd.f32 %v2426_v61, %v996_v56 }
 0x421   : > { %2568 = vst [vmem:[#allocation2 + $0x68] sm:$0xff] %v2504_v1 }
 0x422   : > { %v2258_v50 = vpop.f32.mrf.mxu3 }
 0x423   : > { %v2259_v53 = vadd.f32 %v2258_v50, %v2090_v49  ;;  %v1004_v50 = vld [vmem:[#allocation2 + $0x58] sm:$0xff] }
 0x424   : > { %v2092_v2 = vpop.f32.mrf.mxu2  ;;  %v2430_v59 = vpop.f32.mrf.mxu0 }
 0x425   : > { %v2428_v63 = vadd.f32 %v2427_v58, %v2259_v53  ;;  %v2093_v0 = vadd.f32 %v2092_v2, %v1923_v62 }
 0x426   : > { %v1925_v3 = vpop.f32.mrf.mxu1 }
 0x427   : > { %v2505_v60 = vadd.f32 %v2428_v63, %v997_v54 }
 0x429   : > { %2569 = vst [vmem:[#allocation2 + $0x190] sm:$0xff] %v2505_v60 }
 0x42a   : > { %v2261_v4 = vpop.f32.mrf.mxu3 }
 0x42b   : > { %v2262_v5 = vadd.f32 %v2261_v4, %v2093_v0  ;;  %v1005_v0 = vld [vmem:[#allocation2 + $0xa0] sm:$0xff] }
 0x42c   : > { %v2094_v7 = vpop.f32.mrf.mxu2  ;;  %v2432_v41 = vpop.f32.mrf.mxu0 }
 0x42d   : > { %v2431_v45 = vadd.f32 %v2430_v59, %v2262_v5  ;;  %v2095_v10 = vadd.f32 %v2094_v7, %v1925_v3 }
 0x42e   : > { %v1928_v8 = vpop.f32.mrf.mxu1 }
 0x42f   : > { %v2506_v9 = vadd.f32 %v2431_v45, %v998_v6 }
 0x431   : > { %2570 = vst [vmem:[#allocation2 + $0x198] sm:$0xff] %v2506_v9 }
 0x432   : > { %v2263_v11 = vpop.f32.mrf.mxu3 }
 0x433   : > { %v2264_v12 = vadd.f32 %v2263_v11, %v2095_v10 }
 0x434   : > { %v2097_v14 = vpop.f32.mrf.mxu2  ;;  %v2435_v15 = vpop.f32.mrf.mxu0 }
 0x435   : > { %v2433_v16 = vadd.f32 %v2432_v41, %v2264_v12  ;;  %v2098_v18 = vadd.f32 %v2097_v14, %v1928_v8 }
 0x436   : > { %v1930_v19 = vpop.f32.mrf.mxu1 }
 0x437   : > { %v2507_v17 = vadd.f32 %v2433_v16, %v999_v13 }
 0x439   : > { %2571 = vst [vmem:[#allocation2 + $0x38] sm:$0xff] %v2507_v17 }
 0x43a   : > { %v2266_v20 = vpop.f32.mrf.mxu3 }
 0x43b   : > { %v2267_v21 = vadd.f32 %v2266_v20, %v2098_v18 }
 0x43c   : > { %v2099_v23 = vpop.f32.mrf.mxu2  ;;  %v2437_v24 = vpop.f32.mrf.mxu0 }
 0x43d   : > { %v2436_v27 = vadd.f32 %v2435_v15, %v2267_v21  ;;  %v2100_v29 = vadd.f32 %v2099_v23, %v1930_v19 }
 0x43e   : > { %v1933_v31 = vpop.f32.mrf.mxu1 }
 0x43f   : > { %v2508_v28 = vadd.f32 %v2436_v27, %v1000_v22 }
 0x441   : > { %2572 = vst [vmem:[#allocation2 + $0xc0] sm:$0xff] %v2508_v28 }
 0x442   : > { %v2268_v30 = vpop.f32.mrf.mxu3 }
 0x443   : > { %v2269_v32 = vadd.f32 %v2268_v30, %v2100_v29 }
 0x444   : > { %v2102_v36 = vpop.f32.mrf.mxu2  ;;  %v2440_v38 = vpop.f32.mrf.mxu0 }
 0x445   : > { %v2438_v37 = vadd.f32 %v2437_v24, %v2269_v32  ;;  %v2103_v40 = vadd.f32 %v2102_v36, %v1933_v31 }
 0x446   : > { %v1935_v26 = vpop.f32.mrf.mxu1 }
 0x447   : > { %v2509_v39 = vadd.f32 %v2438_v37, %v1001_v35 }
 0x449   : > { %2573 = vst [vmem:[#allocation2 + $0x1c0] sm:$0xff] %v2509_v39 }
 0x44a   : > { %v2271_v33 = vpop.f32.mrf.mxu3 }
 0x44b   : > { %v2272_v34 = vadd.f32 %v2271_v33, %v2103_v40 }
 0x44c   : > { %v2104_v44 = vpop.f32.mrf.mxu2  ;;  %v2442_v46 = vpop.f32.mrf.mxu0 }
 0x44d   : > { %v2441_v43 = vadd.f32 %v2440_v38, %v2272_v34  ;;  %v2105_v42 = vadd.f32 %v2104_v44, %v1935_v26 }
 0x44e   : > { %v1938_v57 = vpop.f32.mrf.mxu1 }
 0x44f   : > { %v2510_v47 = vadd.f32 %v2441_v43, %v1002_v25 }
 0x451   : > { %2574 = vst [vmem:[#allocation2 + $0x158] sm:$0xff] %v2510_v47 }
 0x452   : > { %v2273_v48 = vpop.f32.mrf.mxu3 }
 0x453   : > { %v2274_v51 = vadd.f32 %v2273_v48, %v2105_v42 }
 0x454   : > { %v2107_v55 = vpop.f32.mrf.mxu2  ;;  %v2445_v1 = vpop.f32.mrf.mxu0 }
 0x455   : > { %v2443_v56 = vadd.f32 %v2442_v46, %v2274_v51  ;;  %v2108_v61 = vadd.f32 %v2107_v55, %v1938_v57 }
 0x456   : > { %v1940_v59 = vpop.f32.mrf.mxu1 }
 0x457   : > { %v2511_v58 = vadd.f32 %v2443_v56, %v1003_v52 }
 0x459   : > { %2575 = vst [vmem:[#allocation2 + $0x10] sm:$0xff] %v2511_v58 }
 0x45a   : > { %v2276_v62 = vpop.f32.mrf.mxu3 }
 0x45b   : > { %v2277_v49 = vadd.f32 %v2276_v62, %v2108_v61 }
 0x45c   : > { %v2109_v54 = vpop.f32.mrf.mxu2  ;;  %v2447_v4 = vpop.f32.mrf.mxu0 }
 0x45d   : > { %v2446_v53 = vadd.f32 %v2445_v1, %v2277_v49  ;;  %v2110_v63 = vadd.f32 %v2109_v54, %v1940_v59 }
 0x45f   : > { %v2512_v2 = vadd.f32 %v2446_v53, %v1004_v50 }
 0x461   : > { %2576 = vst [vmem:[#allocation2 + $0x58] sm:$0xff] %v2512_v2 }
 0x462   : > { %v2278_v3 = vpop.f32.mrf.mxu3 }
 0x463   : > { %v2279_v60 = vadd.f32 %v2278_v3, %v2110_v63 }
 0x465   : > { %v2448_v5 = vadd.f32 %v2447_v4, %v2279_v60  ;;  %2581 = sbr.rel (%p3823_p1) target bundleno = 1193 (0x4a9), region = 68 }
 0x467   : > { %v2513_v6 = vadd.f32 %v2448_v5, %v1005_v0 }
 0x469   : > { %2577 = vst [vmem:[#allocation2 + $0xa0] sm:$0xff] %v2513_v6 }
 0x46a   : > { %v2582_v7 = vld [vmem:[#allocation2 + $0xb0] sm:$0xff]  ;;  %v5418_v45 = vld [vmem:[#allocation9] ss:$0 sm:$0xff]  ;;  %v5420_v8 = vld [vmem:[#allocation11] ss:$0 sm:$0xff] }
 0x46b   : > { %v2583_v41 = vld [vmem:[#allocation2 + $0x1b0] sm:$0xff]  ;;  %v2584_v9 = vld [vmem:[#allocation2 + $0xd8] sm:$0xff]  ;;  %v2650_v12 = vmul.f32 %v5418_v45, %v2582_v7  ;;  %v2587_v16 = vld [vmem:[#allocation2 + $0x168] sm:$0xff] }
 0x46c   : > { %v2585_v10 = vld [vmem:[#allocation2 + $0x18] sm:$0xff]  ;;  %v2586_v11 = vld [vmem:[#allocation2 + $0x50] sm:$0xff]  ;;  %v2651_v13 = vmul.f32 %v5418_v45, %v2583_v41  ;;  %v2652_v14 = vmul.f32 %v5418_v45, %v2584_v9  ;;  %v2589_v18 = vld [vmem:[#allocation2 + $0x48] sm:$0xff]  ;;  %v2655_v20 = vmul.f32 %v5418_v45, %v2587_v16 }
 0x46d   : > { %v2653_v15 = vmul.f32 %v5418_v45, %v2585_v10  ;;  %v2588_v17 = vld [vmem:[#allocation2 + $0x130] sm:$0xff]  ;;  %v2654_v19 = vmul.f32 %v5418_v45, %v2586_v11  ;;  %v2657_v22 = vmul.f32 %v5418_v45, %v2589_v18  ;;  %v2718_v23 = vadd.f32 %v5420_v8, %v2650_v12  ;;  %v2590_v35 = vld [vmem:[#allocation2 + $0x180] sm:$0xff]  ;;  %v2592_v33 = vld [vmem:[#allocation2 + $0x118] sm:$0xff] }
 0x46e   : > { %v2656_v21 = vmul.f32 %v5418_v45, %v2588_v17  ;;  %v2719_v24 = vadd.f32 %v5420_v8, %v2651_v13  ;;  %v2720_v27 = vadd.f32 %v5420_v8, %v2652_v14  ;;  %v2723_v30 = vadd.f32 %v5420_v8, %v2655_v20  ;;  %v2591_v36 = vld [vmem:[#allocation2 + $0x110] sm:$0xff]  ;;  %v2593_v34 = vld [vmem:[#allocation2 + $0x98] sm:$0xff]  ;;  %v2594_v47 = vld [vmem:[#allocation2 + $0x120] sm:$0xff] }
 0x46f   : > { %v2721_v28 = vadd.f32 %v5420_v8, %v2653_v15  ;;  %v2722_v29 = vadd.f32 %v5420_v8, %v2654_v19  ;;  %v2725_v32 = vadd.f32 %v5420_v8, %v2657_v22  ;;  %v2782_v37 = vmax.f32 %v2718_v23, 0.0  ;;  %v2595_v46 = vld [vmem:[#allocation2 + $0x150] sm:$0xff]  ;;  %v2596_v55 = vld [vmem:[#allocation2 + $0x108] sm:$0xff]  ;;  %v2597_v56 = vld [vmem:[#allocation2 + $0x60] sm:$0xff] }
 0x470   : > { %v2724_v31 = vadd.f32 %v5420_v8, %v2656_v21  ;;  %v2783_v38 = vmax.f32 %v2719_v24, 0.0  ;;  %v2784_v39 = vmax.f32 %v2720_v27, 0.0  ;;  %v2787_v26 = vmax.f32 %v2723_v30, 0.0  ;;  %v2598_v3 = vld [vmem:[#allocation2 + $0xe0] sm:$0xff]  ;;  %v2599_v6 = vld [vmem:[#allocation2 + $0x188] sm:$0xff]  ;;  %v2600_v11 = vld [vmem:[#allocation2 + $0x138] sm:$0xff] }
 0x471   : > { %v2785_v40 = vmax.f32 %v2721_v28, 0.0  ;;  %v2786_v25 = vmax.f32 %v2722_v29, 0.0  ;;  %v2789_v43 = vmax.f32 %v2725_v32, 0.0  ;;  %v2658_v51 = vmul.f32 %v5418_v45, %v2590_v35  ;;  %v2601_v12 = vld [vmem:[#allocation2 + $0x140] sm:$0xff]  ;;  %v2603_v18 = vld [vmem:[#allocation2 + $0x1a8] sm:$0xff]  ;;  %v2604_v23 = vld [vmem:[#allocation2 + $0x1b8] sm:$0xff] }
 0x472   : > { %v2788_v44 = vmax.f32 %v2724_v31, 0.0  ;;  %v4003_v42 = vpack.c.bf16 %v2783_v38, %v2782_v37  ;;  %v2659_v52 = vmul.f32 %v5418_v45, %v2591_v36  ;;  %v2660_v61 = vmul.f32 %v5418_v45, %v2592_v33  ;;  %v2602_v17 = vld [vmem:[#allocation2 + $0x80] sm:$0xff]  ;;  %v2605_v30 = vld [vmem:[#allocation2 + $0x28] sm:$0xff] }
 0x473   : > { %v4008_v48 = vpack.c.bf16 %v2785_v40, %v2784_v39  ;;  %v4013_v57 = vpack.c.bf16 %v2787_v26, %v2786_v25  ;;  %v2661_v62 = vmul.f32 %v5418_v45, %v2593_v34  ;;  %v2726_v1 = vadd.f32 %v5420_v8, %v2658_v51  ;;  %v2606_v37 = vld [vmem:[#allocation2 + $0x1e8] sm:$0xff]  ;;  %v2608_v51 = vld [vmem:[#allocation2 + $0x160] sm:$0xff] }
 0x474   : > { %v4018_v58 = vpack.c.bf16 %v2789_v43, %v2788_v44  ;;  %4004 = vst [vmem:[%s4960_s16] sm:$0xff] %v4003_v42   ;;  %v2727_v49 = vadd.f32 %v5420_v8, %v2659_v52  ;;  %v2662_v50 = vmul.f32 %v5418_v45, %v2594_v47  ;;  %v2663_v53 = vmul.f32 %v5418_v45, %v2595_v46  ;;  %v2607_v43 = vld [vmem:[#allocation2 + $0xf8] sm:$0xff]  ;;  %v2609_v52 = vld [vmem:[#allocation2 + $0x30] sm:$0xff] }
 0x475   : > { %4160 = vst [vmem:[%s4960_s16 + $0x8] sm:$0xff] %v4008_v48   ;;  %v2728_v54 = vadd.f32 %v5420_v8, %v2660_v61  ;;  %v2729_v2 = vadd.f32 %v5420_v8, %v2661_v62  ;;  %v2664_v59 = vmul.f32 %v5418_v45, %v2596_v55  ;;  %v2665_v63 = vmul.f32 %v5418_v45, %v2597_v56  ;;  %v2610_v61 = vld [vmem:[#allocation2 + $0x1e0] sm:$0xff] }
 0x476   : > { %4161 = vst [vmem:[%s4960_s16 + $0x10] sm:$0xff] %v4013_v57   ;;  %v2790_v60 = vmax.f32 %v2726_v1, 0.0  ;;  %v2791_v0 = vmax.f32 %v2727_v49, 0.0  ;;  %v2730_v4 = vadd.f32 %v5420_v8, %v2662_v50  ;;  %v2731_v5 = vadd.f32 %v5420_v8, %v2663_v53  ;;  %v2611_v62 = vld [vmem:[#allocation2] sm:$0xff] }
 0x477   : > { %4162 = vst [vmem:[%s4960_s16 + $0x18] sm:$0xff] %v4018_v58   ;;  %v2792_v7 = vmax.f32 %v2728_v54, 0.0  ;;  %v2793_v41 = vmax.f32 %v2729_v2, 0.0  ;;  %v2732_v9 = vadd.f32 %v5420_v8, %v2664_v59  ;;  %v2733_v10 = vadd.f32 %v5420_v8, %v2665_v63  ;;  %v2612_v54 = vld [vmem:[#allocation2 + $0xf0] sm:$0xff] }
 0x478   : > { %v4023_v13 = vpack.c.bf16 %v2791_v0, %v2790_v60  ;;  %v2794_v14 = vmax.f32 %v2730_v4, 0.0  ;;  %v2795_v15 = vmax.f32 %v2731_v5, 0.0  ;;  %v2666_v16 = vmul.f32 %v5418_v45, %v2598_v3  ;;  %v2613_v60 = vld [vmem:[#allocation2 + $0x8] sm:$0xff] }
 0x479   : > { %v4028_v19 = vpack.c.bf16 %v2793_v41, %v2792_v7  ;;  %v2796_v20 = vmax.f32 %v2732_v9, 0.0  ;;  %v2797_v21 = vmax.f32 %v2733_v10, 0.0  ;;  %v2667_v22 = vmul.f32 %v5418_v45, %v2599_v6  ;;  %v2614_v7 = vld [vmem:[#allocation2 + $0x148] sm:$0xff] }
 0x47a   : > { %4163 = vst [vmem:[%s4960_s16 + $0x20] sm:$0xff] %v4023_v13   ;;  %v4033_v24 = vpack.c.bf16 %v2795_v15, %v2794_v14  ;;  %v2734_v27 = vadd.f32 %v5420_v8, %v2666_v16  ;;  %v2668_v28 = vmul.f32 %v5418_v45, %v2600_v11  ;;  %v2669_v29 = vmul.f32 %v5418_v45, %v2601_v12  ;;  %v2615_v16 = vld [vmem:[#allocation2 + $0x1d0] sm:$0xff] }
 0x47b   : > { %4164 = vst [vmem:[%s4960_s16 + $0x28] sm:$0xff] %v4028_v19   ;;  %v4038_v31 = vpack.c.bf16 %v2797_v21, %v2796_v20  ;;  %v2735_v32 = vadd.f32 %v5420_v8, %v2667_v22  ;;  %v2670_v35 = vmul.f32 %v5418_v45, %v2602_v17  ;;  %v2671_v36 = vmul.f32 %v5418_v45, %v2603_v18  ;;  %v2616_v21 = vld [vmem:[#allocation2 + $0x100] sm:$0xff]  ;;  %v2617_v22 = vld [vmem:[#allocation2 + $0xc8] sm:$0xff] }
 0x47c   : > { %4165 = vst [vmem:[%s4960_s16 + $0x30] sm:$0xff] %v4033_v24   ;;  %v2798_v38 = vmax.f32 %v2734_v27, 0.0  ;;  %v2736_v39 = vadd.f32 %v5420_v8, %v2668_v28  ;;  %v2737_v40 = vadd.f32 %v5420_v8, %v2669_v29  ;;  %v2672_v33 = vmul.f32 %v5418_v45, %v2604_v23  ;;  %v2618_v29 = vld [vmem:[#allocation2 + $0x40] sm:$0xff] }
 0x47d   : > { %4166 = vst [vmem:[%s4960_s16 + $0x38] sm:$0xff] %v4038_v31   ;;  %v2799_v34 = vmax.f32 %v2735_v32, 0.0  ;;  %v2738_v25 = vadd.f32 %v5420_v8, %v2670_v35  ;;  %v2739_v26 = vadd.f32 %v5420_v8, %v2671_v36  ;;  %v2673_v44 = vmul.f32 %v5418_v45, %v2605_v30  ;;  %v2619_v30 = vld [vmem:[#allocation2 + $0x1f8] sm:$0xff] }
 0x47e   : > { %v2800_v47 = vmax.f32 %v2736_v39, 0.0  ;;  %v2801_v46 = vmax.f32 %v2737_v40, 0.0  ;;  %v2740_v42 = vadd.f32 %v5420_v8, %v2672_v33  ;;  %v2674_v48 = vmul.f32 %v5418_v45, %v2606_v37  ;;  %v2620_v37 = vld [vmem:[#allocation2 + $0x20] sm:$0xff] }
 0x47f   : > { %v4043_v55 = vpack.c.bf16 %v2799_v34, %v2798_v38  ;;  %v2802_v56 = vmax.f32 %v2738_v25, 0.0  ;;  %v2803_v57 = vmax.f32 %v2739_v26, 0.0  ;;  %v2741_v58 = vadd.f32 %v5420_v8, %v2673_v44  ;;  %v2621_v34 = vld [vmem:[#allocation2 + $0x128] sm:$0xff] }
 0x480   : > { %v4048_v1 = vpack.c.bf16 %v2801_v46, %v2800_v47  ;;  %v2804_v49 = vmax.f32 %v2740_v42, 0.0  ;;  %v2675_v50 = vmul.f32 %v5418_v45, %v2607_v43  ;;  %v2742_v53 = vadd.f32 %v5420_v8, %v2674_v48  ;;  %v2622_v47 = vld [vmem:[#allocation2 + $0x1a0] sm:$0xff] }
 0x481   : > { %4167 = vst [vmem:[%s4960_s16 + $0x40] sm:$0xff] %v4043_v55   ;;  %v4053_v2 = vpack.c.bf16 %v2803_v57, %v2802_v56  ;;  %v2805_v59 = vmax.f32 %v2741_v58, 0.0  ;;  %v2676_v63 = vmul.f32 %v5418_v45, %v2608_v51  ;;  %v2677_v3 = vmul.f32 %v5418_v45, %v2609_v52  ;;  %v2623_v58 = vld [vmem:[#allocation2 + $0x1f0] sm:$0xff] }
 0x482   : > { %4168 = vst [vmem:[%s4960_s16 + $0x48] sm:$0xff] %v4048_v1   ;;  %v2743_v0 = vadd.f32 %v5420_v8, %v2675_v50  ;;  %v2806_v4 = vmax.f32 %v2742_v53, 0.0  ;;  %v2678_v5 = vmul.f32 %v5418_v45, %v2610_v61  ;;  %v2679_v6 = vmul.f32 %v5418_v45, %v2611_v62  ;;  %v2624_v50 = vld [vmem:[#allocation2 + $0xe8] sm:$0xff]  ;;  %v2625_v53 = vld [vmem:[#allocation2 + $0x78] sm:$0xff] }
 0x483   : > { %4169 = vst [vmem:[%s4960_s16 + $0x50] sm:$0xff] %v4053_v2   ;;  %v4058_v41 = vpack.c.bf16 %v2805_v59, %v2804_v49  ;;  %v2744_v9 = vadd.f32 %v5420_v8, %v2676_v63  ;;  %v2745_v10 = vadd.f32 %v5420_v8, %v2677_v3  ;;  %v2680_v11 = vmul.f32 %v5418_v45, %v2612_v54  ;;  %v2626_v3 = vld [vmem:[#allocation2 + $0x70] sm:$0xff] }
 0x484   : > { %v2807_v12 = vmax.f32 %v2743_v0, 0.0  ;;  %v2746_v13 = vadd.f32 %v5420_v8, %v2678_v5  ;;  %v2747_v14 = vadd.f32 %v5420_v8, %v2679_v6  ;;  %v2681_v15 = vmul.f32 %v5418_v45, %v2613_v60  ;;  %v2627_v60 = vld [vmem:[#allocation2 + $0x90] sm:$0xff] }
 0x485   : > { %4170 = vst [vmem:[%s4960_s16 + $0x58] sm:$0xff] %v4058_v41   ;;  %v2808_v17 = vmax.f32 %v2744_v9, 0.0  ;;  %v2809_v18 = vmax.f32 %v2745_v10, 0.0  ;;  %v2748_v19 = vadd.f32 %v5420_v8, %v2680_v11  ;;  %v2682_v20 = vmul.f32 %v5418_v45, %v2614_v7  ;;  %v2628_v7 = vld [vmem:[#allocation2 + $0x1d8] sm:$0xff] }
 0x486   : > { %v4063_v23 = vpack.c.bf16 %v2807_v12, %v2806_v4  ;;  %v2810_v24 = vmax.f32 %v2746_v13, 0.0  ;;  %v2811_v27 = vmax.f32 %v2747_v14, 0.0  ;;  %v2749_v28 = vadd.f32 %v5420_v8, %v2681_v15  ;;  %v2629_v12 = vld [vmem:[#allocation2 + $0xd0] sm:$0xff] }
 0x487   : > { %v4068_v31 = vpack.c.bf16 %v2809_v18, %v2808_v17  ;;  %v2812_v32 = vmax.f32 %v2748_v19, 0.0  ;;  %v2683_v35 = vmul.f32 %v5418_v45, %v2615_v16  ;;  %v2750_v36 = vadd.f32 %v5420_v8, %v2682_v20  ;;  %v2630_v17 = vld [vmem:[#allocation2 + $0xb8] sm:$0xff] }
 0x488   : > { %4171 = vst [vmem:[%s4960_s16 + $0x60] sm:$0xff] %v4063_v23   ;;  %v4073_v38 = vpack.c.bf16 %v2811_v27, %v2810_v24  ;;  %v2813_v39 = vmax.f32 %v2749_v28, 0.0  ;;  %v2684_v40 = vmul.f32 %v5418_v45, %v2616_v21  ;;  %v2685_v33 = vmul.f32 %v5418_v45, %v2617_v22  ;;  %v2631_v28 = vld [vmem:[#allocation2 + $0x88] sm:$0xff] }
 0x489   : > { %4172 = vst [vmem:[%s4960_s16 + $0x68] sm:$0xff] %v4068_v31   ;;  %v2751_v25 = vadd.f32 %v5420_v8, %v2683_v35  ;;  %v2814_v26 = vmax.f32 %v2750_v36, 0.0  ;;  %v2686_v44 = vmul.f32 %v5418_v45, %v2618_v29  ;;  %v2687_v43 = vmul.f32 %v5418_v45, %v2619_v30  ;;  %v2632_v35 = vld [vmem:[#allocation2 + $0xa8] sm:$0xff] }
 0x48a   : > { %4173 = vst [vmem:[%s4960_s16 + $0x70] sm:$0xff] %v4073_v38   ;;  %v4078_v46 = vpack.c.bf16 %v2813_v39, %v2812_v32  ;;  %v2752_v42 = vadd.f32 %v5420_v8, %v2684_v40  ;;  %v2753_v48 = vadd.f32 %v5420_v8, %v2685_v33  ;;  %v2688_v51 = vmul.f32 %v5418_v45, %v2620_v37  ;;  %v2633_v36 = vld [vmem:[#allocation2 + $0x1c8] sm:$0xff]  ;;  %v2634_v33 = vld [vmem:[#allocation2 + $0x170] sm:$0xff] }
 0x48b   : > { %v2815_v52 = vmax.f32 %v2751_v25, 0.0  ;;  %v2754_v55 = vadd.f32 %v5420_v8, %v2686_v44  ;;  %v2755_v56 = vadd.f32 %v5420_v8, %v2687_v43  ;;  %v2689_v57 = vmul.f32 %v5418_v45, %v2621_v34  ;;  %v2635_v34 = vld [vmem:[#allocation2 + $0x178] sm:$0xff] }
 0x48c   : > { %4174 = vst [vmem:[%s4960_s16 + $0x78] sm:$0xff] %v4078_v46   ;;  %v2816_v61 = vmax.f32 %v2752_v42, 0.0  ;;  %v2817_v62 = vmax.f32 %v2753_v48, 0.0  ;;  %v2756_v1 = vadd.f32 %v5420_v8, %v2688_v51  ;;  %v2690_v49 = vmul.f32 %v5418_v45, %v2622_v47  ;;  %v2636_v47 = vld [vmem:[#allocation2 + $0x68] sm:$0xff] }
 0x48d   : > { %v4083_v54 = vpack.c.bf16 %v2815_v52, %v2814_v26  ;;  %v2818_v2 = vmax.f32 %v2754_v55, 0.0  ;;  %v2819_v59 = vmax.f32 %v2755_v56, 0.0  ;;  %v2757_v63 = vadd.f32 %v5420_v8, %v2689_v57  ;;  %v2637_v52 = vld [vmem:[#allocation2 + $0x190] sm:$0xff] }
 0x48e   : > { %v4088_v0 = vpack.c.bf16 %v2817_v62, %v2816_v61  ;;  %v2820_v4 = vmax.f32 %v2756_v1, 0.0  ;;  %v2691_v5 = vmul.f32 %v5418_v45, %v2623_v58  ;;  %v2758_v6 = vadd.f32 %v5420_v8, %v2690_v49  ;;  %v2638_v61 = vld [vmem:[#allocation2 + $0x198] sm:$0xff] }
 0x48f   : > { %4175 = vst [vmem:[%s4960_s16 + $0x80] sm:$0xff] %v4083_v54   ;;  %v4093_v41 = vpack.c.bf16 %v2819_v59, %v2818_v2  ;;  %v2821_v9 = vmax.f32 %v2757_v63, 0.0  ;;  %v2692_v10 = vmul.f32 %v5418_v45, %v2624_v50  ;;  %v2693_v11 = vmul.f32 %v5418_v45, %v2625_v53  ;;  %v2639_v63 = vld [vmem:[#allocation2 + $0x38] sm:$0xff] }
 0x490   : > { %4176 = vst [vmem:[%s4960_s16 + $0x88] sm:$0xff] %v4088_v0   ;;  %v2759_v13 = vadd.f32 %v5420_v8, %v2691_v5  ;;  %v2822_v14 = vmax.f32 %v2758_v6, 0.0  ;;  %v2694_v15 = vmul.f32 %v5418_v45, %v2626_v3  ;;  %v2695_v16 = vmul.f32 %v5418_v45, %v2627_v60  ;;  %v2640_v5 = vld [vmem:[#allocation2 + $0xc0] sm:$0xff] }
 0x491   : > { %4177 = vst [vmem:[%s4960_s16 + $0x90] sm:$0xff] %v4093_v41   ;;  %v4098_v18 = vpack.c.bf16 %v2821_v9, %v2820_v4  ;;  %v2760_v19 = vadd.f32 %v5420_v8, %v2692_v10  ;;  %v2761_v20 = vadd.f32 %v5420_v8, %v2693_v11  ;;  %v2696_v21 = vmul.f32 %v5418_v45, %v2628_v7  ;;  %v2641_v6 = vld [vmem:[#allocation2 + $0x1c0] sm:$0xff]  ;;  %v2642_v11 = vld [vmem:[#allocation2 + $0x158] sm:$0xff] }
 0x492   : > { %v2823_v22 = vmax.f32 %v2759_v13, 0.0  ;;  %v2762_v23 = vadd.f32 %v5420_v8, %v2694_v15  ;;  %v2763_v24 = vadd.f32 %v5420_v8, %v2695_v16  ;;  %v2697_v27 = vmul.f32 %v5418_v45, %v2629_v12  ;;  %v2643_v12 = vld [vmem:[#allocation2 + $0x10] sm:$0xff] }
 0x493   : > { %4178 = vst [vmem:[%s4960_s16 + $0x98] sm:$0xff] %v4098_v18   ;;  %v2824_v29 = vmax.f32 %v2760_v19, 0.0  ;;  %v2825_v30 = vmax.f32 %v2761_v20, 0.0  ;;  %v2764_v31 = vadd.f32 %v5420_v8, %v2696_v21  ;;  %v2698_v32 = vmul.f32 %v5418_v45, %v2630_v17  ;;  %v2644_v17 = vld [vmem:[#allocation2 + $0x58] sm:$0xff] }
 0x494   : > { %v4103_v37 = vpack.c.bf16 %v2823_v22, %v2822_v14  ;;  %v2826_v38 = vmax.f32 %v2762_v23, 0.0  ;;  %v2827_v39 = vmax.f32 %v2763_v24, 0.0  ;;  %v2765_v40 = vadd.f32 %v5420_v8, %v2697_v27  ;;  %v2645_v22 = vld [vmem:[#allocation2 + $0xa0] sm:$0xff] }
 0x495   : > { %v4108_v25 = vpack.c.bf16 %v2825_v30, %v2824_v29  ;;  %v2828_v26 = vmax.f32 %v2764_v31, 0.0  ;;  %v2699_v44 = vmul.f32 %v5418_v45, %v2631_v28  ;;  %v2766_v43 = vadd.f32 %v5420_v8, %v2698_v32 }
 0x496   : > { %4179 = vst [vmem:[%s4960_s16 + $0xa0] sm:$0xff] %v4103_v37   ;;  %v4113_v46 = vpack.c.bf16 %v2827_v39, %v2826_v38  ;;  %v2829_v42 = vmax.f32 %v2765_v40, 0.0  ;;  %v2700_v48 = vmul.f32 %v5418_v45, %v2632_v35  ;;  %v2701_v51 = vmul.f32 %v5418_v45, %v2633_v36 }
 0x497   : > { %4180 = vst [vmem:[%s4960_s16 + $0xa8] sm:$0xff] %v4108_v25   ;;  %v2767_v55 = vadd.f32 %v5420_v8, %v2699_v44  ;;  %v2830_v56 = vmax.f32 %v2766_v43, 0.0  ;;  %v2702_v57 = vmul.f32 %v5418_v45, %v2634_v33  ;;  %v2703_v58 = vmul.f32 %v5418_v45, %v2635_v34 }
 0x498   : > { %4181 = vst [vmem:[%s4960_s16 + $0xb0] sm:$0xff] %v4113_v46   ;;  %v4118_v62 = vpack.c.bf16 %v2829_v42, %v2828_v26  ;;  %v2768_v1 = vadd.f32 %v5420_v8, %v2700_v48  ;;  %v2769_v49 = vadd.f32 %v5420_v8, %v2701_v51  ;;  %v2704_v50 = vmul.f32 %v5418_v45, %v2636_v47 }
 0x499   : > { %v2831_v53 = vmax.f32 %v2767_v55, 0.0  ;;  %v2770_v54 = vadd.f32 %v5420_v8, %v2702_v57  ;;  %v2771_v2 = vadd.f32 %v5420_v8, %v2703_v58  ;;  %v2705_v59 = vmul.f32 %v5418_v45, %v2637_v52 }
 0x49a   : > { %4182 = vst [vmem:[%s4960_s16 + $0xb8] sm:$0xff] %v4118_v62   ;;  %v2832_v3 = vmax.f32 %v2768_v1, 0.0  ;;  %v2833_v60 = vmax.f32 %v2769_v49, 0.0  ;;  %v2772_v0 = vadd.f32 %v5420_v8, %v2704_v50  ;;  %v2706_v4 = vmul.f32 %v5418_v45, %v2638_v61 }
 0x49b   : > { %v4123_v7 = vpack.c.bf16 %v2831_v53, %v2830_v56  ;;  %v2834_v41 = vmax.f32 %v2770_v54, 0.0  ;;  %v2835_v9 = vmax.f32 %v2771_v2, 0.0  ;;  %v2773_v10 = vadd.f32 %v5420_v8, %v2705_v59 }
 0x49c   : > { %v4128_v13 = vpack.c.bf16 %v2833_v60, %v2832_v3  ;;  %v2836_v14 = vmax.f32 %v2772_v0, 0.0  ;;  %v2707_v15 = vmul.f32 %v5418_v45, %v2639_v63  ;;  %v2774_v16 = vadd.f32 %v5420_v8, %v2706_v4 }
 0x49d   : > { %4183 = vst [vmem:[%s4960_s16 + $0xc0] sm:$0xff] %v4123_v7   ;;  %v4133_v18 = vpack.c.bf16 %v2835_v9, %v2834_v41  ;;  %v2837_v19 = vmax.f32 %v2773_v10, 0.0  ;;  %v2708_v20 = vmul.f32 %v5418_v45, %v2640_v5  ;;  %v2709_v21 = vmul.f32 %v5418_v45, %v2641_v6 }
 0x49e   : > { %4184 = vst [vmem:[%s4960_s16 + $0xc8] sm:$0xff] %v4128_v13   ;;  %v2775_v23 = vadd.f32 %v5420_v8, %v2707_v15  ;;  %v2838_v24 = vmax.f32 %v2774_v16, 0.0  ;;  %v2710_v27 = vmul.f32 %v5418_v45, %v2642_v11  ;;  %v2711_v28 = vmul.f32 %v5418_v45, %v2643_v12 }
 0x49f   : > { %4185 = vst [vmem:[%s4960_s16 + $0xd0] sm:$0xff] %v4133_v18   ;;  %v4138_v29 = vpack.c.bf16 %v2837_v19, %v2836_v14  ;;  %v2776_v30 = vadd.f32 %v5420_v8, %v2708_v20  ;;  %v2777_v31 = vadd.f32 %v5420_v8, %v2709_v21  ;;  %v2712_v32 = vmul.f32 %v5418_v45, %v2644_v17 }
 0x4a0   : > { %v2839_v35 = vmax.f32 %v2775_v23, 0.0  ;;  %v2778_v36 = vadd.f32 %v5420_v8, %v2710_v27  ;;  %v2779_v37 = vadd.f32 %v5420_v8, %v2711_v28  ;;  %v2713_v38 = vmul.f32 %v5418_v45, %v2645_v22 }
 0x4a1   : > { %4186 = vst [vmem:[%s4960_s16 + $0xd8] sm:$0xff] %v4138_v29   ;;  %v2840_v39 = vmax.f32 %v2776_v30, 0.0  ;;  %v2841_v40 = vmax.f32 %v2777_v31, 0.0  ;;  %v2780_v33 = vadd.f32 %v5420_v8, %v2712_v32 }
 0x4a2   : > { %v4143_v34 = vpack.c.bf16 %v2839_v35, %v2838_v24  ;;  %v2842_v25 = vmax.f32 %v2778_v36, 0.0  ;;  %v2843_v26 = vmax.f32 %v2779_v37, 0.0  ;;  %v2781_v44 = vadd.f32 %v5420_v8, %v2713_v38 }
 0x4a3   : > { %v4148_v43 = vpack.c.bf16 %v2841_v40, %v2840_v39  ;;  %v2844_v47 = vmax.f32 %v2780_v33, 0.0 }
 0x4a4   : > { %4187 = vst [vmem:[%s4960_s16 + $0xe0] sm:$0xff] %v4143_v34   ;;  %v4153_v46 = vpack.c.bf16 %v2843_v26, %v2842_v25  ;;  %v2845_v42 = vmax.f32 %v2781_v44, 0.0 }
 0x4a5   : > { %4188 = vst [vmem:[%s4960_s16 + $0xe8] sm:$0xff] %v4148_v43  }
 0x4a6   : > { %4189 = vst [vmem:[%s4960_s16 + $0xf0] sm:$0xff] %v4153_v46   ;;  %v4158_v48 = vpack.c.bf16 %v2845_v42, %v2844_v47 }
 0x4a8   : > { %4190 = vst [vmem:[%s4960_s16 + $0xf8] sm:$0xff] %v4158_v48  }
 0x4a9 PF: > { %s5719_s5 = sld [smem:[#allocation21_spill]]  ;;  %s2987_s21 = sshll.u32 %s4960_s16, 4  ;;  %s2988_s21 = int_to_ptr.vmem [resolvable:$true] %s2987_s21 }
 0x4aa   : > { %s5721_s27 = sld [smem:[#allocation43_spill]]  ;;  %s2975_s14 = scalar_lea.sflag [#allocation5], %s346_s9 }
 0x4af   : > { %s3999_s12 = sshll.u32 %s5719_s5, 8 }
 0x4b0   : > { %s5722_s3 = smov %s5721_s27  ;;  %s2986_s30 = scalar_lea.hbm %s5721_s27, %s3999_s12 }
 0x4b1   : > { %s2989_s4 = sshll.u32 %s2986_s30, 4  ;;  %s4557_s13 = scalar_lea.hbm %s5722_s3, 512  ;;  %s2990_s4 = int_to_ptr.hbm [resolvable:$true] %s2989_s4 }
 0x4b2   : > { %s4551_s8 = sshra.s32 %s2990_s4, 4  ;;  %s4552_s8 = int_to_ptr.hbm [resolvable:$true] %s4551_s8 }
 0x4b3   : > { %s4553_s26 = scalar_lea.hbm %s4552_s8, 256  ;;  %p4558_p11 = scmp.lt.s32.totalorder %s4552_s8, %s5722_s3 }
 0x4b4   : > { %p4554_p6 = scmp.ne.s32.totalorder %s4552_s8, %s4553_s26  ;;  %p4559_p0 = scmp.lt.s32.totalorder %s4557_s13, %s4553_s26 }
 0x4b6   : > { %p4555_p13 = pnand %p4554_p6, %p4828_p8  ;;  %p4560_p3 = por %p4559_p0, %p4558_p11 }
 0x4b8   : > { %p4556_p7 = pneg %p4555_p13 }
 0x4ba   : > { %p4561_p5 = pnand %p4560_p3, %p4556_p7 }
 0x4bc   : > { %4564 = shalt.err (!%p4561_p5)
}
 0x4bd   : > { %s4706_s9 = smov 64   ;;  %s4707_s16 = smov 4  }
 0x4be   : > { %4231 = dma.vmem_to_hbm [thread:$0]  (%p4828_p8), %s2988_s21, 4096, %s2990_s4, %s2975_s14, %s4706_s9, %s4706_s9, %s4707_s16  }
 0x4bf PF: > { %s5723_s10 = sld [smem:[#allocation18_spill]]  ;;  %p4261_p10 = scmp.ge.s32.totalorder %s4695_s6, 2 }
 0x4c1   : > { %p4251_p2 = pnand %p4261_p10, %p4834_p12 }
 0x4c3   : > { %p4252_p9 = pneg %p4251_p2 }
 0x4c5   : > { %s3004_s5 = sand.u32 1, %s5723_s10  }
 0x4c6   : > { %s3005_s12 = scalar_lea.sflag [#allocation5], %s3004_s5 }
 0x4c7   : > { %4638 = dma.done.wait (%p4252_p9), %s3005_s12, 4096  }
 0x4c8   : > { %4640 = vsyncadd (%p4252_p9), %s3005_s12, 4294963200  ;;  %s25_s6 = sadd.s32 1, %s4695_s6   ;;  %s5726_s17 = sld [smem:[#allocation27_spill]] }
 0x4c9   : > { %p5604_p4 = scmp.ge.s32.totalorder %s25_s6, 6   ;;  %s5727_s27 = sld [smem:[#allocation19_spill]] }
 0x4ca   : > { %s5728_s26 = sld [smem:[#allocation28_spill]]  ;;  %s5732_s18 = smov %s4647_s19 }
 0x4cb   : > { %s5729_s28 = sld [smem:[#allocation22_spill]]  ;;  %s5733_s19 = smov %s4651_s20 }
 0x4cc   : > { %s5730_s30 = sld [smem:[#allocation25_spill]]  ;;  %s5735_s21 = smov %s4659_s22 }
 0x4cd   : > { %s5731_s4 = sld [smem:[#allocation26_spill]]  ;;  %s5736_s22 = smov %s4663_s23 }
 0x4ce   : > { %s5734_s20 = smov %s5726_s17  ;;  %s5737_s23 = smov %s4918_s2 }
 0x4cf   : > { %s5738_s24 = smov %s4671_s25  ;;  %s5739_s25 = smov %s5727_s27 }
 0x4d0   : > { %s5740_s27 = smov %s4687_s29  ;;  %24 = sbr.rel (!%p5604_p4) target bundleno = 19 (0x13), region = 118 }
 0x4d2   : > { %s5741_s29 = smov %s5730_s30 }
 0x4d3   : > { %s5742_s30 = smov %s5731_s4 }
 0x4d5   :  { %3011 = vsyncpa [#allocation4], 1 }
 0x4d6   :  { %3013 = vsyncpa [#allocation4 + $0x1], 1 }
 0x4d7   :  { %3014 = vsyncpa [#allocation7], 1 }
 0x4d8   :  { %3016 = vsyncpa [#allocation7 + $0x1], 1 }
 0x4d9   :  { %3017 = vsyncpa [#allocation10], 1 }
 0x4da   :  { %3018 = vsyncpa [#allocation5], 1 }
 0x4db   :  { %3020 = vsyncpa [#allocation5 + $0x1], 1 }

</bundles_post_ra>
